<compile_context>
chip_gen: v5e
topology: v5e:2x2
jax: 0.10.0
libtpu: 0.0.40
codegen_flags: <defaults>
</compile_context>

<pallas_src>
import functools

import jax
import jax.numpy as jnp
from jax import lax
from jax.experimental import pallas as pl
from jax.experimental.pallas import tpu as pltpu

LAYERS = [64, 128, 128, 256, 128]
INPUT_DIM = 3
MAX_TILE_N = 4096                   # points per grid step (multiple of 128)
VMEM_LIMIT_BYTES = 48 * 1024 * 1024


def _pointnet_kernel(n_layers, din0, tile_n, total_n, n_tiles, tiles_per_split,
                     guard_tiles, x_ref, *refs):
    """refs = (w0, b0, w1, b1, ..., w_{L-1}, b_{L-1}, out_ref).

    x_ref:   (1, Din, tile_n)  points, channel-first / lane-dense
    w_i:     (dout_i, din_i)   torch nn.Linear layout (layer 0 f32, rest bf16)
    b_i:     (dout_i, 1)       f32 column
    out_ref: (1, 1, F_out, 1)  running max, revisited across the tile axis
    """
    o_ref = refs[-1]
    prefs = refs[:-1]
    s_idx = pl.program_id(0)          # reduction split (keeps 2 TCs busy on v7x)
    n_idx = pl.program_id(2)          # tile index within the split (reduction)

    # Fresh accumulator for every (split, batch) output block.
    @pl.when(n_idx == 0)
    def _init():
        o_ref[...] = jnp.full(o_ref.shape, -jnp.inf, o_ref.dtype)

    def _tile_update():
        x = x_ref[0].astype(jnp.float32)                  # (Din, tile_n)

        # ---- Layer 0 on the VPU: K = Din is tiny, a matmul would idle the MXU.
        w0 = prefs[0][...]                                # (d1, Din) f32
        b0 = prefs[1][...]                                # (d1, 1)  f32
        h = w0[:, 0:1] * x[0:1, :]                        # broadcast FMA
        for c in range(1, din0):
            h = h + w0[:, c:c + 1] * x[c:c + 1, :]
        h = h + b0                                        # (d1, tile_n) f32

        # ---- Remaining layers on the MXU (bf16 operands, f32 accumulation).
        for i in range(1, n_layers):
            h = jnp.maximum(h, 0.0)                       # ReLU after prev linear
            w = prefs[2 * i][...]                         # (dout, din) bf16
            b = prefs[2 * i + 1][...]                     # (dout, 1)  f32
            h = jnp.dot(w, h.astype(w.dtype),
                        preferred_element_type=jnp.float32) + b

        # ---- Mask lanes of a ragged last tile so padding never wins the max.
        tile_idx = s_idx * tiles_per_split + n_idx
        if total_n % tile_n != 0:
            col = tile_idx * tile_n + lax.broadcasted_iota(jnp.int32, h.shape, 1)
            h = jnp.where(col < total_n, h, -jnp.inf)

        tile_max = jnp.max(h, axis=1, keepdims=True)      # (F_out, 1)
        o_ref[...] = jnp.maximum(o_ref[...], tile_max.reshape(o_ref.shape))

    if guard_tiles:
        # Split grid is padded: skip tiles past the end (their x block was
        # clamped to the last valid tile by the index_map, so DMA is in-bounds).
        pl.when(s_idx * tiles_per_split + n_idx < n_tiles)(_tile_update)
    else:
        _tile_update()


def pointnet_encoder(x, weights, biases, *, max_tile_n=MAX_TILE_N, n_split=2,
                     compute_dtype=jnp.bfloat16,
                     vmem_limit_bytes=VMEM_LIMIT_BYTES,
                     single_buffer_params=True):
    """x: (B, N, Din). weights[i]: (dout_i, din_i) torch layout, biases[i]: (dout_i,)."""
    B, N, Din = x.shape
    n_layers = len(weights)
    assert weights[0].shape[1] == Din
    assert max_tile_n % 128 == 0
    f_out = weights[-1].shape[0]

    # Channel-first, lane-dense points layout.  Kept in x's native dtype (the
    # f32 cast happens inside the kernel -- no extra HBM pass for a cast).
    x_t = jnp.transpose(x, (0, 2, 1))                     # (B, Din, N)

    tile_n = N if N <= max_tile_n else max_tile_n
    n_tiles = pl.cdiv(N, tile_n)

    # 2-way split of the points reduction so both v7x TensorCores have work
    # even at B == 1; near-free on single-core chips (padded tiles are skipped).
    n_split_eff = min(n_split, n_tiles) if (n_split > 1 and n_tiles > 1) else 1
    tiles_per_split = pl.cdiv(n_tiles, n_split_eff)
    guard_tiles = n_split_eff * tiles_per_split != n_tiles

    kernel = functools.partial(_pointnet_kernel, n_layers, Din, tile_n, N,
                               n_tiles, tiles_per_split, guard_tiles)

    def x_index_map(s, b, n):
        # Clamp keeps the DMA in-bounds for padded split tiles; duplicate
        # (clamped) tiles are either skipped or harmless for a max reduction.
        return (b, 0, jnp.minimum(s * tiles_per_split + n, n_tiles - 1))

    def param_spec(shape, single_buffer):
        if single_buffer:
            return pl.BlockSpec(shape, lambda s, b, n: (0, 0),
                                pipeline_mode=pl.Buffered(1))
        return pl.BlockSpec(shape, lambda s, b, n: (0, 0))

    def run(single_buffer):
        in_specs = [pl.BlockSpec((1, Din, tile_n), x_index_map)]
        args = [x_t]
        for i, (w, bvec) in enumerate(zip(weights, biases)):
            dout, din = w.shape
            # Layer 0 stays f32 (VPU path); later layers feed the MXU in bf16.
            # (These casts are tiny; hoist/cache them if calling repeatedly.)
            args.append(w.astype(jnp.float32 if i == 0 else compute_dtype))
            args.append(bvec.reshape(dout, 1).astype(jnp.float32))
            in_specs.append(param_spec((dout, din), single_buffer))
            in_specs.append(param_spec((dout, 1), single_buffer))

        dims = [Din] + [wt.shape[0] for wt in weights]
        flops = 2 * B * N * sum(dims[i] * dims[i + 1] for i in range(n_layers))
        bytes_accessed = (sum(int(a.size) * a.dtype.itemsize for a in args)
                          + n_split_eff * B * f_out * 4)

        return pl.pallas_call(
            kernel,
            out_shape=jax.ShapeDtypeStruct((n_split_eff, B, f_out, 1),
                                           jnp.float32),
            grid=(n_split_eff, B, tiles_per_split),
            in_specs=in_specs,
            out_specs=pl.BlockSpec((1, 1, f_out, 1),
                                   lambda s, b, n: (s, b, 0, 0)),
            compiler_params=pltpu.CompilerParams(
                dimension_semantics=("parallel", "parallel", "arbitrary"),
                vmem_limit_bytes=vmem_limit_bytes),
            cost_estimate=pl.CostEstimate(
                flops=flops, transcendentals=0, bytes_accessed=bytes_accessed),
        )(*args)

    if single_buffer_params:
        try:
            partial_max = run(True)
        except Exception:        # pl.Buffered(1) unsupported -> default buffering
            partial_max = run(False)
    else:
        partial_max = run(False)

    # Combine per-split partial maxima (tiny: n_split * B * F_out values).
    return jnp.max(partial_max, axis=0).reshape(B, f_out)


def init_params(key, input_dim=INPUT_DIM, layers=LAYERS):
    """Deterministic synthetic parameters in torch layout: W_i is (dout, din)."""
    dims = [input_dim] + list(layers)
    weights, biases = [], []
    for i in range(len(dims) - 1):
        key, kw, kb = jax.random.split(key, 3)
        bound = 1.0 / float(dims[i]) ** 0.5        # torch.nn.Linear default scale
        weights.append(jax.random.uniform(kw, (dims[i + 1], dims[i]), jnp.float32,
                                          minval=-bound, maxval=bound))
        biases.append(jax.random.uniform(kb, (dims[i + 1],), jnp.float32,
                                         minval=-bound, maxval=bound))
    return weights, biases


def pointnet_reference(x, weights, biases, compute_dtype=jnp.bfloat16):
    """Pure-JAX reference mirroring the kernel's numerics (bf16 MXU operands)."""
    h = x.astype(jnp.float32)                              # (B, N, Din)
    w0 = weights[0].astype(jnp.float32)                    # (d1, Din)
    a = h[..., 0:1] * w0[:, 0][None, None, :]
    for c in range(1, w0.shape[1]):
        a = a + h[..., c:c + 1] * w0[:, c][None, None, :]
    h = a + biases[0].astype(jnp.float32)[None, None, :]
    for i in range(1, len(weights)):
        h = jnp.maximum(h, 0.0)
        h = jnp.einsum("bnf,gf->bng", h.astype(compute_dtype),
                       weights[i].astype(compute_dtype),
                       preferred_element_type=jnp.float32) \
            + biases[i].astype(jnp.float32)
    return jnp.max(h, axis=1)


if __name__ == "__main__":
    key = jax.random.PRNGKey(0)
    key, kx1, kx2, kx3 = jax.random.split(key, 4)
    weights, biases = init_params(key)

    # Case 1: single tile, no reduction split (B=2, N=16, Din=3).
    x1 = jax.random.normal(kx1, (2, 16, INPUT_DIM), jnp.float32)
    out1 = jax.block_until_ready(pointnet_encoder(x1, weights, biases))
    ref1 = pointnet_reference(x1, weights, biases)
    assert out1.shape == (2, LAYERS[-1])
    assert jnp.allclose(out1, ref1, atol=1e-2, rtol=1e-2), "mismatch (case 1)"

    # Case 2: N-tiling, 2-way reduction split, ragged + clamped/skipped tiles
    # (N=600, tile=128 -> 5 tiles -> splits of 3, last padded block skipped).
    x2 = jax.random.normal(kx2, (2, 600, INPUT_DIM), jnp.float32)
    out2 = jax.block_until_ready(
        pointnet_encoder(x2, weights, biases, max_tile_n=128))
    ref2 = pointnet_reference(x2, weights, biases)
    assert out2.shape == (2, LAYERS[-1])
    assert jnp.allclose(out2, ref2, atol=1e-2, rtol=1e-2), "mismatch (case 2)"

    # Case 3: B=1 with an even split (N=256, tile=128 -> 2 tiles, 1 per split).
    x3 = jax.random.normal(kx3, (1, 256, INPUT_DIM), jnp.float32)
    out3 = jax.block_until_ready(
        pointnet_encoder(x3, weights, biases, max_tile_n=128))
    ref3 = pointnet_reference(x3, weights, biases)
    assert out3.shape == (1, LAYERS[-1])
    assert jnp.allclose(out3, ref3, atol=1e-2, rtol=1e-2), "mismatch (case 3)"

    print("KERNEL_OK")
</pallas_src>

<mosaic_0001>
module attributes {stable_mosaic.version = 11 : i64} {
  func.func @_pointnet_kernel(%arg0: i32, %arg1: i32, %arg2: i32, %arg3: memref<1x3x16xf32, #tpu.memory_space<vmem>>, %arg4: memref<64x3xf32, #tpu.memory_space<vmem>>, %arg5: memref<64x1xf32, #tpu.memory_space<vmem>>, %arg6: memref<128x64xbf16, #tpu.memory_space<vmem>>, %arg7: memref<128x1xf32, #tpu.memory_space<vmem>>, %arg8: memref<128x128xbf16, #tpu.memory_space<vmem>>, %arg9: memref<128x1xf32, #tpu.memory_space<vmem>>, %arg10: memref<256x128xbf16, #tpu.memory_space<vmem>>, %arg11: memref<256x1xf32, #tpu.memory_space<vmem>>, %arg12: memref<128x256xbf16, #tpu.memory_space<vmem>>, %arg13: memref<128x1xf32, #tpu.memory_space<vmem>>, %arg14: memref<1x1x128x1xf32, #tpu.memory_space<vmem>>) attributes {dimension_semantics = [#tpu.dimension_semantics<parallel>, #tpu.dimension_semantics<parallel>, #tpu.dimension_semantics<arbitrary>], iteration_bounds = array<i64: 1, 2, 1>, scalar_prefetch = 0 : i64, scratch_operands = 0 : i64, tpu.core_type = #tpu.core_type<tc>, window_params = [{transform_indices = @transform_0, window_bounds = array<i64: 1, 3, 16>}, {pipeline_mode = #tpu.pipeline_mode<synchronous>, transform_indices = @transform_1, window_bounds = array<i64: 64, 3>}, {pipeline_mode = #tpu.pipeline_mode<synchronous>, transform_indices = @transform_2, window_bounds = array<i64: 64, 1>}, {pipeline_mode = #tpu.pipeline_mode<synchronous>, transform_indices = @transform_3, window_bounds = array<i64: 128, 64>}, {pipeline_mode = #tpu.pipeline_mode<synchronous>, transform_indices = @transform_4, window_bounds = array<i64: 128, 1>}, {pipeline_mode = #tpu.pipeline_mode<synchronous>, transform_indices = @transform_5, window_bounds = array<i64: 128, 128>}, {pipeline_mode = #tpu.pipeline_mode<synchronous>, transform_indices = @transform_6, window_bounds = array<i64: 128, 1>}, {pipeline_mode = #tpu.pipeline_mode<synchronous>, transform_indices = @transform_7, window_bounds = array<i64: 256, 128>}, {pipeline_mode = #tpu.pipeline_mode<synchronous>, transform_indices = @transform_8, window_bounds = array<i64: 256, 1>}, {pipeline_mode = #tpu.pipeline_mode<synchronous>, transform_indices = @transform_9, window_bounds = array<i64: 128, 256>}, {pipeline_mode = #tpu.pipeline_mode<synchronous>, transform_indices = @transform_10, window_bounds = array<i64: 128, 1>}, {transform_indices = @transform_11, window_bounds = array<i64: 1, 1, 128, 1>}]} {
    %c0_i32 = arith.constant 0 : i32
    %0 = arith.cmpi eq, %arg2, %c0_i32 : i32
    %1 = arith.extui %0 : i1 to i32
    %c0_i32_0 = arith.constant 0 : i32
    %2 = arith.cmpi ne, %1, %c0_i32_0 : i32
    scf.if %2 {
      %cst_39 = arith.constant 0xFF800000 : f32
      %64 = vector.broadcast %cst_39 : f32 to vector<1x1x128x1xf32>
      %c0_40 = arith.constant 0 : index
      %c0_41 = arith.constant 0 : index
      %c0_42 = arith.constant 0 : index
      %c0_43 = arith.constant 0 : index
      %65 = vector.load %arg14[%c0_40, %c0_41, %c0_42, %c0_43] : memref<1x1x128x1xf32, #tpu.memory_space<vmem>>, vector<1x1x128x1xf32>
      tpu.vector_store %arg14[%c0_40, %c0_41, %c0_42, %c0_43], %64 {strides = array<i32>} : memref<1x1x128x1xf32, #tpu.memory_space<vmem>>, vector<1x1x128x1xf32>,
    } else {
    }
    %c0 = arith.constant 0 : index
    %c0_1 = arith.constant 0 : index
    %c0_2 = arith.constant 0 : index
    %3 = vector.load %arg3[%c0, %c0_1, %c0_2] : memref<1x3x16xf32, #tpu.memory_space<vmem>>, vector<1x3x16xf32>
    %4 = vector.shape_cast %3 : vector<1x3x16xf32> to vector<3x16xf32>
    %c0_3 = arith.constant 0 : index
    %c0_4 = arith.constant 0 : index
    %5 = vector.load %arg4[%c0_3, %c0_4] : memref<64x3xf32, #tpu.memory_space<vmem>>, vector<64x3xf32>
    %c0_5 = arith.constant 0 : index
    %c0_6 = arith.constant 0 : index
    %6 = vector.load %arg5[%c0_5, %c0_6] : memref<64x1xf32, #tpu.memory_space<vmem>>, vector<64x1xf32>
    %7 = vector.extract_strided_slice %5 {offsets = [0, 0], sizes = [64, 1], strides = [1, 1]} : vector<64x3xf32> to vector<64x1xf32>
    %8 = vector.extract_strided_slice %4 {offsets = [0, 0], sizes = [1, 16], strides = [1, 1]} : vector<3x16xf32> to vector<1x16xf32>
    %9 = vector.broadcast %7 : vector<64x1xf32> to vector<64x16xf32>
    %10 = vector.broadcast %8 : vector<1x16xf32> to vector<64x16xf32>
    %11 = arith.mulf %9, %10 : vector<64x16xf32>
    %12 = vector.extract_strided_slice %5 {offsets = [0, 1], sizes = [64, 1], strides = [1, 1]} : vector<64x3xf32> to vector<64x1xf32>
    %13 = vector.extract_strided_slice %4 {offsets = [1, 0], sizes = [1, 16], strides = [1, 1]} : vector<3x16xf32> to vector<1x16xf32>
    %14 = vector.broadcast %12 : vector<64x1xf32> to vector<64x16xf32>
    %15 = vector.broadcast %13 : vector<1x16xf32> to vector<64x16xf32>
    %16 = arith.mulf %14, %15 : vector<64x16xf32>
    %17 = arith.addf %11, %16 : vector<64x16xf32>
    %18 = vector.extract_strided_slice %5 {offsets = [0, 2], sizes = [64, 1], strides = [1, 1]} : vector<64x3xf32> to vector<64x1xf32>
    %19 = vector.extract_strided_slice %4 {offsets = [2, 0], sizes = [1, 16], strides = [1, 1]} : vector<3x16xf32> to vector<1x16xf32>
    %20 = vector.broadcast %18 : vector<64x1xf32> to vector<64x16xf32>
    %21 = vector.broadcast %19 : vector<1x16xf32> to vector<64x16xf32>
    %22 = arith.mulf %20, %21 : vector<64x16xf32>
    %23 = arith.addf %17, %22 : vector<64x16xf32>
    %24 = vector.broadcast %6 : vector<64x1xf32> to vector<64x16xf32>
    %25 = arith.addf %23, %24 : vector<64x16xf32>
    %cst = arith.constant 0.000000e+00 : f32
    %26 = vector.broadcast %cst : f32 to vector<64x16xf32>
    %27 = arith.maximumf %25, %26 : vector<64x16xf32>
    %c0_7 = arith.constant 0 : index
    %c0_8 = arith.constant 0 : index
    %28 = vector.load %arg6[%c0_7, %c0_8] : memref<128x64xbf16, #tpu.memory_space<vmem>>, vector<128x64xbf16>
    %c0_9 = arith.constant 0 : index
    %c0_10 = arith.constant 0 : index
    %29 = vector.load %arg7[%c0_9, %c0_10] : memref<128x1xf32, #tpu.memory_space<vmem>>, vector<128x1xf32>
    %30 = arith.truncf %27 : vector<64x16xf32> to vector<64x16xbf16>
    %cst_11 = arith.constant dense<0.000000e+00> : vector<128x16xf32>
    %31 = tpu.matmul %28, %30, %cst_11 {dimension_numbers = #tpu.dot_dimension_numbers<[1], [0], [0], [1], [0, 0, 1, 1], [], []>} : vector<128x64xbf16>, vector<64x16xbf16>, vector<128x16xf32> -> vector<128x16xf32>
    %32 = vector.broadcast %29 : vector<128x1xf32> to vector<128x16xf32>
    %33 = arith.addf %31, %32 : vector<128x16xf32>
    %cst_12 = arith.constant 0.000000e+00 : f32
    %34 = vector.broadcast %cst_12 : f32 to vector<128x16xf32>
    %35 = arith.maximumf %33, %34 : vector<128x16xf32>
    %c0_13 = arith.constant 0 : index
    %c0_14 = arith.constant 0 : index
    %36 = vector.load %arg8[%c0_13, %c0_14] : memref<128x128xbf16, #tpu.memory_space<vmem>>, vector<128x128xbf16>
    %c0_15 = arith.constant 0 : index
    %c0_16 = arith.constant 0 : index
    %37 = vector.load %arg9[%c0_15, %c0_16] : memref<128x1xf32, #tpu.memory_space<vmem>>, vector<128x1xf32>
    %38 = arith.truncf %35 : vector<128x16xf32> to vector<128x16xbf16>
    %cst_17 = arith.constant dense<0.000000e+00> : vector<128x16xf32>
    %39 = tpu.matmul %36, %38, %cst_17 {dimension_numbers = #tpu.dot_dimension_numbers<[1], [0], [0], [1], [0, 0, 1, 1], [], []>} : vector<128x128xbf16>, vector<128x16xbf16>, vector<128x16xf32> -> vector<128x16xf32>
    %40 = vector.broadcast %37 : vector<128x1xf32> to vector<128x16xf32>
    %41 = arith.addf %39, %40 : vector<128x16xf32>
    %cst_18 = arith.constant 0.000000e+00 : f32
    %42 = vector.broadcast %cst_18 : f32 to vector<128x16xf32>
    %43 = arith.maximumf %41, %42 : vector<128x16xf32>
    %c0_19 = arith.constant 0 : index
    %c0_20 = arith.constant 0 : index
    %44 = vector.load %arg10[%c0_19, %c0_20] : memref<256x128xbf16, #tpu.memory_space<vmem>>, vector<256x128xbf16>
    %c0_21 = arith.constant 0 : index
    %c0_22 = arith.constant 0 : index
    %45 = vector.load %arg11[%c0_21, %c0_22] : memref<256x1xf32, #tpu.memory_space<vmem>>, vector<256x1xf32>
    %46 = arith.truncf %43 : vector<128x16xf32> to vector<128x16xbf16>
    %cst_23 = arith.constant dense<0.000000e+00> : vector<256x16xf32>
    %47 = tpu.matmul %44, %46, %cst_23 {dimension_numbers = #tpu.dot_dimension_numbers<[1], [0], [0], [1], [0, 0, 1, 1], [], []>} : vector<256x128xbf16>, vector<128x16xbf16>, vector<256x16xf32> -> vector<256x16xf32>
    %48 = vector.broadcast %45 : vector<256x1xf32> to vector<256x16xf32>
    %49 = arith.addf %47, %48 : vector<256x16xf32>
    %cst_24 = arith.constant 0.000000e+00 : f32
    %50 = vector.broadcast %cst_24 : f32 to vector<256x16xf32>
    %51 = arith.maximumf %49, %50 : vector<256x16xf32>
    %c0_25 = arith.constant 0 : index
    %c0_26 = arith.constant 0 : index
    %52 = vector.load %arg12[%c0_25, %c0_26] : memref<128x256xbf16, #tpu.memory_space<vmem>>, vector<128x256xbf16>
    %c0_27 = arith.constant 0 : index
    %c0_28 = arith.constant 0 : index
    %53 = vector.load %arg13[%c0_27, %c0_28] : memref<128x1xf32, #tpu.memory_space<vmem>>, vector<128x1xf32>
    %54 = arith.truncf %51 : vector<256x16xf32> to vector<256x16xbf16>
    %cst_29 = arith.constant dense<0.000000e+00> : vector<128x16xf32>
    %55 = tpu.matmul %52, %54, %cst_29 {dimension_numbers = #tpu.dot_dimension_numbers<[1], [0], [0], [1], [0, 0, 1, 1], [], []>} : vector<128x256xbf16>, vector<256x16xbf16>, vector<128x16xf32> -> vector<128x16xf32>
    %56 = vector.broadcast %53 : vector<128x1xf32> to vector<128x16xf32>
    %57 = arith.addf %55, %56 : vector<128x16xf32>
    %cst_30 = arith.constant dense<0xFF800000> : vector<128xf32>
    %58 = vector.multi_reduction <maximumf>, %57, %cst_30 [1] : vector<128x16xf32> to vector<128xf32>
    %59 = vector.shape_cast %58 : vector<128xf32> to vector<128x1xf32>
    %c0_31 = arith.constant 0 : index
    %c0_32 = arith.constant 0 : index
    %c0_33 = arith.constant 0 : index
    %c0_34 = arith.constant 0 : index
    %60 = vector.load %arg14[%c0_31, %c0_32, %c0_33, %c0_34] : memref<1x1x128x1xf32, #tpu.memory_space<vmem>>, vector<1x1x128x1xf32>
    %61 = vector.shape_cast %59 : vector<128x1xf32> to vector<1x1x128x1xf32>
    %62 = arith.maximumf %60, %61 : vector<1x1x128x1xf32>
    %c0_35 = arith.constant 0 : index
    %c0_36 = arith.constant 0 : index
    %c0_37 = arith.constant 0 : index
    %c0_38 = arith.constant 0 : index
    %63 = vector.load %arg14[%c0_35, %c0_36, %c0_37, %c0_38] : memref<1x1x128x1xf32, #tpu.memory_space<vmem>>, vector<1x1x128x1xf32>
    tpu.vector_store %arg14[%c0_35, %c0_36, %c0_37, %c0_38], %62 {strides = array<i32>} : memref<1x1x128x1xf32, #tpu.memory_space<vmem>>, vector<1x1x128x1xf32>,
    return
  }
  func.func @transform_0(%arg0: i32, %arg1: i32, %arg2: i32) -> (i32, i32, i32) {
    %c1_i32 = arith.constant 1 : i32
    %0 = arith.muli %arg0, %c1_i32 : i32
    %1 = arith.addi %0, %arg2 : i32
    %c0_i32 = arith.constant 0 : i32
    %2 = arith.minsi %1, %c0_i32 : i32
    %c0_i32_0 = arith.constant 0 : i32
    %c0_i32_1 = arith.constant 0 : i32
    return %arg1, %c0_i32_0, %2 : i32, i32, i32
  }
  func.func @transform_1(%arg0: i32, %arg1: i32, %arg2: i32) -> (i32, i32) {
    %c0_i32 = arith.constant 0 : i32
    %c0_i32_0 = arith.constant 0 : i32
    %c0_i32_1 = arith.constant 0 : i32
    return %c0_i32, %c0_i32_0 : i32, i32
  }
  func.func @transform_2(%arg0: i32, %arg1: i32, %arg2: i32) -> (i32, i32) {
    %c0_i32 = arith.constant 0 : i32
    %c0_i32_0 = arith.constant 0 : i32
    %c0_i32_1 = arith.constant 0 : i32
    return %c0_i32, %c0_i32_0 : i32, i32
  }
  func.func @transform_3(%arg0: i32, %arg1: i32, %arg2: i32) -> (i32, i32) {
    %c0_i32 = arith.constant 0 : i32
    %c0_i32_0 = arith.constant 0 : i32
    %c0_i32_1 = arith.constant 0 : i32
    return %c0_i32, %c0_i32_0 : i32, i32
  }
  func.func @transform_4(%arg0: i32, %arg1: i32, %arg2: i32) -> (i32, i32) {
    %c0_i32 = arith.constant 0 : i32
    %c0_i32_0 = arith.constant 0 : i32
    %c0_i32_1 = arith.constant 0 : i32
    return %c0_i32, %c0_i32_0 : i32, i32
  }
  func.func @transform_5(%arg0: i32, %arg1: i32, %arg2: i32) -> (i32, i32) {
    %c0_i32 = arith.constant 0 : i32
    %c0_i32_0 = arith.constant 0 : i32
    %c0_i32_1 = arith.constant 0 : i32
    return %c0_i32, %c0_i32_0 : i32, i32
  }
  func.func @transform_6(%arg0: i32, %arg1: i32, %arg2: i32) -> (i32, i32) {
    %c0_i32 = arith.constant 0 : i32
    %c0_i32_0 = arith.constant 0 : i32
    %c0_i32_1 = arith.constant 0 : i32
    return %c0_i32, %c0_i32_0 : i32, i32
  }
  func.func @transform_7(%arg0: i32, %arg1: i32, %arg2: i32) -> (i32, i32) {
    %c0_i32 = arith.constant 0 : i32
    %c0_i32_0 = arith.constant 0 : i32
    %c0_i32_1 = arith.constant 0 : i32
    return %c0_i32, %c0_i32_0 : i32, i32
  }
  func.func @transform_8(%arg0: i32, %arg1: i32, %arg2: i32) -> (i32, i32) {
    %c0_i32 = arith.constant 0 : i32
    %c0_i32_0 = arith.constant 0 : i32
    %c0_i32_1 = arith.constant 0 : i32
    return %c0_i32, %c0_i32_0 : i32, i32
  }
  func.func @transform_9(%arg0: i32, %arg1: i32, %arg2: i32) -> (i32, i32) {
    %c0_i32 = arith.constant 0 : i32
    %c0_i32_0 = arith.constant 0 : i32
    %c0_i32_1 = arith.constant 0 : i32
    return %c0_i32, %c0_i32_0 : i32, i32
  }
  func.func @transform_10(%arg0: i32, %arg1: i32, %arg2: i32) -> (i32, i32) {
    %c0_i32 = arith.constant 0 : i32
    %c0_i32_0 = arith.constant 0 : i32
    %c0_i32_1 = arith.constant 0 : i32
    return %c0_i32, %c0_i32_0 : i32, i32
  }
  func.func @transform_11(%arg0: i32, %arg1: i32, %arg2: i32) -> (i32, i32, i32, i32) {
    %c0_i32 = arith.constant 0 : i32
    %c0_i32_0 = arith.constant 0 : i32
    %c0_i32_1 = arith.constant 0 : i32
    return %arg0, %arg1, %c0_i32, %c0_i32_0 : i32, i32, i32, i32
  }
}

module attributes {stable_mosaic.version = 11 : i64} {
  func.func @_pointnet_kernel(%arg0: i32, %arg1: i32, %arg2: i32, %arg3: memref<1x3x16xf32, #tpu.memory_space<vmem>>, %arg4: memref<64x3xf32, #tpu.memory_space<vmem>>, %arg5: memref<64x1xf32, #tpu.memory_space<vmem>>, %arg6: memref<128x64xbf16, #tpu.memory_space<vmem>>, %arg7: memref<128x1xf32, #tpu.memory_space<vmem>>, %arg8: memref<128x128xbf16, #tpu.memory_space<vmem>>, %arg9: memref<128x1xf32, #tpu.memory_space<vmem>>, %arg10: memref<256x128xbf16, #tpu.memory_space<vmem>>, %arg11: memref<256x1xf32, #tpu.memory_space<vmem>>, %arg12: memref<128x256xbf16, #tpu.memory_space<vmem>>, %arg13: memref<128x1xf32, #tpu.memory_space<vmem>>, %arg14: memref<1x1x128x1xf32, #tpu.memory_space<vmem>>) attributes {dimension_semantics = [#tpu.dimension_semantics<parallel>, #tpu.dimension_semantics<parallel>, #tpu.dimension_semantics<arbitrary>], iteration_bounds = array<i64: 1, 2, 1>, scalar_prefetch = 0 : i64, scratch_operands = 0 : i64, tpu.core_type = #tpu.core_type<tc>, window_params = [{transform_indices = @transform_0, window_bounds = array<i64: 1, 3, 16>}, {pipeline_mode = #tpu.pipeline_mode<synchronous>, transform_indices = @transform_1, window_bounds = array<i64: 64, 3>}, {pipeline_mode = #tpu.pipeline_mode<synchronous>, transform_indices = @transform_2, window_bounds = array<i64: 64, 1>}, {pipeline_mode = #tpu.pipeline_mode<synchronous>, transform_indices = @transform_3, window_bounds = array<i64: 128, 64>}, {pipeline_mode = #tpu.pipeline_mode<synchronous>, transform_indices = @transform_4, window_bounds = array<i64: 128, 1>}, {pipeline_mode = #tpu.pipeline_mode<synchronous>, transform_indices = @transform_5, window_bounds = array<i64: 128, 128>}, {pipeline_mode = #tpu.pipeline_mode<synchronous>, transform_indices = @transform_6, window_bounds = array<i64: 128, 1>}, {pipeline_mode = #tpu.pipeline_mode<synchronous>, transform_indices = @transform_7, window_bounds = array<i64: 256, 128>}, {pipeline_mode = #tpu.pipeline_mode<synchronous>, transform_indices = @transform_8, window_bounds = array<i64: 256, 1>}, {pipeline_mode = #tpu.pipeline_mode<synchronous>, transform_indices = @transform_9, window_bounds = array<i64: 128, 256>}, {pipeline_mode = #tpu.pipeline_mode<synchronous>, transform_indices = @transform_10, window_bounds = array<i64: 128, 1>}, {transform_indices = @transform_11, window_bounds = array<i64: 1, 1, 128, 1>}]} {
    %c0_i32 = arith.constant 0 : i32
    %0 = arith.cmpi eq, %arg2, %c0_i32 : i32
    %1 = arith.extui %0 : i1 to i32
    %c0_i32_0 = arith.constant 0 : i32
    %2 = arith.cmpi ne, %1, %c0_i32_0 : i32
    scf.if %2 {
      %cst_39 = arith.constant 0xFF800000 : f32
      %64 = vector.broadcast %cst_39 : f32 to vector<1x1x128x1xf32>
      %c0_40 = arith.constant 0 : index
      %c0_41 = arith.constant 0 : index
      %c0_42 = arith.constant 0 : index
      %c0_43 = arith.constant 0 : index
      %65 = vector.load %arg14[%c0_40, %c0_41, %c0_42, %c0_43] : memref<1x1x128x1xf32, #tpu.memory_space<vmem>>, vector<1x1x128x1xf32>
      tpu.vector_store %arg14[%c0_40, %c0_41, %c0_42, %c0_43], %64 {strides = array<i32>} : memref<1x1x128x1xf32, #tpu.memory_space<vmem>>, vector<1x1x128x1xf32>,
    } else {
    }
    %c0 = arith.constant 0 : index
    %c0_1 = arith.constant 0 : index
    %c0_2 = arith.constant 0 : index
    %3 = vector.load %arg3[%c0, %c0_1, %c0_2] : memref<1x3x16xf32, #tpu.memory_space<vmem>>, vector<1x3x16xf32>
    %4 = vector.shape_cast %3 : vector<1x3x16xf32> to vector<3x16xf32>
    %c0_3 = arith.constant 0 : index
    %c0_4 = arith.constant 0 : index
    %5 = vector.load %arg4[%c0_3, %c0_4] : memref<64x3xf32, #tpu.memory_space<vmem>>, vector<64x3xf32>
    %c0_5 = arith.constant 0 : index
    %c0_6 = arith.constant 0 : index
    %6 = vector.load %arg5[%c0_5, %c0_6] : memref<64x1xf32, #tpu.memory_space<vmem>>, vector<64x1xf32>
    %7 = vector.extract_strided_slice %5 {offsets = [0, 0], sizes = [64, 1], strides = [1, 1]} : vector<64x3xf32> to vector<64x1xf32>
    %8 = vector.extract_strided_slice %4 {offsets = [0, 0], sizes = [1, 16], strides = [1, 1]} : vector<3x16xf32> to vector<1x16xf32>
    %9 = vector.broadcast %7 : vector<64x1xf32> to vector<64x16xf32>
    %10 = vector.broadcast %8 : vector<1x16xf32> to vector<64x16xf32>
    %11 = arith.mulf %9, %10 : vector<64x16xf32>
    %12 = vector.extract_strided_slice %5 {offsets = [0, 1], sizes = [64, 1], strides = [1, 1]} : vector<64x3xf32> to vector<64x1xf32>
    %13 = vector.extract_strided_slice %4 {offsets = [1, 0], sizes = [1, 16], strides = [1, 1]} : vector<3x16xf32> to vector<1x16xf32>
    %14 = vector.broadcast %12 : vector<64x1xf32> to vector<64x16xf32>
    %15 = vector.broadcast %13 : vector<1x16xf32> to vector<64x16xf32>
    %16 = arith.mulf %14, %15 : vector<64x16xf32>
    %17 = arith.addf %11, %16 : vector<64x16xf32>
    %18 = vector.extract_strided_slice %5 {offsets = [0, 2], sizes = [64, 1], strides = [1, 1]} : vector<64x3xf32> to vector<64x1xf32>
    %19 = vector.extract_strided_slice %4 {offsets = [2, 0], sizes = [1, 16], strides = [1, 1]} : vector<3x16xf32> to vector<1x16xf32>
    %20 = vector.broadcast %18 : vector<64x1xf32> to vector<64x16xf32>
    %21 = vector.broadcast %19 : vector<1x16xf32> to vector<64x16xf32>
    %22 = arith.mulf %20, %21 : vector<64x16xf32>
    %23 = arith.addf %17, %22 : vector<64x16xf32>
    %24 = vector.broadcast %6 : vector<64x1xf32> to vector<64x16xf32>
    %25 = arith.addf %23, %24 : vector<64x16xf32>
    %cst = arith.constant 0.000000e+00 : f32
    %26 = vector.broadcast %cst : f32 to vector<64x16xf32>
    %27 = arith.maximumf %25, %26 : vector<64x16xf32>
    %c0_7 = arith.constant 0 : index
    %c0_8 = arith.constant 0 : index
    %28 = vector.load %arg6[%c0_7, %c0_8] : memref<128x64xbf16, #tpu.memory_space<vmem>>, vector<128x64xbf16>
    %c0_9 = arith.constant 0 : index
    %c0_10 = arith.constant 0 : index
    %29 = vector.load %arg7[%c0_9, %c0_10] : memref<128x1xf32, #tpu.memory_space<vmem>>, vector<128x1xf32>
    %30 = arith.truncf %27 : vector<64x16xf32> to vector<64x16xbf16>
    %cst_11 = arith.constant dense<0.000000e+00> : vector<128x16xf32>
    %31 = tpu.matmul %28, %30, %cst_11 {dimension_numbers = #tpu.dot_dimension_numbers<[1], [0], [0], [1], [0, 0, 1, 1], [], []>} : vector<128x64xbf16>, vector<64x16xbf16>, vector<128x16xf32> -> vector<128x16xf32>
    %32 = vector.broadcast %29 : vector<128x1xf32> to vector<128x16xf32>
    %33 = arith.addf %31, %32 : vector<128x16xf32>
    %cst_12 = arith.constant 0.000000e+00 : f32
    %34 = vector.broadcast %cst_12 : f32 to vector<128x16xf32>
    %35 = arith.maximumf %33, %34 : vector<128x16xf32>
    %c0_13 = arith.constant 0 : index
    %c0_14 = arith.constant 0 : index
    %36 = vector.load %arg8[%c0_13, %c0_14] : memref<128x128xbf16, #tpu.memory_space<vmem>>, vector<128x128xbf16>
    %c0_15 = arith.constant 0 : index
    %c0_16 = arith.constant 0 : index
    %37 = vector.load %arg9[%c0_15, %c0_16] : memref<128x1xf32, #tpu.memory_space<vmem>>, vector<128x1xf32>
    %38 = arith.truncf %35 : vector<128x16xf32> to vector<128x16xbf16>
    %cst_17 = arith.constant dense<0.000000e+00> : vector<128x16xf32>
    %39 = tpu.matmul %36, %38, %cst_17 {dimension_numbers = #tpu.dot_dimension_numbers<[1], [0], [0], [1], [0, 0, 1, 1], [], []>} : vector<128x128xbf16>, vector<128x16xbf16>, vector<128x16xf32> -> vector<128x16xf32>
    %40 = vector.broadcast %37 : vector<128x1xf32> to vector<128x16xf32>
    %41 = arith.addf %39, %40 : vector<128x16xf32>
    %cst_18 = arith.constant 0.000000e+00 : f32
    %42 = vector.broadcast %cst_18 : f32 to vector<128x16xf32>
    %43 = arith.maximumf %41, %42 : vector<128x16xf32>
    %c0_19 = arith.constant 0 : index
    %c0_20 = arith.constant 0 : index
    %44 = vector.load %arg10[%c0_19, %c0_20] : memref<256x128xbf16, #tpu.memory_space<vmem>>, vector<256x128xbf16>
    %c0_21 = arith.constant 0 : index
    %c0_22 = arith.constant 0 : index
    %45 = vector.load %arg11[%c0_21, %c0_22] : memref<256x1xf32, #tpu.memory_space<vmem>>, vector<256x1xf32>
    %46 = arith.truncf %43 : vector<128x16xf32> to vector<128x16xbf16>
    %cst_23 = arith.constant dense<0.000000e+00> : vector<256x16xf32>
    %47 = tpu.matmul %44, %46, %cst_23 {dimension_numbers = #tpu.dot_dimension_numbers<[1], [0], [0], [1], [0, 0, 1, 1], [], []>} : vector<256x128xbf16>, vector<128x16xbf16>, vector<256x16xf32> -> vector<256x16xf32>
    %48 = vector.broadcast %45 : vector<256x1xf32> to vector<256x16xf32>
    %49 = arith.addf %47, %48 : vector<256x16xf32>
    %cst_24 = arith.constant 0.000000e+00 : f32
    %50 = vector.broadcast %cst_24 : f32 to vector<256x16xf32>
    %51 = arith.maximumf %49, %50 : vector<256x16xf32>
    %c0_25 = arith.constant 0 : index
    %c0_26 = arith.constant 0 : index
    %52 = vector.load %arg12[%c0_25, %c0_26] : memref<128x256xbf16, #tpu.memory_space<vmem>>, vector<128x256xbf16>
    %c0_27 = arith.constant 0 : index
    %c0_28 = arith.constant 0 : index
    %53 = vector.load %arg13[%c0_27, %c0_28] : memref<128x1xf32, #tpu.memory_space<vmem>>, vector<128x1xf32>
    %54 = arith.truncf %51 : vector<256x16xf32> to vector<256x16xbf16>
    %cst_29 = arith.constant dense<0.000000e+00> : vector<128x16xf32>
    %55 = tpu.matmul %52, %54, %cst_29 {dimension_numbers = #tpu.dot_dimension_numbers<[1], [0], [0], [1], [0, 0, 1, 1], [], []>} : vector<128x256xbf16>, vector<256x16xbf16>, vector<128x16xf32> -> vector<128x16xf32>
    %56 = vector.broadcast %53 : vector<128x1xf32> to vector<128x16xf32>
    %57 = arith.addf %55, %56 : vector<128x16xf32>
    %cst_30 = arith.constant dense<0xFF800000> : vector<128xf32>
    %58 = vector.multi_reduction <maximumf>, %57, %cst_30 [1] : vector<128x16xf32> to vector<128xf32>
    %59 = vector.shape_cast %58 : vector<128xf32> to vector<128x1xf32>
    %c0_31 = arith.constant 0 : index
    %c0_32 = arith.constant 0 : index
    %c0_33 = arith.constant 0 : index
    %c0_34 = arith.constant 0 : index
    %60 = vector.load %arg14[%c0_31, %c0_32, %c0_33, %c0_34] : memref<1x1x128x1xf32, #tpu.memory_space<vmem>>, vector<1x1x128x1xf32>
    %61 = vector.shape_cast %59 : vector<128x1xf32> to vector<1x1x128x1xf32>
    %62 = arith.maximumf %60, %61 : vector<1x1x128x1xf32>
    %c0_35 = arith.constant 0 : index
    %c0_36 = arith.constant 0 : index
    %c0_37 = arith.constant 0 : index
    %c0_38 = arith.constant 0 : index
    %63 = vector.load %arg14[%c0_35, %c0_36, %c0_37, %c0_38] : memref<1x1x128x1xf32, #tpu.memory_space<vmem>>, vector<1x1x128x1xf32>
    tpu.vector_store %arg14[%c0_35, %c0_36, %c0_37, %c0_38], %62 {strides = array<i32>} : memref<1x1x128x1xf32, #tpu.memory_space<vmem>>, vector<1x1x128x1xf32>,
    return
  }
  func.func @transform_0(%arg0: i32, %arg1: i32, %arg2: i32) -> (i32, i32, i32) {
    %c1_i32 = arith.constant 1 : i32
    %0 = arith.muli %arg0, %c1_i32 : i32
    %1 = arith.addi %0, %arg2 : i32
    %c0_i32 = arith.constant 0 : i32
    %2 = arith.minsi %1, %c0_i32 : i32
    %c0_i32_0 = arith.constant 0 : i32
    %c0_i32_1 = arith.constant 0 : i32
    return %arg1, %c0_i32_0, %2 : i32, i32, i32
  }
  func.func @transform_1(%arg0: i32, %arg1: i32, %arg2: i32) -> (i32, i32) {
    %c0_i32 = arith.constant 0 : i32
    %c0_i32_0 = arith.constant 0 : i32
    %c0_i32_1 = arith.constant 0 : i32
    return %c0_i32, %c0_i32_0 : i32, i32
  }
  func.func @transform_2(%arg0: i32, %arg1: i32, %arg2: i32) -> (i32, i32) {
    %c0_i32 = arith.constant 0 : i32
    %c0_i32_0 = arith.constant 0 : i32
    %c0_i32_1 = arith.constant 0 : i32
    return %c0_i32, %c0_i32_0 : i32, i32
  }
  func.func @transform_3(%arg0: i32, %arg1: i32, %arg2: i32) -> (i32, i32) {
    %c0_i32 = arith.constant 0 : i32
    %c0_i32_0 = arith.constant 0 : i32
    %c0_i32_1 = arith.constant 0 : i32
    return %c0_i32, %c0_i32_0 : i32, i32
  }
  func.func @transform_4(%arg0: i32, %arg1: i32, %arg2: i32) -> (i32, i32) {
    %c0_i32 = arith.constant 0 : i32
    %c0_i32_0 = arith.constant 0 : i32
    %c0_i32_1 = arith.constant 0 : i32
    return %c0_i32, %c0_i32_0 : i32, i32
  }
  func.func @transform_5(%arg0: i32, %arg1: i32, %arg2: i32) -> (i32, i32) {
    %c0_i32 = arith.constant 0 : i32
    %c0_i32_0 = arith.constant 0 : i32
    %c0_i32_1 = arith.constant 0 : i32
    return %c0_i32, %c0_i32_0 : i32, i32
  }
  func.func @transform_6(%arg0: i32, %arg1: i32, %arg2: i32) -> (i32, i32) {
    %c0_i32 = arith.constant 0 : i32
    %c0_i32_0 = arith.constant 0 : i32
    %c0_i32_1 = arith.constant 0 : i32
    return %c0_i32, %c0_i32_0 : i32, i32
  }
  func.func @transform_7(%arg0: i32, %arg1: i32, %arg2: i32) -> (i32, i32) {
    %c0_i32 = arith.constant 0 : i32
    %c0_i32_0 = arith.constant 0 : i32
    %c0_i32_1 = arith.constant 0 : i32
    return %c0_i32, %c0_i32_0 : i32, i32
  }
  func.func @transform_8(%arg0: i32, %arg1: i32, %arg2: i32) -> (i32, i32) {
    %c0_i32 = arith.constant 0 : i32
    %c0_i32_0 = arith.constant 0 : i32
    %c0_i32_1 = arith.constant 0 : i32
    return %c0_i32, %c0_i32_0 : i32, i32
  }
  func.func @transform_9(%arg0: i32, %arg1: i32, %arg2: i32) -> (i32, i32) {
    %c0_i32 = arith.constant 0 : i32
    %c0_i32_0 = arith.constant 0 : i32
    %c0_i32_1 = arith.constant 0 : i32
    return %c0_i32, %c0_i32_0 : i32, i32
  }
  func.func @transform_10(%arg0: i32, %arg1: i32, %arg2: i32) -> (i32, i32) {
    %c0_i32 = arith.constant 0 : i32
    %c0_i32_0 = arith.constant 0 : i32
    %c0_i32_1 = arith.constant 0 : i32
    return %c0_i32, %c0_i32_0 : i32, i32
  }
  func.func @transform_11(%arg0: i32, %arg1: i32, %arg2: i32) -> (i32, i32, i32, i32) {
    %c0_i32 = arith.constant 0 : i32
    %c0_i32_0 = arith.constant 0 : i32
    %c0_i32_1 = arith.constant 0 : i32
    return %arg0, %arg1, %c0_i32, %c0_i32_0 : i32, i32, i32, i32
  }
}

</mosaic_0001>

<bundles_post_ra>
// kernel: tpu_custom_call.1
= control target key start
LH: loop header
LB: loop body
LE: loop exit
PB: predicated region body
PF: predicated region fallthrough
CT: control target
= control target key end

     0   :  { %s2516_s17 = smov 0   ;;  %s2518_s18 = smov 0   ;;  %s3280_s0 = inlined_call_operand.vmem [shape: f32[2,3,16], index: 0, kind: input, shape index: {}]   ;;  %s3281_s1 = inlined_call_operand.vmem [shape: f32[64,3], index: 1, kind: input, shape index: {}]   ;;  %s3282_s2 = inlined_call_operand.vmem [shape: f32[64,1], index: 2, kind: input, shape index: {}]   ;;  %s3283_s3 = inlined_call_operand.vmem [shape: bf16[128,64], index: 3, kind: input, shape index: {}]   ;;  %s3284_s4 = inlined_call_operand.vmem [shape: f32[128,1], index: 4, kind: input, shape index: {}]   ;;  %s3285_s5 = inlined_call_operand.vmem [shape: bf16[128,128], index: 5, kind: input, shape index: {}]   ;;  %s3286_s6 = inlined_call_operand.vmem [shape: f32[128,1], index: 6, kind: input, shape index: {}]   ;;  %s3287_s7 = inlined_call_operand.vmem [shape: bf16[256,128], index: 7, kind: input, shape index: {}]   ;;  %s3288_s8 = inlined_call_operand.vmem [shape: f32[256,1], index: 8, kind: input, shape index: {}]   ;;  %s3289_s9 = inlined_call_operand.vmem [shape: bf16[128,256], index: 9, kind: input, shape index: {}]   ;;  %s3290_s10 = inlined_call_operand.vmem [shape: f32[128,1], index: 10, kind: input, shape index: {}]   ;;  %s3291_s11 = inlined_call_operand.vmem [shape: f32[1,2,128,1], index: 11, kind: output, shape index: {}]  }
   0x1   :  { %s2520_s19 = smov 0  }
   0x2 LB: > { %s36_s20 = sadd.s32 1, %s2446_s18  ;;  %p2112_p0 = scmp.ge.s32.totalorder %s2450_s19, 1  ;;  %s2450_s19 = sphi %s2520_s19, %s21_s19   ;;  %s2446_s18 = sphi %s2518_s18, %s3293_s18   ;;  %s2442_s17 = sphi %s2516_s17, %s3292_s17  }
   0x3   : > { %p38_p1 = scmp.ge.s32.totalorder %s36_s20, 2  ;;  %p374_p2 = scmp.lt.s32.totalorder %s2450_s19, 3 }
   0x5   : > { %s3295_s20 = smov (%p38_p1, %s36_s20), 0  ;;  %p375_p3 = pnand %p2112_p0, %p374_p2 }
   0x6   : > { %p426_p4 = scmp.lt.s32.totalorder (!%p375_p3), %s2442_s17, 1 }
   0x7   : > { %378 = sbr.rel (%p375_p3) target bundleno = 1462 (0x5b6), region = 64 }
   0xc   : > { %v474_v0 = vld [vmem:[%s3281_s1 + $0x30] sm:$0xff]  ;;  %v471_v1 = vld [vmem:[%s3281_s1 + $0x18] sm:$0xff]  ;;  %v2452_v2 = vmov 2   ;;  %v2453_v3 = vmov 1   ;;  %v473_v5 = vld [vmem:[%s3281_s1 + $0x28] sm:$0xff]  ;;  %v2454_v8 = vmov 0  }
   0xd   : > { %2418 = vset.pattern.permute.xlu0 %v2452_v2  ;;  %2408 = vset.pattern.permute.xlu2 %v2452_v2  ;;  %v475_v4 = vld [vmem:[%s3281_s1 + $0x38] sm:$0xff]  ;;  %v472_v6 = vld [vmem:[%s3281_s1 + $0x20] sm:$0xff]  ;;  %v482_v9 = vld [vmem:[%s3282_s2 + $0x30] sm:$0xff]  ;;  %s3297_s17 = smov (!%p426_p4, %s2442_s17), 1  ;;  %vm843_vm0 = vcmask 523264   ;;  %vm1921_vm1 = vcmask 130048  }
   0xe   : > { %2407 = vset.pattern.permute.xlu1 %v2453_v3  ;;  %607 = vperm.xlu2 %2408, %v474_v0   ;;  %v468_v7 = vld [vmem:[%s3281_s1] sm:$0xff]  ;;  %v483_v10 = vld [vmem:[%s3282_s2 + $0x38] sm:$0xff]  ;;  %v470_v11 = vld [vmem:[%s3281_s1 + $0x10] sm:$0xff]  ;;  %s2113_s27 = sshll.u32 %s3297_s17, 2  ;;  %s2318_s30 = sshll.u32 %s3297_s17, 7  ;;  %vm450_vm2 = vcmask 7168  }
   0xf   : > { %558 = vperm.xlu1 %2407, %v474_v0   ;;  %595 = vperm.xlu0 %2418, %v471_v1   ;;  %v479_v12 = vld [vmem:[%s3282_s2 + $0x18] sm:$0xff]  ;;  %v480_v13 = vld [vmem:[%s3282_s2 + $0x20] sm:$0xff]  ;;  %v481_v14 = vld [vmem:[%s3282_s2 + $0x28] sm:$0xff]  ;;  %s432_s15 = scalar_lea.vmem %s3280_s0, %s2113_s27  ;;  %s3183_s14 = scalar_lea.vmem %s3291_s11, %s2318_s30 }
  0x10   : > { %v715_v15 = vld [vmem:[%s3284_s4 + $0x60] sm:$0xff]  ;;  %v469_v16 = vld [vmem:[%s3281_s1 + $0x8] sm:$0xff]  ;;  %v714_v17 = vld [vmem:[%s3284_s4 + $0x58] sm:$0xff] }
  0x11   : > { %v709_v18 = vld [vmem:[%s3284_s4 + $0x30] sm:$0xff]  ;;  %v708_v20 = vld [vmem:[%s3284_s4 + $0x28] sm:$0xff]  ;;  %v476_v22 = vld [vmem:[%s3282_s2] sm:$0xff] }
  0x12   : > { %v478_v19 = vld [vmem:[%s3282_s2 + $0x10] sm:$0xff]  ;;  %v477_v23 = vld [vmem:[%s3282_s2 + $0x8] sm:$0xff]  ;;  %v703_v24 = vld [vmem:[%s3284_s4] sm:$0xff] }
  0x13   : > { %v717_v26 = vld [vmem:[%s3284_s4 + $0x70] sm:$0xff]  ;;  %v718_v27 = vld [vmem:[%s3284_s4 + $0x78] sm:$0xff]  ;;  %v716_v30 = vld [vmem:[%s3284_s4 + $0x68] sm:$0xff] }
  0x14   : > { %v964_v28 = vld [vmem:[%s3286_s6 + $0x78] sm:$0xff]  ;;  %v713_v31 = vld [vmem:[%s3284_s4 + $0x50] sm:$0xff]  ;;  %v711_v36 = vld [vmem:[%s3284_s4 + $0x40] sm:$0xff] }
  0x15   : > { %v959_v32 = vld [vmem:[%s3286_s6 + $0x50] sm:$0xff]  ;;  %v712_v37 = vld [vmem:[%s3284_s4 + $0x48] sm:$0xff]  ;;  %v710_v41 = vld [vmem:[%s3284_s4 + $0x38] sm:$0xff] }
  0x16   : > { %611 = vperm.xlu2 %2408, %v475_v4   ;;  %v958_v38 = vld [vmem:[%s3286_s6 + $0x48] sm:$0xff]  ;;  %v707_v43 = vld [vmem:[%s3284_s4 + $0x20] sm:$0xff]  ;;  %v705_v47 = vld [vmem:[%s3284_s4 + $0x10] sm:$0xff] }
  0x17   : > { %562 = vperm.xlu1 %2407, %v475_v4   ;;  %2419 = vset.pattern.permute.xlu0 %v2453_v3  ;;  %v953_v44 = vld [vmem:[%s3286_s6 + $0x20] sm:$0xff]  ;;  %v706_v48 = vld [vmem:[%s3284_s4 + $0x18] sm:$0xff]  ;;  %v704_v54 = vld [vmem:[%s3284_s4 + $0x8] sm:$0xff] }
  0x18   : > { %554 = vperm.xlu0 %2419, %v473_v5   ;;  %v952_v50 = vld [vmem:[%s3286_s6 + $0x18] sm:$0xff]  ;;  %v467_v51 = vld [vmem:[%s432_s15] sm:$0x7]  ;;  %v963_v57 = vld [vmem:[%s3286_s6 + $0x70] sm:$0xff] }
  0x19   : > { %v2680_v55 = vperm.slane %v467_v51, 1  ;;  %v2682_v56 = vperm.slane %v467_v51, 0  ;;  %v1212_v60 = vld [vmem:[%s3288_s8 + $0x70] sm:$0xff]  ;;  %v2693_v61 = vperm.slane %v467_v51, 2 }
  0x1e   : > { %2410 = vset.pattern.permute.xlu2 %v2453_v3 }
  0x1f   : > { %2409 = vset.pattern.permute.xlu1 %v2454_v8  ;;  %550 = vperm.xlu2 %2410, %v472_v6  }
  0x20   : > { %511 = vperm.xlu1 %2409, %v473_v5   ;;  %534 = vperm.xlu0 %2419, %v468_v7  }
  0x27   : > { %2412 = vset.pattern.permute.xlu2 %v2452_v2 }
  0x28   : > { %2411 = vset.pattern.permute.xlu1 %v2452_v2  ;;  %2422 = vset.pattern.permute.xlu0 %v2454_v8 }
  0x29   : > { %599 = vperm.xlu1 %2411, %v472_v6   ;;  %603 = vperm.xlu2 %2412, %v473_v5  }
  0x2a   : > { %516 = vperm.xlu0 %2422, %v474_v0  }
  0x31   : > { %2413 = vset.pattern.permute.xlu1 %v2454_v8  ;;  %2414 = vset.pattern.permute.xlu2 %v2454_v8 }
  0x32   : > { %521 = vperm.xlu0 %2422, %v475_v4   ;;  %663 = vperm.xlu1 %2413, %v482_v9  }
  0x33   : > { %668 = vperm.xlu2 %2414, %v483_v10   ;;  %v1211_v10 = vld [vmem:[%s3288_s8 + $0x68] sm:$0xff] }
  0x3a   : > { %506 = vperm.xlu0 %2422, %v472_v6   ;;  %501 = vperm.xlu1 %2413, %v471_v1   ;;  %v962_v6 = vld [vmem:[%s3286_s6 + $0x68] sm:$0xff] }
  0x3b   : > { %2415 = vset.pattern.permute.xlu2 %v2453_v3 }
  0x3c   : > { %542 = vperm.xlu2 %2415, %v470_v11  }
  0x42   : > { %496 = vperm.xlu0 %2422, %v470_v11   ;;  %2416 = vset.pattern.permute.xlu1 %v2453_v3 }
  0x43   : > { %546 = vperm.xlu1 %2416, %v471_v1  }
  0x44   : > { %2417 = vset.pattern.permute.xlu2 %v2452_v2 }
  0x45   : > { %591 = vperm.xlu2 %2417, %v470_v11  }
  0x4a   : > { %648 = vperm.xlu0 %2422, %v479_v12  }
  0x4b   : > { %2420 = vset.pattern.permute.xlu1 %v2454_v8 }
  0x4c   : > { %653 = vperm.xlu1 %2420, %v480_v13  }
  0x4d   : > { %2421 = vset.pattern.permute.xlu2 %v2454_v8 }
  0x4e   : > { %658 = vperm.xlu2 %2421, %v481_v14  }
  0x52   : > { %785 = vperm.xlu0 %2422, %v715_v15  }
  0x54   : > { %486 = vperm.xlu1 %2420, %v468_v7  }
  0x56   : > { %491 = vperm.xlu2 %2421, %v469_v16  }
  0x5a   : > { %780 = vperm.xlu0 %2422, %v714_v17   ;;  %v960_v17 = vld [vmem:[%s3286_s6 + $0x58] sm:$0xff] }
  0x5c   : > { %2423 = vset.pattern.permute.xlu1 %v2453_v3 }
  0x5d   : > { %538 = vperm.xlu1 %2423, %v469_v16  }
  0x5e   : > { %2424 = vset.pattern.permute.xlu2 %v2452_v2 }
  0x5f   : > { %583 = vperm.xlu2 %2424, %v468_v7  }
  0x62   : > { %755 = vperm.xlu0 %2422, %v709_v18  }
  0x65   : > { %2425 = vset.pattern.permute.xlu1 %v2452_v2  ;;  %v961_v2 = vld [vmem:[%s3286_s6 + $0x60] sm:$0xff] }
  0x66   : > { %587 = vperm.xlu1 %2425, %v469_v16  }
  0x67   : > { %2426 = vset.pattern.permute.xlu2 %v2454_v8 }
  0x68   : > { %643 = vperm.xlu2 %2426, %v478_v19   ;;  %v2597_v21 = vpop.permute.xlu2 %607  ;;  %v957_v19 = vld [vmem:[%s3286_s6 + $0x40] sm:$0xff] }
  0x69   : > { %v621_v3 = vmul.f32 %v2693_v61, %v2597_v21 }
  0x6a   : > { %750 = vperm.xlu0 %2422, %v708_v20  }
  0x6e   : > { %2427 = vset.pattern.permute.xlu1 %v2454_v8 }
  0x6f   : > { %633 = vperm.xlu1 %2427, %v476_v22   ;;  %v1228_v22 = vld [vmem:[%s3288_s8 + $0xf0] sm:$0xff] }
  0x70   : > { %638 = vperm.xlu2 %2426, %v477_v23   ;;  %v2608_v25 = vpop.permute.xlu2 %611 }
  0x71   : > { %v622_v7 = vmul.f32 %v2693_v61, %v2608_v25 }
  0x72   : > { %725 = vperm.xlu0 %2422, %v703_v24  }
  0x77   : > { %795 = vperm.xlu1 %2427, %v717_v26  }
  0x78   : > { %800 = vperm.xlu2 %2426, %v718_v27   ;;  %v955_v27 = vld [vmem:[%s3286_s6 + $0x30] sm:$0xff] }
  0x79   : > { %v2619_v29 = vpop.permute.xlu2 %550 }
  0x7a   : > { %1050 = vperm.xlu0 %2422, %v964_v28  }
  0x7f   : > { %790 = vperm.xlu1 %2427, %v716_v30  }
  0x80   : > { %775 = vperm.xlu2 %2426, %v713_v31   ;;  %v956_v31 = vld [vmem:[%s3286_s6 + $0x38] sm:$0xff] }
  0x81   : > { %v559_v33 = vpop.permute.xlu1 %558  ;;  %v2630_v34 = vpop.permute.xlu0 %595 }
  0x82   : > { %1025 = vperm.xlu0 %2422, %v959_v32   ;;  %v572_v62 = vmul.f32 %v2680_v55, %v559_v33  ;;  %v570_v33 = vmul.f32 %v2680_v55, %v2619_v29  ;;  %v618_v29 = vmul.f32 %v2693_v61, %v2630_v34  ;;  %v951_v34 = vld [vmem:[%s3286_s6 + $0x10] sm:$0xff] }
  0x83   : > { %v2632_v35 = vpop.permute.xlu2 %603 }
  0x87   : > { %765 = vperm.xlu1 %2427, %v711_v36   ;;  %v620_v36 = vmul.f32 %v2693_v61, %v2632_v35 }
  0x88   : > { %770 = vperm.xlu2 %2426, %v712_v37  }
  0x89   : > { %v563_v39 = vpop.permute.xlu1 %562 }
  0x8a   : > { %1020 = vperm.xlu0 %2422, %v958_v38   ;;  %v2643_v40 = vpop.permute.xlu0 %554  ;;  %v573_v4 = vmul.f32 %v2680_v55, %v563_v39  ;;  %v1207_v39 = vld [vmem:[%s3288_s8 + $0x48] sm:$0xff] }
  0x8b   : > { %v571_v24 = vmul.f32 %v2680_v55, %v2643_v40 }
  0x8d   : > { %v669_v42 = vpop.permute.xlu2 %668 }
  0x8f   : > { %760 = vperm.xlu1 %2427, %v710_v41  }
  0x90   : > { %745 = vperm.xlu2 %2426, %v707_v43  }
  0x92   : > { %995 = vperm.xlu0 %2422, %v953_v44   ;;  %v512_v45 = vpop.permute.xlu1 %511  ;;  %v2658_v46 = vpop.permute.xlu0 %534 }
  0x93   : > { %v530_v25 = vmul.f32 %v2682_v56, %v512_v45 }
  0x95   : > { %v579_v37 = vadd.f32 %v571_v24, %v530_v25 }
  0x96   : > { %v2667_v49 = vpop.permute.xlu2 %542 }
  0x97   : > { %735 = vperm.xlu1 %2427, %v705_v47   ;;  %v568_v35 = vmul.f32 %v2680_v55, %v2667_v49  ;;  %v628_v45 = vadd.f32 %v620_v36, %v579_v37  ;;  %v1227_v37 = vld [vmem:[%s3288_s8 + $0xe8] sm:$0xff] }
  0x98   : > { %740 = vperm.xlu2 %2426, %v706_v48   ;;  %v954_v48 = vld [vmem:[%s3286_s6 + $0x28] sm:$0xff] }
  0x9a   : > { %990 = vperm.xlu0 %2422, %v952_v50  }
  0x9b   : > { %v2675_v52 = vpop.permute.xlu1 %599 }
  0x9c   : > { %v517_v53 = vpop.permute.xlu0 %516  ;;  %v619_v44 = vmul.f32 %v2693_v61, %v2675_v52  ;;  %v1204_v52 = vld [vmem:[%s3288_s8 + $0x30] sm:$0xff] }
  0x9d   : > { %v531_v58 = vmul.f32 %v2682_v56, %v517_v53 }
  0x9f   : > { %v2688_v59 = vpop.permute.xlu2 %591  ;;  %730 = vperm.xlu1 %2427, %v704_v54   ;;  %v580_v63 = vadd.f32 %v572_v62, %v531_v58 }
  0xa0   : > { %1045 = vperm.xlu2 %2426, %v963_v57   ;;  %v617_v47 = vmul.f32 %v2693_v61, %v2688_v59 }
  0xa1   : > { %v629_v9 = vadd.f32 %v621_v3, %v580_v63  ;;  %v949_v3 = vld [vmem:[%s3286_s6] sm:$0xff] }
  0xa2   : > { %1310 = vperm.xlu0 %2422, %v1212_v60  }
  0xa4   : > { %v522_v0 = vpop.permute.xlu0 %521  ;;  %v664_v1 = vpop.permute.xlu1 %663 }
  0xa5   : > { %v532_v5 = vmul.f32 %v2682_v56, %v522_v0  ;;  %v677_v13 = vadd.f32 %v664_v1, %v629_v9 }
  0xa7   : > { %v581_v8 = vadd.f32 %v573_v4, %v532_v5  ;;  %1035 = vperm.xlu1 %2427, %v961_v2   ;;  %v685_v18 = vmax.f32 %v677_v13, 0.0  ;;  %v1222_v13 = vld [vmem:[%s3288_s8 + $0xc0] sm:$0xff] }
  0xa8   : > { %v659_v11 = vpop.permute.xlu2 %658  ;;  %1040 = vperm.xlu2 %2426, %v962_v6   ;;  %v950_v6 = vld [vmem:[%s3286_s6 + $0x8] sm:$0xff] }
  0xa9   : > { %v630_v12 = vadd.f32 %v622_v7, %v581_v8  ;;  %v676_v50 = vadd.f32 %v659_v11, %v628_v45  ;;  %v1225_v8 = vld [vmem:[%s3288_s8 + $0xd8] sm:$0xff]  ;;  %v1210_v11 = vld [vmem:[%s3288_s8 + $0x60] sm:$0xff]  ;;  %v1632_v45 = vld [vmem:[%s3290_s10 + $0x8] sm:$0xff] }
  0xaa   : > { %1305 = vperm.xlu0 %2422, %v1211_v10   ;;  %v1213_v10 = vld [vmem:[%s3288_s8 + $0x78] sm:$0xff] }
  0xab   : > { %v678_v14 = vadd.f32 %v669_v42, %v630_v12  ;;  %v684_v59 = vmax.f32 %v676_v50, 0.0  ;;  %v1223_v50 = vld [vmem:[%s3288_s8 + $0xc8] sm:$0xff] }
  0xac   : > { %v507_v15 = vpop.permute.xlu0 %506  ;;  %v502_v16 = vpop.permute.xlu1 %501 }
  0xad   : > { %v686_v20 = vmax.f32 %v678_v14, 0.0  ;;  %v529_v28 = vmul.f32 %v2682_v56, %v507_v15  ;;  %v528_v38 = vmul.f32 %v2682_v56, %v502_v16  ;;  %v1208_v14 = vld [vmem:[%s3288_s8 + $0x50] sm:$0xff]  ;;  %v1209_v15 = vld [vmem:[%s3288_s8 + $0x58] sm:$0xff] }
  0xaf   : > { %1030 = vperm.xlu1 %2427, %v960_v17   ;;  %v722_v21 = vpack.c.bf16 %v686_v20, %v685_v18  ;;  %v578_v40 = vadd.f32 %v570_v33, %v529_v28  ;;  %v1201_v17 = vld [vmem:[%s3288_s8 + $0x18] sm:$0xff]  ;;  %v1226_v33 = vld [vmem:[%s3288_s8 + $0xe0] sm:$0xff] }
  0xb0   : > { %1015 = vperm.xlu2 %2426, %v957_v19   ;;  %v2720_v23 = vpop.permute.xlu2 %491  ;;  %v1229_v28 = vld [vmem:[%s3288_s8 + $0xf8] sm:$0xff] }
  0xb1   : > { %872 = vmatpush.bf16.msra.mxu0 %v722_v21  ;;  %2367 = vmatpush.bf16.msra.mxu3 %v722_v21  ;;  %v627_v54 = vadd.f32 %v619_v44, %v578_v40  ;;  %v526_v18 = vmul.f32 %v2682_v56, %v2720_v23  ;;  %v2319_v40 = vld [vmem:[%s3283_s3] sm:$0xff]  ;;  %v1203_v44 = vld [vmem:[%s3288_s8 + $0x28] sm:$0xff] }
  0xb2   : > { %1390 = vperm.xlu0 %2422, %v1228_v22   ;;  %v566_v22 = vmul.f32 %v2680_v55, %v2658_v46  ;;  %v1198_v46 = vld [vmem:[%s3288_s8] sm:$0xff] }
  0xb4   : > { %v497_v26 = vpop.permute.xlu0 %496 }
  0xb5   : > { %v547_v30 = vpop.permute.xlu1 %546  ;;  %v527_v41 = vmul.f32 %v2682_v56, %v497_v26 }
  0xb6   : > { %v569_v32 = vmul.f32 %v2680_v55, %v547_v30 }
  0xb7   : > { %1005 = vperm.xlu1 %2427, %v955_v27   ;;  %v576_v51 = vadd.f32 %v568_v35, %v527_v41  ;;  %v2324_v41 = vld [vmem:[%s3283_s3 + $0x28] sm:$0xff]  ;;  %v1202_v35 = vld [vmem:[%s3288_s8 + $0x20] sm:$0xff] }
  0xb8   : > { %1010 = vperm.xlu2 %2426, %v956_v31   ;;  %v577_v42 = vadd.f32 %v569_v32, %v528_v38 }
  0xb9   : > { %v584_v43 = vpop.permute.xlu2 %583  ;;  %v625_v63 = vadd.f32 %v617_v47, %v576_v51  ;;  %v2320_v47 = vld [vmem:[%s3283_s3 + $0x8] sm:$0xff]  ;;  %v1200_v51 = vld [vmem:[%s3288_s8 + $0x10] sm:$0xff] }
  0xba   : > { %1285 = vperm.xlu0 %2422, %v1207_v39   ;;  %v626_v53 = vadd.f32 %v618_v29, %v577_v42  ;;  %v615_v25 = vmul.f32 %v2693_v61, %v584_v43  ;;  %v1219_v39 = vld [vmem:[%s3288_s8 + $0xa8] sm:$0xff]  ;;  %v1205_v42 = vld [vmem:[%s3288_s8 + $0x38] sm:$0xff]  ;;  %v1224_v43 = vld [vmem:[%s3288_s8 + $0xd0] sm:$0xff] }
  0xbb   : > { %v1214_v29 = vld [vmem:[%s3288_s8 + $0x80] sm:$0xff] }
  0xbc   : > { %v649_v49 = vpop.permute.xlu0 %648 }
  0xbd   : > { %v674_v60 = vadd.f32 %v649_v49, %v626_v53  ;;  %v1635_v53 = vld [vmem:[%s3290_s10 + $0x20] sm:$0xff]  ;;  %v1638_v49 = vld [vmem:[%s3290_s10 + $0x38] sm:$0xff] }
  0xbe   : > { %v654_v57 = vpop.permute.xlu1 %653 }
  0xbf   : > { %v675_v58 = vadd.f32 %v654_v57, %v627_v54  ;;  %1000 = vperm.xlu1 %2427, %v954_v48   ;;  %v682_v4 = vmax.f32 %v674_v60, 0.0  ;;  %v2325_v48 = vld [vmem:[%s3283_s3 + $0x30] sm:$0xff] }
  0xc0   : > { %985 = vperm.xlu2 %2426, %v951_v34   ;;  %v1220_v54 = vld [vmem:[%s3288_s8 + $0xb0] sm:$0xff]  ;;  %v1221_v34 = vld [vmem:[%s3288_s8 + $0xb8] sm:$0xff] }
  0xc1   : > { %v683_v62 = vmax.f32 %v675_v58, 0.0  ;;  %v2321_v57 = vld [vmem:[%s3283_s3 + $0x10] sm:$0xff]  ;;  %v2326_v58 = vld [vmem:[%s3283_s3 + $0x38] sm:$0xff] }
  0xc2   : > { %v644_v0 = vpop.permute.xlu2 %643  ;;  %1270 = vperm.xlu0 %2422, %v1204_v52   ;;  %v1199_v52 = vld [vmem:[%s3288_s8 + $0x8] sm:$0xff]  ;;  %v1641_v60 = vld [vmem:[%s3290_s10 + $0x50] sm:$0xff] }
  0xc3   : > { %v673_v1 = vadd.f32 %v644_v0, %v625_v63  ;;  %v721_v2 = vpack.c.bf16 %v684_v59, %v683_v62  ;;  %v1218_v59 = vld [vmem:[%s3288_s8 + $0xa0] sm:$0xff]  ;;  %v1216_v62 = vld [vmem:[%s3288_s8 + $0x90] sm:$0xff]  ;;  %v1217_v63 = vld [vmem:[%s3288_s8 + $0x98] sm:$0xff] }
  0xc4   : > { %v1644_v0 = vld [vmem:[%s3290_s10 + $0x68] sm:$0xff] }
  0xc5   : > { %v681_v5 = vmax.f32 %v673_v1, 0.0  ;;  %873 = vmatpush.bf16.msra.mxu0 %v721_v2  ;;  %2368 = vmatpush.bf16.msra.mxu3 %v721_v2  ;;  %v2322_v1 = vld [vmem:[%s3283_s3 + $0x18] sm:$0xff]  ;;  %v1215_v2 = vld [vmem:[%s3288_s8 + $0x88] sm:$0xff] }
  0xc6   : > { %v487_v7 = vpop.permute.xlu1 %486 }
  0xc7   : > { %975 = vperm.xlu1 %2427, %v949_v3   ;;  %v720_v9 = vpack.c.bf16 %v682_v4, %v681_v5  ;;  %v525_v19 = vmul.f32 %v2682_v56, %v487_v7  ;;  %v1206_v56 = vld [vmem:[%s3288_s8 + $0x40] sm:$0xff]  ;;  %v1633_v4 = vld [vmem:[%s3290_s10 + $0x10] sm:$0xff]  ;;  %v1634_v5 = vld [vmem:[%s3290_s10 + $0x18] sm:$0xff] }
  0xc8   : > { %980 = vperm.xlu2 %2426, %v950_v6   ;;  %v1631_v3 = vld [vmem:[%s3290_s10] sm:$0xff]  ;;  %v1636_v7 = vld [vmem:[%s3290_s10 + $0x28] sm:$0xff] }
  0xc9   : > { %874 = vmatpush.bf16.msra.mxu0 %v720_v9  ;;  %2369 = vmatpush.bf16.msra.mxu3 %v720_v9  ;;  %v574_v26 = vadd.f32 %v566_v22, %v525_v19  ;;  %v2323_v6 = vld [vmem:[%s3283_s3 + $0x20] sm:$0xff] }
  0xca   : > { %1375 = vperm.xlu0 %2422, %v1225_v8   ;;  %v639_v23 = vpop.permute.xlu2 %638  ;;  %v1637_v8 = vld [vmem:[%s3290_s10 + $0x30] sm:$0xff]  ;;  %v1639_v9 = vld [vmem:[%s3290_s10 + $0x40] sm:$0xff] }
  0xcf   : > { %1315 = vperm.xlu1 %2427, %v1213_v10   ;;  %v539_v12 = vpop.permute.xlu1 %538  ;;  %v1640_v10 = vld [vmem:[%s3290_s10 + $0x48] sm:$0xff] }
  0xd0   : > { %1300 = vperm.xlu2 %2426, %v1210_v11   ;;  %v567_v16 = vmul.f32 %v2680_v55, %v539_v12  ;;  %v623_v55 = vadd.f32 %v615_v25, %v574_v26  ;;  %v1642_v11 = vld [vmem:[%s3290_s10 + $0x58] sm:$0xff]  ;;  %v1643_v12 = vld [vmem:[%s3290_s10 + $0x60] sm:$0xff] }
  0xd2   : > { %1360 = vperm.xlu0 %2422, %v1222_v13   ;;  %v575_v24 = vadd.f32 %v567_v16, %v526_v18  ;;  %v1645_v13 = vld [vmem:[%s3290_s10 + $0x70] sm:$0xff] }
  0xd7   : > { %1290 = vperm.xlu1 %2427, %v1208_v14   ;;  %v1646_v14 = vld [vmem:[%s3290_s10 + $0x78] sm:$0xff] }
  0xd8   : > { %1295 = vperm.xlu2 %2426, %v1209_v15   ;;  %v588_v20 = vpop.permute.xlu1 %587 }
  0xd9   : > { %v616_v21 = vmul.f32 %v2693_v61, %v588_v20 }
  0xda   : > { %1255 = vperm.xlu0 %2422, %v1201_v17  }
  0xdb   : > { %v624_v27 = vadd.f32 %v616_v21, %v575_v24 }
  0xdd   : > { %v672_v30 = vadd.f32 %v639_v23, %v624_v27  ;;  %v801_v27 = vpop.permute.xlu2 %800 }
  0xdf   : > { %1395 = vperm.xlu1 %2427, %v1229_v28   ;;  %v680_v36 = vmax.f32 %v672_v30, 0.0 }
  0xe0   : > { %1280 = vperm.xlu2 %2426, %v1206_v56   ;;  %v786_v56 = vpop.permute.xlu0 %785 }
  0xe1   : > { %v634_v61 = vpop.permute.xlu1 %633 }
  0xe2   : > { %1240 = vperm.xlu0 %2422, %v1198_v46   ;;  %v671_v31 = vadd.f32 %v634_v61, %v623_v55 }
  0xe4   : > { %v679_v32 = vmax.f32 %v671_v31, 0.0 }
  0xe6   : > { %v719_v38 = vpack.c.bf16 %v680_v36, %v679_v32  ;;  %v776_v32 = vpop.permute.xlu2 %775 }
  0xe7   : > { %1380 = vperm.xlu1 %2427, %v1226_v33  }
  0xe8   : > { %1385 = vperm.xlu2 %2426, %v1227_v37   ;;  %875 = vmatpush.bf16.msra.mxu0 %v719_v38 }
  0xe9   : > { %2370 = vmatpush.bf16.msra.mxu3 %v719_v38  ;;  %v796_v25 = vpop.permute.xlu1 %795  ;;  %v781_v38 = vpop.permute.xlu0 %780 }
  0xea   : > { %1345 = vperm.xlu0 %2422, %v1219_v39  }
  0xeb   : > { %2148 = vmatmul.msk.bf16.vlgmr.msra.gmra.mxu0 %vm843_vm0, %v2319_v40 }
  0xec   : > { %2153 = vmatmul.msk.bf16.vlgmr.msra.gmra.mxu3 %vm843_vm0, %v2324_v41 }
  0xef   : > { %1275 = vperm.xlu1 %2427, %v1205_v42  }
  0xf0   : > { %1370 = vperm.xlu2 %2426, %v1224_v43  }
  0xf1   : > { %v791_v23 = vpop.permute.xlu1 %790 }
  0xf2   : > { %1320 = vperm.xlu0 %2422, %v1214_v29  }
  0xf7   : > { %1260 = vperm.xlu1 %2427, %v1202_v35  }
  0xf8   : > { %1265 = vperm.xlu2 %2426, %v1203_v44  }
  0xf9   : > { %v766_v42 = vpop.permute.xlu1 %765 }
  0xfa   : > { %1670 = vperm.xlu0 %2422, %v1632_v45  }
  0xfb   : > { %2149 = vmatmul.msk.bf16.gmra.mxu0 %vm843_vm0, %v2320_v47 }
  0xfc   : > { %2154 = vmatmul.msk.bf16.gmra.mxu3 %vm843_vm0, %v2325_v48  ;;  %v771_v48 = vpop.permute.xlu2 %770 }
  0xff   : > { %1365 = vperm.xlu1 %2427, %v1223_v50  }
 0x100   : > { %1250 = vperm.xlu2 %2426, %v1200_v51  }
 0x101   : > { %v761_v51 = vpop.permute.xlu1 %760 }
 0x102   : > { %1685 = vperm.xlu0 %2422, %v1635_v53  }
 0x107   : > { %1350 = vperm.xlu1 %2427, %v1220_v54   ;;  %v756_v54 = vpop.permute.xlu0 %755 }
 0x108   : > { %1355 = vperm.xlu2 %2426, %v1221_v34   ;;  %v746_v34 = vpop.permute.xlu2 %745 }
 0x10a   : > { %1700 = vperm.xlu0 %2422, %v1638_v49  }
 0x10b   : > { %2150 = vmatmul.msk.bf16.gmra.mxu0 %vm843_vm0, %v2321_v57 }
 0x10c   : > { %2155 = vmatmul.msk.bf16.gmra.mxu3 %vm843_vm0, %v2326_v58 }
 0x10f   : > { %1245 = vperm.xlu1 %2427, %v1199_v52  }
 0x110   : > { %1340 = vperm.xlu2 %2426, %v1218_v59   ;;  %v736_v59 = vpop.permute.xlu1 %735 }
 0x112   : > { %1715 = vperm.xlu0 %2422, %v1641_v60  }
 0x117   : > { %1330 = vperm.xlu1 %2427, %v1216_v62  }
 0x118   : > { %1335 = vperm.xlu2 %2426, %v1217_v63  }
 0x11a   : > { %1730 = vperm.xlu0 %2422, %v1644_v0   ;;  %v751_v0 = vpop.permute.xlu0 %750 }
 0x11b   : > { %2151 = vmatmul.msk.bf16.gmra.mxu0 %vm843_vm0, %v2322_v1 }
 0x11f   : > { %1325 = vperm.xlu1 %2427, %v1215_v2  }
 0x120   : > { %1665 = vperm.xlu2 %2426, %v1631_v3  }
 0x127   : > { %1675 = vperm.xlu1 %2427, %v1633_v4  }
 0x128   : > { %1680 = vperm.xlu2 %2426, %v1634_v5  }
 0x12b   : > { %2152 = vmatmul.msk.bf16.gmra.mxu0 %vm843_vm0, %v2323_v6  ;;  %v741_v6 = vpop.permute.xlu2 %740 }
 0x12f   : > { %1690 = vperm.xlu1 %2427, %v1636_v7  }
 0x130   : > { %1695 = vperm.xlu2 %2426, %v1637_v8  }
 0x137   : > { %1705 = vperm.xlu1 %2427, %v1639_v9  }
 0x138   : > { %1710 = vperm.xlu2 %2426, %v1640_v10  }
 0x13f   : > { %1720 = vperm.xlu1 %2427, %v1642_v11  }
 0x140   : > { %1725 = vperm.xlu2 %2426, %v1643_v12   ;;  %v731_v12 = vpop.permute.xlu1 %730 }
 0x147   : > { %1735 = vperm.xlu1 %2427, %v1645_v13  }
 0x148   : > { %1740 = vperm.xlu2 %2426, %v1646_v14  }
 0x168   : > { %v2934_v15 = vpop.f32.mrf.mxu0 }
 0x16f   : > { %v902_v16 = vpop.f32.mrf.mxu3 }
 0x170   : > { %v2936_v17 = vpop.f32.mrf.mxu0  ;;  %v903_v43 = vadd.f32 %v902_v16, %v776_v32  ;;  %v2334_v32 = vld [vmem:[%s3285_s5 + $0x38] sm:$0xff] }
 0x171   : > { %v880_v13 = vadd.f32 %v2936_v17, %v731_v12  ;;  %v2328_v17 = vld [vmem:[%s3285_s5 + $0x8] sm:$0xff] }
 0x172   : > { %v927_v47 = vmax.f32 %v903_v43, 0.0 }
 0x177   : > { %v904_v18 = vpop.f32.mrf.mxu3 }
 0x178   : > { %v882_v19 = vpop.f32.mrf.mxu0  ;;  %v905_v39 = vadd.f32 %v904_v18, %v781_v38  ;;  %v726_v18 = vpop.permute.xlu0 %725 }
 0x179   : > { %v883_v10 = vadd.f32 %v882_v19, %v736_v59  ;;  %v2327_v19 = vld [vmem:[%s3285_s5] sm:$0xff] }
 0x17a   : > { %v928_v35 = vmax.f32 %v905_v39, 0.0 }
 0x17c   : > { %v970_v50 = vpack.c.bf16 %v928_v35, %v927_v47 }
 0x17f   : > { %v907_v20 = vpop.f32.mrf.mxu3 }
 0x180   : > { %v884_v21 = vpop.f32.mrf.mxu0  ;;  %v908_v33 = vadd.f32 %v907_v20, %v786_v56  ;;  %v878_v20 = vadd.f32 %v2934_v15, %v726_v18  ;;  %v2329_v15 = vld [vmem:[%s3285_s5 + $0x10] sm:$0xff]  ;;  %v2332_v56 = vld [vmem:[%s3285_s5 + $0x28] sm:$0xff] }
 0x181   : > { %v885_v7 = vadd.f32 %v884_v21, %v741_v6 }
 0x182   : > { %v929_v29 = vmax.f32 %v908_v33, 0.0  ;;  %v1051_v33 = vpop.permute.xlu0 %1050 }
 0x183   : > { %v920_v14 = vmax.f32 %v885_v7, 0.0 }
 0x187   : > { %v909_v22 = vpop.f32.mrf.mxu3 }
 0x188   : > { %v887_v24 = vpop.f32.mrf.mxu0  ;;  %v910_v30 = vadd.f32 %v909_v22, %v791_v23  ;;  %v919_v22 = vmax.f32 %v883_v10, 0.0  ;;  %v1046_v23 = vpop.permute.xlu2 %1045 }
 0x189   : > { %v888_v4 = vadd.f32 %v887_v24, %v746_v34  ;;  %v918_v24 = vmax.f32 %v880_v13, 0.0 }
 0x18a   : > { %v930_v40 = vmax.f32 %v910_v30, 0.0  ;;  %v1026_v38 = vpop.permute.xlu0 %1025 }
 0x18b   : > { %v921_v11 = vmax.f32 %v888_v4, 0.0 }
 0x18c   : > { %v971_v45 = vpack.c.bf16 %v930_v40, %v929_v29 }
 0x18f   : > { %v912_v26 = vpop.f32.mrf.mxu3 }
 0x190   : > { %v889_v28 = vpop.f32.mrf.mxu0  ;;  %v913_v46 = vadd.f32 %v912_v26, %v796_v25  ;;  %v966_v25 = vpack.c.bf16 %v920_v14, %v919_v22  ;;  %v917_v26 = vmax.f32 %v878_v20, 0.0  ;;  %v1041_v30 = vpop.permute.xlu2 %1040 }
 0x191   : > { %v890_v1 = vadd.f32 %v889_v28, %v751_v0  ;;  %v2331_v28 = vld [vmem:[%s3285_s5 + $0x20] sm:$0xff] }
 0x192   : > { %v931_v36 = vmax.f32 %v913_v46, 0.0  ;;  %v965_v21 = vpack.c.bf16 %v918_v24, %v917_v26  ;;  %v1036_v46 = vpop.permute.xlu1 %1035 }
 0x193   : > { %v922_v8 = vmax.f32 %v890_v1, 0.0 }
 0x195   : > { %v967_v16 = vpack.c.bf16 %v922_v8, %v921_v11 }
 0x197   : > { %v914_v55 = vpop.f32.mrf.mxu3 }
 0x198   : > { %v915_v61 = vadd.f32 %v914_v55, %v801_v27  ;;  %v892_v31 = vpop.f32.mrf.mxu0  ;;  %v2330_v27 = vld [vmem:[%s3285_s5 + $0x18] sm:$0xff]  ;;  %v2333_v55 = vld [vmem:[%s3285_s5 + $0x30] sm:$0xff] }
 0x199   : > { %v893_v60 = vadd.f32 %v892_v31, %v756_v54  ;;  %v2961_v31 = vpop.permute.xlu2 %1015 }
 0x19a   : > { %v932_v37 = vmax.f32 %v915_v61, 0.0  ;;  %v1031_v61 = vpop.permute.xlu1 %1030 }
 0x19b   : > { %v923_v5 = vmax.f32 %v893_v60, 0.0 }
 0x19c   : > { %v972_v41 = vpack.c.bf16 %v932_v37, %v931_v36 }
 0x19e   : > { %1101 = vmatpush.bf16.msra.mxu1 %v972_v41 }
 0x1a0   : > { %v894_v44 = vpop.f32.mrf.mxu0 }
 0x1a1   : > { %v895_v58 = vadd.f32 %v894_v44, %v761_v51  ;;  %v1011_v37 = vpop.permute.xlu2 %1010 }
 0x1a2   : > { %1102 = vmatpush.bf16.msra.mxu1 %v971_v45  ;;  %v1006_v36 = vpop.permute.xlu1 %1005 }
 0x1a3   : > { %v924_v2 = vmax.f32 %v895_v58, 0.0 }
 0x1a5   : > { %v968_v9 = vpack.c.bf16 %v924_v2, %v923_v5 }
 0x1a6   : > { %1103 = vmatpush.bf16.msra.mxu1 %v970_v50 }
 0x1a8   : > { %v897_v53 = vpop.f32.mrf.mxu0 }
 0x1a9   : > { %v898_v49 = vadd.f32 %v897_v53, %v766_v42  ;;  %v986_v40 = vpop.permute.xlu2 %985  ;;  %v1021_v42 = vpop.permute.xlu0 %1020 }
 0x1aa   : > { %v1001_v39 = vpop.permute.xlu1 %1000 }
 0x1ab   : > { %v925_v62 = vmax.f32 %v898_v49, 0.0 }
 0x1b0   : > { %v899_v57 = vpop.f32.mrf.mxu0 }
 0x1b1   : > { %v900_v52 = vadd.f32 %v899_v57, %v771_v48  ;;  %v981_v35 = vpop.permute.xlu2 %980  ;;  %v996_v51 = vpop.permute.xlu0 %995 }
 0x1b2   : > { %v976_v43 = vpop.permute.xlu1 %975 }
 0x1b3   : > { %v926_v63 = vmax.f32 %v900_v52, 0.0 }
 0x1b5   : > { %v969_v3 = vpack.c.bf16 %v926_v63, %v925_v62 }
 0x1b7   : > { %1104 = vmatpush.bf16.msra.mxu1 %v969_v3 }
 0x1b9   : > { %v991_v34 = vpop.permute.xlu0 %990 }
 0x1bb   : > { %1105 = vmatpush.bf16.msra.mxu1 %v968_v9 }
 0x1bf   : > { %1106 = vmatpush.bf16.msra.mxu1 %v967_v16 }
 0x1c3   : > { %1107 = vmatpush.bf16.msra.mxu1 %v966_v25 }
 0x1c7   : > { %1108 = vmatpush.bf16.msra.mxu1 %v965_v21 }
 0x1ca   : > { %1109 = vmatmul.bf16.vlgmr.msra.gmra.mxu1 %v2327_v19 }
 0x1da   : > { %1114 = vmatmul.bf16.gmra.mxu1 %v2328_v17 }
 0x1ea   : > { %1119 = vmatmul.bf16.gmra.mxu1 %v2329_v15 }
 0x1fa   : > { %1124 = vmatmul.bf16.gmra.mxu1 %v2330_v27 }
 0x20a   : > { %1129 = vmatmul.bf16.gmra.mxu1 %v2331_v28 }
 0x21a   : > { %1134 = vmatmul.bf16.gmra.mxu1 %v2332_v56 }
 0x22a   : > { %1139 = vmatmul.bf16.gmra.mxu1 %v2333_v55 }
 0x23a   : > { %1144 = vmatmul.bf16.gmra.mxu1 %v2334_v32 }
 0x247   : > { %v1110_v41 = vpop.f32.mrf.mxu1 }
 0x248   : > { %v1111_v29 = vadd.f32 %v1110_v41, %v976_v43  ;;  %v2340_v41 = vld [vmem:[%s3287_s7 + $0x28] sm:$0xff]  ;;  %v2341_v43 = vld [vmem:[%s3287_s7 + $0x30] sm:$0xff] }
 0x24a   : > { %v1150_v47 = vmax.f32 %v1111_v29, 0.0  ;;  %v2338_v29 = vld [vmem:[%s3287_s7 + $0x18] sm:$0xff] }
 0x24f   : > { %v1112_v44 = vpop.f32.mrf.mxu1 }
 0x250   : > { %v1113_v45 = vadd.f32 %v1112_v44, %v981_v35  ;;  %v2342_v35 = vld [vmem:[%s3287_s7 + $0x38] sm:$0xff]  ;;  %v2343_v44 = vld [vmem:[%s3287_s7 + $0x40] sm:$0xff] }
 0x252   : > { %v1151_v48 = vmax.f32 %v1113_v45, 0.0  ;;  %v2344_v45 = vld [vmem:[%s3287_s7 + $0x48] sm:$0xff] }
 0x254   : > { %v2966_v50 = vpack.c.bf16 %v1151_v48, %v1150_v47  ;;  %v2345_v47 = vld [vmem:[%s3287_s7 + $0x50] sm:$0xff]  ;;  %v1311_v48 = vpop.permute.xlu0 %1310 }
 0x257   : > { %v1115_v53 = vpop.f32.mrf.mxu1 }
 0x258   : > { %v1116_v54 = vadd.f32 %v1115_v53, %v986_v40 }
 0x25a   : > { %v1152_v58 = vmax.f32 %v1116_v54, 0.0 }
 0x25c   : > { %v1306_v53 = vpop.permute.xlu0 %1305 }
 0x25f   : > { %v1117_v49 = vpop.f32.mrf.mxu1 }
 0x260   : > { %v1118_v57 = vadd.f32 %v1117_v49, %v991_v34 }
 0x262   : > { %v1153_v52 = vmax.f32 %v1118_v57, 0.0  ;;  %v2347_v57 = vld [vmem:[%s3287_s7 + $0x60] sm:$0xff] }
 0x264   : > { %v1231_v59 = vpack.c.bf16 %v1153_v52, %v1152_v58  ;;  %v3007_v34 = vpop.permute.xlu0 %1390  ;;  %v1301_v52 = vpop.permute.xlu2 %1300 }
 0x267   : > { %v1120_v60 = vpop.f32.mrf.mxu1 }
 0x268   : > { %v1121_v62 = vadd.f32 %v1120_v60, %v996_v51  ;;  %v2346_v51 = vld [vmem:[%s3287_s7 + $0x58] sm:$0xff] }
 0x26a   : > { %v1154_v1 = vmax.f32 %v1121_v62, 0.0 }
 0x26f   : > { %v1122_v63 = vpop.f32.mrf.mxu1 }
 0x270   : > { %v1123_v0 = vadd.f32 %v1122_v63, %v1001_v39 }
 0x272   : > { %v1155_v2 = vmax.f32 %v1123_v0, 0.0  ;;  %v1296_v0 = vpop.permute.xlu2 %1295 }
 0x274   : > { %v1232_v3 = vpack.c.bf16 %v1155_v2, %v1154_v1  ;;  %v2348_v2 = vld [vmem:[%s3287_s7 + $0x68] sm:$0xff] }
 0x277   : > { %v1125_v4 = vpop.f32.mrf.mxu1 }
 0x278   : > { %v1126_v5 = vadd.f32 %v1125_v4, %v1006_v36 }
 0x27a   : > { %v1156_v8 = vmax.f32 %v1126_v5, 0.0 }
 0x27f   : > { %v1127_v6 = vpop.f32.mrf.mxu1 }
 0x280   : > { %v1128_v7 = vadd.f32 %v1127_v6, %v1011_v37 }
 0x282   : > { %v1157_v9 = vmax.f32 %v1128_v7, 0.0  ;;  %v1281_v7 = vpop.permute.xlu2 %1280 }
 0x284   : > { %v1233_v10 = vpack.c.bf16 %v1157_v9, %v1156_v8 }
 0x287   : > { %v1130_v11 = vpop.f32.mrf.mxu1 }
 0x288   : > { %v1131_v39 = vadd.f32 %v1130_v11, %v2961_v31  ;;  %v2335_v31 = vld [vmem:[%s3287_s7] sm:$0xff]  ;;  %v2349_v11 = vld [vmem:[%s3287_s7 + $0x70] sm:$0xff] }
 0x28f   : > { %v1132_v12 = vpop.f32.mrf.mxu1 }
 0x290   : > { %v1133_v32 = vadd.f32 %v1132_v12, %v1021_v42  ;;  %v2337_v42 = vld [vmem:[%s3287_s7 + $0x10] sm:$0xff] }
 0x297   : > { %v1135_v13 = vpop.f32.mrf.mxu1 }
 0x298   : > { %v1136_v56 = vadd.f32 %v1135_v13, %v1026_v38  ;;  %v2336_v38 = vld [vmem:[%s3287_s7 + $0x8] sm:$0xff]  ;;  %v3032_v13 = vpop.permute.xlu2 %1385 }
 0x29a   : > { %v1160_v40 = vmax.f32 %v1136_v56, 0.0 }
 0x29f   : > { %v1137_v14 = vpop.f32.mrf.mxu1 }
 0x2a0   : > { %v1138_v15 = vadd.f32 %v1137_v14, %v1031_v61 }
 0x2a2   : > { %v1161_v36 = vmax.f32 %v1138_v15, 0.0 }
 0x2a7   : > { %v1140_v16 = vpop.f32.mrf.mxu1 }
 0x2a8   : > { %v1141_v21 = vadd.f32 %v1140_v16, %v1036_v46  ;;  %v1158_v46 = vmax.f32 %v1131_v39, 0.0 }
 0x2aa   : > { %v1162_v55 = vmax.f32 %v1141_v21, 0.0 }
 0x2af   : > { %v1142_v18 = vpop.f32.mrf.mxu1 }
 0x2b0   : > { %v1143_v25 = vadd.f32 %v1142_v18, %v1041_v30  ;;  %v1235_v30 = vpack.c.bf16 %v1161_v36, %v1160_v40 }
 0x2b2   : > { %v1163_v27 = vmax.f32 %v1143_v25, 0.0 }
 0x2b4   : > { %v1236_v37 = vpack.c.bf16 %v1163_v27, %v1162_v55 }
 0x2b7   : > { %v1145_v20 = vpop.f32.mrf.mxu1 }
 0x2b8   : > { %v1146_v22 = vadd.f32 %v1145_v20, %v1046_v23  ;;  %v1159_v23 = vmax.f32 %v1133_v32, 0.0 }
 0x2ba   : > { %v1164_v19 = vmax.f32 %v1146_v22, 0.0  ;;  %v1234_v61 = vpack.c.bf16 %v1159_v23, %v1158_v46  ;;  %v3038_v22 = vpop.permute.xlu2 %1370 }
 0x2bf   : > { %v1147_v24 = vpop.f32.mrf.mxu1 }
 0x2c0   : > { %v1148_v26 = vadd.f32 %v1147_v24, %v1051_v33  ;;  %v2339_v33 = vld [vmem:[%s3287_s7 + $0x20] sm:$0xff] }
 0x2c2   : > { %v1165_v17 = vmax.f32 %v1148_v26, 0.0  ;;  %v2350_v26 = vld [vmem:[%s3287_s7 + $0x78] sm:$0xff] }
 0x2c4   : > { %v1237_v28 = vpack.c.bf16 %v1165_v17, %v1164_v19  ;;  %v1266_v17 = vpop.permute.xlu2 %1265 }
 0x2c6   : > { %1494 = vmatpush.bf16.msrb.mxu1 %v1237_v28  ;;  %2371 = vmatpush.bf16.msra.mxu2 %v1237_v28 }
 0x2ca   : > { %1495 = vmatpush.bf16.msrb.mxu1 %v1236_v37  ;;  %2372 = vmatpush.bf16.msra.mxu2 %v1236_v37 }
 0x2cc   : > { %v1251_v39 = vpop.permute.xlu2 %1250 }
 0x2ce   : > { %1496 = vmatpush.bf16.msrb.mxu1 %v1235_v30  ;;  %2373 = vmatpush.bf16.msra.mxu2 %v1235_v30 }
 0x2d2   : > { %1497 = vmatpush.bf16.msrb.mxu1 %v1234_v61  ;;  %2374 = vmatpush.bf16.msra.mxu2 %v1234_v61 }
 0x2d6   : > { %1498 = vmatpush.bf16.msrb.mxu1 %v1233_v10  ;;  %2375 = vmatpush.bf16.msra.mxu2 %v1233_v10 }
 0x2da   : > { %1499 = vmatpush.bf16.msrb.mxu1 %v1232_v3  ;;  %2376 = vmatpush.bf16.msra.mxu2 %v1232_v3 }
 0x2de   : > { %1500 = vmatpush.bf16.msrb.mxu1 %v1231_v59  ;;  %2377 = vmatpush.bf16.msra.mxu2 %v1231_v59  ;;  %v1286_v59 = vpop.permute.xlu0 %1285 }
 0x2e2   : > { %1501 = vmatpush.bf16.msrb.mxu1 %v2966_v50  ;;  %2378 = vmatpush.bf16.msra.mxu2 %v2966_v50  ;;  %v1316_v50 = vpop.permute.xlu1 %1315 }
 0x2e5   : > { %1502 = vmatmul.bf16.vlgmr.msrb.gmra.mxu1 %v2335_v31  ;;  %1522 = vmatmul.bf16.vlgmr.msra.gmra.mxu2 %v2339_v33 }
 0x2e6   : > { %v1271_v3 = vpop.permute.xlu0 %1270 }
 0x2ea   : > { %v1291_v54 = vpop.permute.xlu1 %1290 }
 0x2ee   : > { %v3025_v8 = vpop.permute.xlu0 %1375 }
 0x2f2   : > { %v3009_v49 = vpop.permute.xlu1 %1395 }
 0x2f5   : > { %1507 = vmatmul.bf16.gmra.mxu1 %v2336_v38  ;;  %1527 = vmatmul.bf16.gmra.mxu2 %v2340_v41 }
 0x2f6   : > { %v3034_v14 = vpop.permute.xlu0 %1360 }
 0x2fa   : > { %v3016_v62 = vpop.permute.xlu1 %1380 }
 0x2fe   : > { %v1256_v24 = vpop.permute.xlu0 %1255 }
 0x302   : > { %v1276_v4 = vpop.permute.xlu1 %1275 }
 0x305   : > { %1512 = vmatmul.bf16.gmra.mxu1 %v2337_v42  ;;  %1532 = vmatmul.bf16.gmra.mxu2 %v2341_v43 }
 0x306   : > { %v1241_v27 = vpop.permute.xlu0 %1240 }
 0x30a   : > { %v1261_v9 = vpop.permute.xlu1 %1260 }
 0x30e   : > { %v3045_v46 = vpop.permute.xlu0 %1345 }
 0x312   : > { %v3036_v16 = vpop.permute.xlu1 %1365 }
 0x315   : > { %1517 = vmatmul.bf16.gmra.mxu1 %v2338_v29  ;;  %1537 = vmatmul.bf16.gmra.mxu2 %v2342_v35 }
 0x31a   : > { %v3043_v21 = vpop.permute.xlu1 %1350 }
 0x322   : > { %v1246_v28 = vpop.permute.xlu1 %1245 }
 0x325   : > { %1542 = vmatmul.bf16.gmra.mxu2 %v2343_v44 }
 0x32a   : > { %v1331_v38 = vpop.permute.xlu1 %1330 }
 0x335   : > { %1547 = vmatmul.bf16.gmra.mxu2 %v2344_v45 }
 0x345   : > { %1552 = vmatmul.bf16.gmra.mxu2 %v2345_v47 }
 0x355   : > { %1557 = vmatmul.bf16.gmra.mxu2 %v2346_v51 }
 0x362   : > { %v3014_v58 = vpop.f32.mrf.mxu1 }
 0x365   : > { %1562 = vmatmul.bf16.gmra.mxu2 %v2347_v57 }
 0x368   : > { %v1523_v60 = vpop.f32.mrf.mxu2 }
 0x369   : > { %v1524_v47 = vadd.f32 %v1523_v60, %v1281_v7 }
 0x36a   : > { %v3018_v63 = vpop.f32.mrf.mxu1 }
 0x370   : > { %v1525_v1 = vpop.f32.mrf.mxu2 }
 0x371   : > { %v1526_v29 = vadd.f32 %v1525_v1, %v1286_v59 }
 0x372   : > { %v3023_v5 = vpop.f32.mrf.mxu1 }
 0x373   : > { %v1592_v51 = vmax.f32 %v1526_v29, 0.0  ;;  %v2354_v29 = vld [vmem:[%s3289_s9 + $0x14] sm:$0xf0] }
 0x375   : > { %1567 = vmatmul.bf16.gmra.mxu2 %v2348_v2 }
 0x378   : > { %v1528_v6 = vpop.f32.mrf.mxu2 }
 0x379   : > { %v1529_v41 = vadd.f32 %v1528_v6, %v1291_v54  ;;  %v1326_v54 = vpop.permute.xlu1 %1325 }
 0x37a   : > { %v3030_v12 = vpop.f32.mrf.mxu1 }
 0x380   : > { %v1530_v10 = vpop.f32.mrf.mxu2 }
 0x381   : > { %v1531_v61 = vadd.f32 %v1530_v10, %v1296_v0  ;;  %v1591_v0 = vmax.f32 %v1524_v47, 0.0 }
 0x382   : > { %v1513_v20 = vpop.f32.mrf.mxu1 }
 0x383   : > { %v1594_v35 = vmax.f32 %v1531_v61, 0.0 }
 0x385   : > { %1572 = vmatmul.bf16.gmra.mxu2 %v2349_v11 }
 0x388   : > { %v1533_v18 = vpop.f32.mrf.mxu2 }
 0x389   : > { %v1534_v40 = vadd.f32 %v1533_v18, %v1301_v52  ;;  %v1321_v52 = vpop.permute.xlu0 %1320  ;;  %v1651_v18 = vpack.c.bf16 %v1592_v51, %v1591_v0  ;;  %v2356_v0 = vld [vmem:[%s3289_s9 + $0x24] sm:$0xf0] }
 0x38a   : > { %v1515_v19 = vpop.f32.mrf.mxu1 }
 0x38b   : > { %v1595_v42 = vmax.f32 %v1534_v40, 0.0  ;;  %v1516_v11 = vadd.f32 %v1515_v19, %v1266_v17  ;;  %v1506_v17 = vadd.f32 %v3018_v63, %v1246_v28 }
 0x390   : > { %v1535_v25 = vpop.f32.mrf.mxu2 }
 0x391   : > { %v1536_v36 = vadd.f32 %v1535_v25, %v1306_v53  ;;  %v1514_v25 = vadd.f32 %v1513_v20, %v1261_v9  ;;  %v1504_v20 = vadd.f32 %v3014_v58, %v1241_v27 }
 0x392   : > { %v1518_v55 = vpop.f32.mrf.mxu1 }
 0x393   : > { %v1596_v31 = vmax.f32 %v1536_v36, 0.0  ;;  %v1519_v2 = vadd.f32 %v1518_v55, %v1271_v3  ;;  %v1509_v55 = vadd.f32 %v3023_v5, %v1251_v39  ;;  %v1587_v36 = vmax.f32 %v1514_v25, 0.0  ;;  %v2254_v5 = vld [vmem:[%s3289_s9] sm:$0xf]  ;;  %v2352_v39 = vld [vmem:[%s3289_s9 + $0x4] sm:$0xf0] }
 0x394   : > { %v2255_v58 = vor.u32 %v2352_v39, %v2254_v5 }
 0x395   : > { %1577 = vmatmul.bf16.gmra.mxu2 %v2350_v26  ;;  %v1653_v44 = vpack.c.bf16 %v1596_v31, %v1595_v42  ;;  %v1589_v60 = vmax.f32 %v1519_v2, 0.0  ;;  %v1585_v40 = vmax.f32 %v1509_v55, 0.0 }
 0x398   : > { %v1538_v15 = vpop.f32.mrf.mxu2 }
 0x399   : > { %v1539_v56 = vadd.f32 %v1538_v15, %v1311_v48  ;;  %v1593_v48 = vmax.f32 %v1529_v41, 0.0  ;;  %v1511_v15 = vadd.f32 %v3030_v12, %v1256_v24  ;;  %v1583_v24 = vmax.f32 %v1504_v20, 0.0 }
 0x39a   : > { %v1520_v45 = vpop.f32.mrf.mxu1 }
 0x39b   : > { %v1597_v23 = vmax.f32 %v1539_v56, 0.0  ;;  %v1521_v53 = vadd.f32 %v1520_v45, %v1276_v4  ;;  %v1652_v57 = vpack.c.bf16 %v1594_v35, %v1593_v48  ;;  %v1588_v4 = vmax.f32 %v1516_v11, 0.0 }
 0x39d   : > { %v1590_v59 = vmax.f32 %v1521_v53, 0.0  ;;  %v1649_v9 = vpack.c.bf16 %v1588_v4, %v1587_v36 }
 0x39f   : > { %v1650_v56 = vpack.c.bf16 %v1590_v59, %v1589_v60 }
 0x3a0   : > { %v1540_v32 = vpop.f32.mrf.mxu2 }
 0x3a1   : > { %v1541_v37 = vadd.f32 %v1540_v32, %v1316_v50  ;;  %v3047_v50 = vpop.permute.xlu2 %1355 }
 0x3a3   : > { %v1598_v30 = vmax.f32 %v1541_v37, 0.0  ;;  %v1586_v37 = vmax.f32 %v1511_v15, 0.0 }
 0x3a5   : > { %v1654_v33 = vpack.c.bf16 %v1598_v30, %v1597_v23  ;;  %v1584_v23 = vmax.f32 %v1506_v17, 0.0  ;;  %v1648_v12 = vpack.c.bf16 %v1586_v37, %v1585_v40  ;;  %v2302_v37 = vld [vmem:[%s3289_s9 + $0x60] sm:$0xf] }
 0x3a7   : > { %1823 = vmatpush.bf16.msrb.mxu3 %v1654_v33  ;;  %v1647_v31 = vpack.c.bf16 %v1584_v23, %v1583_v24 }
 0x3a8   : > { %v1543_v43 = vpop.f32.mrf.mxu2 }
 0x3a9   : > { %v1544_v10 = vadd.f32 %v1543_v43, %v1321_v52  ;;  %v1341_v3 = vpop.permute.xlu2 %1340  ;;  %v2262_v43 = vld [vmem:[%s3289_s9 + $0x10] sm:$0xf]  ;;  %v2270_v52 = vld [vmem:[%s3289_s9 + $0x20] sm:$0xf] }
 0x3aa   : > { %v2263_v45 = vor.u32 %v2354_v29, %v2262_v43  ;;  %v2256_v43 = vld [vmem:[%s3289_s9 + $0x8] sm:$0xf0] }
 0x3ab   : > { %1824 = vmatpush.bf16.msrb.mxu3 %v1653_v44  ;;  %v1599_v7 = vmax.f32 %v1544_v10, 0.0  ;;  %v2271_v10 = vor.u32 %v2356_v0, %v2270_v52  ;;  %v2288_v52 = vld [vmem:[%s3289_s9 + $0x48] sm:$0xf0] }
 0x3af   : > { %1825 = vmatpush.bf16.msrb.mxu3 %v1652_v57 }
 0x3b0   : > { %v1545_v6 = vpop.f32.mrf.mxu2 }
 0x3b1   : > { %v1546_v1 = vadd.f32 %v1545_v6, %v1326_v54  ;;  %v1336_v63 = vpop.permute.xlu2 %1335 }
 0x3b3   : > { %v1600_v26 = vmax.f32 %v1546_v1, 0.0  ;;  %1826 = vmatpush.bf16.msrb.mxu3 %v1651_v18  ;;  %v2358_v1 = vld [vmem:[%s3289_s9 + $0x34] sm:$0xf0] }
 0x3b5   : > { %v3050_v32 = vpack.c.bf16 %v1600_v26, %v1599_v7  ;;  %v2360_v7 = vld [vmem:[%s3289_s9 + $0x44] sm:$0xf0] }
 0x3b7   : > { %1827 = vmatpush.bf16.msrb.mxu3 %v1650_v56  ;;  %v2294_v56 = vld [vmem:[%s3289_s9 + $0x50] sm:$0xf] }
 0x3b8   : > { %v1548_v19 = vpop.f32.mrf.mxu2 }
 0x3b9   : > { %v1549_v30 = vadd.f32 %v1548_v19, %v1331_v38 }
 0x3bb   : > { %1828 = vmatpush.bf16.msrb.mxu3 %v1649_v9  ;;  %v1601_v27 = vmax.f32 %v1549_v30, 0.0  ;;  %v2364_v9 = vld [vmem:[%s3289_s9 + $0x64] sm:$0xf0] }
 0x3bf   : > { %1829 = vmatpush.bf16.msrb.mxu3 %v1648_v12  ;;  %v2303_v12 = vor.u32 %v2364_v9, %v2302_v37  ;;  %v1676_v9 = vpop.permute.xlu1 %1675 }
 0x3c0   : > { %v1550_v28 = vpop.f32.mrf.mxu2 }
 0x3c1   : > { %v1551_v61 = vadd.f32 %v1550_v28, %v1336_v63 }
 0x3c3   : > { %v1602_v33 = vmax.f32 %v1551_v61, 0.0  ;;  %1830 = vmatpush.bf16.msrb.mxu3 %v1647_v31 }
 0x3c5   : > { %v3061_v41 = vpack.c.bf16 %v1602_v33, %v1601_v27 }
 0x3c6   : > { %1831 = vmatmul.bf16.vlgmr.msrb.gmra.mxu3 %v2255_v58 }
 0x3c8   : > { %v1553_v38 = vpop.f32.mrf.mxu2 }
 0x3c9   : > { %v1554_v42 = vadd.f32 %v1553_v38, %v1341_v3  ;;  %v2362_v3 = vld [vmem:[%s3289_s9 + $0x54] sm:$0xf0] }
 0x3ca   : > { %v2295_v36 = vor.u32 %v2362_v3, %v2294_v56  ;;  %v1671_v3 = vpop.permute.xlu0 %1670 }
 0x3cb   : > { %v1603_v47 = vmax.f32 %v1554_v42, 0.0 }
 0x3d0   : > { %v1555_v35 = vpop.f32.mrf.mxu2 }
 0x3d1   : > { %v1556_v44 = vadd.f32 %v1555_v35, %v3045_v46  ;;  %v2353_v35 = vld [vmem:[%s3289_s9 + $0x14] sm:$0xf] }
 0x3d3   : > { %v1604_v48 = vmax.f32 %v1556_v44, 0.0 }
 0x3d5   : > { %v3070_v51 = vpack.c.bf16 %v1604_v48, %v1603_v47  ;;  %v2272_v47 = vld [vmem:[%s3289_s9 + $0x28] sm:$0xf0]  ;;  %v2357_v48 = vld [vmem:[%s3289_s9 + $0x34] sm:$0xf] }
 0x3d6   : > { %1836 = vmatmul.bf16.gmra.mxu3 %v2263_v45  ;;  %v2355_v45 = vld [vmem:[%s3289_s9 + $0x24] sm:$0xf] }
 0x3d8   : > { %v1558_v53 = vpop.f32.mrf.mxu2 }
 0x3d9   : > { %v1559_v57 = vadd.f32 %v1558_v53, %v3043_v21  ;;  %v2278_v21 = vld [vmem:[%s3289_s9 + $0x30] sm:$0xf] }
 0x3da   : > { %v2279_v25 = vor.u32 %v2358_v1, %v2278_v21  ;;  %v2365_v1 = vld [vmem:[%s3289_s9 + $0x74] sm:$0xf] }
 0x3db   : > { %v1605_v54 = vmax.f32 %v1559_v57, 0.0  ;;  %v2359_v57 = vld [vmem:[%s3289_s9 + $0x44] sm:$0xf] }
 0x3dc   : > { %v2291_v0 = vor.u32 %v2359_v57, %v2288_v52 }
 0x3e0   : > { %v1560_v2 = vpop.f32.mrf.mxu2 }
 0x3e1   : > { %v1561_v46 = vadd.f32 %v1560_v2, %v3047_v50  ;;  %v2286_v50 = vld [vmem:[%s3289_s9 + $0x40] sm:$0xf]  ;;  %v2361_v2 = vld [vmem:[%s3289_s9 + $0x54] sm:$0xf] }
 0x3e2   : > { %v2287_v15 = vor.u32 %v2360_v7, %v2286_v50  ;;  %v1666_v7 = vpop.permute.xlu2 %1665 }
 0x3e3   : > { %v1606_v6 = vmax.f32 %v1561_v46, 0.0  ;;  %v2296_v46 = vld [vmem:[%s3289_s9 + $0x58] sm:$0xf0] }
 0x3e5   : > { %v1658_v11 = vpack.c.bf16 %v1606_v6, %v1605_v54  ;;  %v2363_v54 = vld [vmem:[%s3289_s9 + $0x64] sm:$0xf]  ;;  %v2304_v6 = vld [vmem:[%s3289_s9 + $0x68] sm:$0xf0] }
 0x3e6   : > { %1841 = vmatmul.bf16.gmra.mxu3 %v2271_v10  ;;  %v2299_v10 = vor.u32 %v2361_v2, %v2296_v46 }
 0x3e8   : > { %v1563_v59 = vpop.f32.mrf.mxu2 }
 0x3f0   : > { %v1565_v18 = vpop.f32.mrf.mxu2 }
 0x3f1   : > { %v1566_v31 = vadd.f32 %v1565_v18, %v3036_v16  ;;  %v2312_v18 = vld [vmem:[%s3289_s9 + $0x78] sm:$0xf0] }
 0x3f6   : > { %1846 = vmatmul.bf16.gmra.mxu3 %v2279_v25  ;;  %v2315_v25 = vor.u32 %v2365_v1, %v2312_v18 }
 0x3f8   : > { %v1568_v60 = vpop.f32.mrf.mxu2 }
 0x3f9   : > { %v1569_v28 = vadd.f32 %v1568_v60, %v3038_v22  ;;  %v2366_v22 = vld [vmem:[%s3289_s9 + $0x74] sm:$0xf0] }
 0x3fb   : > { %v1609_v27 = vmax.f32 %v1569_v28, 0.0 }
 0x400   : > { %v1570_v26 = vpop.f32.mrf.mxu2 }
 0x406   : > { %1851 = vmatmul.bf16.gmra.mxu3 %v2287_v15 }
 0x408   : > { %v1573_v4 = vpop.f32.mrf.mxu2 }
 0x409   : > { %v1574_v24 = vadd.f32 %v1573_v4, %v3016_v62  ;;  %v1608_v62 = vmax.f32 %v1566_v31, 0.0 }
 0x40b   : > { %v1611_v61 = vmax.f32 %v1574_v24, 0.0 }
 0x410   : > { %v1575_v55 = vpop.f32.mrf.mxu2 }
 0x411   : > { %v1576_v40 = vadd.f32 %v1575_v55, %v3032_v13 }
 0x413   : > { %v1612_v39 = vmax.f32 %v1576_v40, 0.0 }
 0x415   : > { %v1661_v13 = vpack.c.bf16 %v1612_v39, %v1611_v61  ;;  %v1686_v61 = vpop.permute.xlu0 %1685 }
 0x416   : > { %1856 = vmatmul.bf16.gmra.mxu3 %v2295_v36 }
 0x418   : > { %v1578_v19 = vpop.f32.mrf.mxu2 }
 0x419   : > { %v1579_v17 = vadd.f32 %v1578_v19, %v3007_v34  ;;  %v1571_v34 = vadd.f32 %v1570_v26, %v3025_v8  ;;  %v2310_v8 = vld [vmem:[%s3289_s9 + $0x70] sm:$0xf] }
 0x41a   : > { %v2311_v16 = vor.u32 %v2366_v22, %v2310_v8 }
 0x41b   : > { %v1613_v30 = vmax.f32 %v1579_v17, 0.0  ;;  %v1610_v58 = vmax.f32 %v1571_v34, 0.0 }
 0x41d   : > { %v1660_v33 = vpack.c.bf16 %v1610_v58, %v1609_v27 }
 0x420   : > { %v1580_v20 = vpop.f32.mrf.mxu2 }
 0x421   : > { %v1581_v23 = vadd.f32 %v1580_v20, %v3009_v49  ;;  %v1564_v49 = vadd.f32 %v1563_v59, %v3034_v14  ;;  %v2351_v14 = vld [vmem:[%s3289_s9 + $0x4] sm:$0xf]  ;;  %v2307_v59 = vor.u32 %v2363_v54, %v2304_v6 }
 0x422   : > { %v2259_v29 = vor.u32 %v2351_v14, %v2256_v43 }
 0x423   : > { %v1614_v5 = vmax.f32 %v1581_v23, 0.0  ;;  %v1607_v38 = vmax.f32 %v1564_v49, 0.0 }
 0x425   : > { %v1662_v63 = vpack.c.bf16 %v1614_v5, %v1613_v30  ;;  %v1659_v42 = vpack.c.bf16 %v1608_v62, %v1607_v38  ;;  %v1681_v30 = vpop.permute.xlu2 %1680  ;;  %v1691_v62 = vpop.permute.xlu1 %1690 }
 0x426   : > { %1861 = vmatmul.bf16.gmra.mxu3 %v2303_v12 }
 0x427   : > { %1872 = vmatpush.bf16.msrb.mxu0 %v1662_v63 }
 0x42b   : > { %1873 = vmatpush.bf16.msrb.mxu0 %v1661_v13 }
 0x42f   : > { %1874 = vmatpush.bf16.msrb.mxu0 %v1660_v33 }
 0x433   : > { %1875 = vmatpush.bf16.msrb.mxu0 %v1659_v42  ;;  %v1696_v42 = vpop.permute.xlu2 %1695 }
 0x436   : > { %1866 = vmatmul.bf16.gmra.mxu3 %v2311_v16 }
 0x437   : > { %1876 = vmatpush.bf16.msrb.mxu0 %v1658_v11 }
 0x43b   : > { %1877 = vmatpush.bf16.msrb.mxu0 %v3070_v51  ;;  %v2280_v51 = vld [vmem:[%s3289_s9 + $0x38] sm:$0xf0]  ;;  %v1711_v46 = vpop.permute.xlu2 %1710 }
 0x43c   : > { %v2283_v53 = vor.u32 %v2357_v48, %v2280_v51  ;;  %v1706_v51 = vpop.permute.xlu1 %1705 }
 0x43f   : > { %1878 = vmatpush.bf16.msrb.mxu0 %v3061_v41  ;;  %v2264_v41 = vld [vmem:[%s3289_s9 + $0x18] sm:$0xf0] }
 0x440   : > { %v2267_v44 = vor.u32 %v2353_v35, %v2264_v41  ;;  %v1701_v41 = vpop.permute.xlu0 %1700 }
 0x443   : > { %1879 = vmatpush.bf16.msrb.mxu0 %v3050_v32  ;;  %v2275_v32 = vor.u32 %v2355_v45, %v2272_v47 }
 0x446   : > { %1880 = vmatmul.bf16.vlgmr.msrb.gmra.mxu0 %v2259_v29 }
 0x449   : > { %v1832_v11 = vpop.f32.mrf.mxu3 }
 0x44a   : > { %v1833_v26 = vadd.f32 %v1832_v11, %v1666_v7  ;;  %v1721_v7 = vpop.permute.xlu1 %1720 }
 0x451   : > { %v1834_v21 = vpop.f32.mrf.mxu3 }
 0x452   : > { %v1835_v36 = vadd.f32 %v1834_v21, %v1671_v3  ;;  %v1716_v21 = vpop.permute.xlu0 %1715 }
 0x456   : > { %1885 = vmatmul.bf16.gmra.mxu0 %v2267_v44 }
 0x459   : > { %v1837_v60 = vpop.f32.mrf.mxu3 }
 0x45a   : > { %v1838_v20 = vadd.f32 %v1837_v60, %v1676_v9  ;;  %v2455_v60 = vmov -inf  }
 0x45b   : > { %451 = vst.msk [vmem:[%s3183_s14] sm:$0xff] %vm450_vm2, %v2455_v60 }
 0x45c   : > { %452 = vst.msk [vmem:[%s3183_s14 + $0x8] sm:$0xff] %vm450_vm2, %v2455_v60 }
 0x45d   : > { %453 = vst.msk [vmem:[%s3183_s14 + $0x10] sm:$0xff] %vm450_vm2, %v2455_v60 }
 0x45e   : > { %454 = vst.msk [vmem:[%s3183_s14 + $0x18] sm:$0xff] %vm450_vm2, %v2455_v60 }
 0x45f   : > { %455 = vst.msk [vmem:[%s3183_s14 + $0x20] sm:$0xff] %vm450_vm2, %v2455_v60 }
 0x460   : > { %456 = vst.msk [vmem:[%s3183_s14 + $0x28] sm:$0xff] %vm450_vm2, %v2455_v60 }
 0x461   : > { %v1839_v50 = vpop.f32.mrf.mxu3  ;;  %457 = vst.msk [vmem:[%s3183_s14 + $0x30] sm:$0xff] %vm450_vm2, %v2455_v60 }
 0x462   : > { %v1840_v5 = vadd.f32 %v1839_v50, %v1681_v30  ;;  %458 = vst.msk [vmem:[%s3183_s14 + $0x38] sm:$0xff] %vm450_vm2, %v2455_v60 }
 0x463   : > { %459 = vst.msk [vmem:[%s3183_s14 + $0x40] sm:$0xff] %vm450_vm2, %v2455_v60 }
 0x464   : > { %460 = vst.msk [vmem:[%s3183_s14 + $0x48] sm:$0xff] %vm450_vm2, %v2455_v60 }
 0x465   : > { %461 = vst.msk [vmem:[%s3183_s14 + $0x50] sm:$0xff] %vm450_vm2, %v2455_v60 }
 0x466   : > { %1890 = vmatmul.bf16.gmra.mxu0 %v2275_v32  ;;  %462 = vst.msk [vmem:[%s3183_s14 + $0x58] sm:$0xff] %vm450_vm2, %v2455_v60 }
 0x467   : > { %463 = vst.msk [vmem:[%s3183_s14 + $0x60] sm:$0xff] %vm450_vm2, %v2455_v60 }
 0x468   : > { %464 = vst.msk [vmem:[%s3183_s14 + $0x68] sm:$0xff] %vm450_vm2, %v2455_v60 }
 0x469   : > { %v1842_v55 = vpop.f32.mrf.mxu3  ;;  %465 = vst.msk [vmem:[%s3183_s14 + $0x70] sm:$0xff] %vm450_vm2, %v2455_v60 }
 0x46a   : > { %v1843_v31 = vadd.f32 %v1842_v55, %v1686_v61  ;;  %v1726_v55 = vpop.permute.xlu2 %1725  ;;  %466 = vst.msk [vmem:[%s3183_s14 + $0x78] sm:$0xff] %vm450_vm2, %v2455_v60 }
 0x46d   : > { %v1981_v60 = vld [vmem:[%s3183_s14 + $0x58] sm:$0xff] }
 0x471   : > { %v1844_v40 = vpop.f32.mrf.mxu3 }
 0x472   : > { %v1845_v33 = vadd.f32 %v1844_v40, %v1691_v62 }
 0x476   : > { %1895 = vmatmul.bf16.gmra.mxu0 %v2283_v53 }
 0x479   : > { %v1847_v63 = vpop.f32.mrf.mxu3 }
 0x47a   : > { %v1848_v14 = vadd.f32 %v1847_v63, %v1696_v42 }
 0x481   : > { %v1849_v27 = vpop.f32.mrf.mxu3 }
 0x482   : > { %v1850_v44 = vadd.f32 %v1849_v27, %v1701_v41 }
 0x486   : > { %1900 = vmatmul.bf16.gmra.mxu0 %v2291_v0 }
 0x489   : > { %v1852_v16 = vpop.f32.mrf.mxu3 }
 0x48a   : > { %v1853_v53 = vadd.f32 %v1852_v16, %v1706_v51  ;;  %v1972_v16 = vld [vmem:[%s3183_s14 + $0x10] sm:$0xff] }
 0x491   : > { %v1854_v45 = vpop.f32.mrf.mxu3 }
 0x496   : > { %1905 = vmatmul.bf16.gmra.mxu0 %v2299_v10  ;;  %v1855_v10 = vadd.f32 %v1854_v45, %v1711_v46 }
 0x499   : > { %v1857_v0 = vpop.f32.mrf.mxu3 }
 0x49a   : > { %v1858_v1 = vadd.f32 %v1857_v0, %v1716_v21  ;;  %v1977_v0 = vld [vmem:[%s3183_s14 + $0x38] sm:$0xff] }
 0x4a6   : > { %1910 = vmatmul.bf16.gmra.mxu0 %v2307_v59  ;;  %v1859_v59 = vpop.f32.mrf.mxu3 }
 0x4b6   : > { %1915 = vmatmul.bf16.gmra.mxu0 %v2315_v25 }
 0x4c3   : > { %v1881_v15 = vpop.f32.mrf.mxu0 }
 0x4c4   : > { %v1882_v4 = vadd.f32 %v1881_v15, %v1833_v26  ;;  %v1862_v26 = vpop.f32.mrf.mxu3  ;;  %v1860_v15 = vadd.f32 %v1859_v59, %v1721_v7 }
 0x4c6   : > { %v1922_v56 = vsel %vm1921_vm1, %v1882_v4, -inf }
 0x4c7   : > { %1923 = vmax.xlane.f32.xlu0 %v1922_v56 }
 0x4cb   : > { %v1883_v19 = vpop.f32.mrf.mxu0 }
 0x4cc   : > { %v1884_v17 = vadd.f32 %v1883_v19, %v1835_v36  ;;  %v1863_v36 = vadd.f32 %v1862_v26, %v1726_v55  ;;  %v1864_v19 = vpop.f32.mrf.mxu3  ;;  %v1982_v26 = vld [vmem:[%s3183_s14 + $0x60] sm:$0xff] }
 0x4ce   : > { %v1925_v37 = vsel %vm1921_vm1, %v1884_v17, -inf }
 0x4cf   : > { %1926 = vmax.xlane.f32.xlu1 %v1925_v37 }
 0x4d3   : > { %v1886_v23 = vpop.f32.mrf.mxu0 }
 0x4d4   : > { %v1887_v12 = vadd.f32 %v1886_v23, %v1838_v20  ;;  %v1731_v20 = vpop.permute.xlu0 %1730 }
 0x4d5   : > { %v1865_v40 = vadd.f32 %v1864_v19, %v1731_v20 }
 0x4d6   : > { %v1928_v24 = vsel %vm1921_vm1, %v1887_v12, -inf }
 0x4d7   : > { %1929 = vmax.xlane.f32.xlu2 %v1928_v24  ;;  %v1867_v24 = vpop.f32.mrf.mxu3 }
 0x4db   : > { %v1888_v34 = vpop.f32.mrf.mxu0 }
 0x4dc   : > { %v1889_v39 = vadd.f32 %v1888_v34, %v1840_v5  ;;  %v1736_v5 = vpop.permute.xlu1 %1735 }
 0x4dd   : > { %v1868_v34 = vadd.f32 %v1867_v24, %v1736_v5 }
 0x4de   : > { %v1931_v28 = vsel %vm1921_vm1, %v1889_v39, -inf }
 0x4df   : > { %1932 = vmax.xlane.f32.xlu2 %v1931_v28  ;;  %v1869_v61 = vpop.f32.mrf.mxu3 }
 0x4e3   : > { %v1891_v58 = vpop.f32.mrf.mxu0 }
 0x4e4   : > { %v1892_v13 = vadd.f32 %v1891_v58, %v1843_v31  ;;  %v1970_v31 = vld [vmem:[%s3183_s14] sm:$0xff]  ;;  %v1741_v58 = vpop.permute.xlu2 %1740 }
 0x4e6   : > { %v1934_v49 = vsel %vm1921_vm1, %v1892_v13, -inf  ;;  %v1870_v13 = vadd.f32 %v1869_v61, %v1741_v58 }
 0x4e7   : > { %1935 = vmax.xlane.f32.xlu0 %v1934_v49 }
 0x4eb   : > { %v1893_v38 = vpop.f32.mrf.mxu0 }
 0x4ec   : > { %v1894_v8 = vadd.f32 %v1893_v38, %v1845_v33 }
 0x4ee   : > { %v1937_v22 = vsel %vm1921_vm1, %v1894_v8, -inf  ;;  %v1971_v8 = vld [vmem:[%s3183_s14 + $0x8] sm:$0xff] }
 0x4ef   : > { %1938 = vmax.xlane.f32.xlu1 %v1937_v22 }
 0x4f3   : > { %v1896_v43 = vpop.f32.mrf.mxu0 }
 0x4f4   : > { %v1897_v29 = vadd.f32 %v1896_v43, %v1848_v14 }
 0x4f6   : > { %v1940_v35 = vsel %vm1921_vm1, %v1897_v29, -inf  ;;  %v1973_v29 = vld [vmem:[%s3183_s14 + $0x18] sm:$0xff] }
 0x4f7   : > { %1941 = vmax.xlane.f32.xlu2 %v1940_v35 }
 0x4fb   : > { %v1898_v47 = vpop.f32.mrf.mxu0 }
 0x4fc   : > { %v1899_v32 = vadd.f32 %v1898_v47, %v1850_v44  ;;  %v1974_v44 = vld [vmem:[%s3183_s14 + $0x20] sm:$0xff] }
 0x4fe   : > { %v1943_v48 = vsel %vm1921_vm1, %v1899_v32, -inf  ;;  %v1975_v32 = vld [vmem:[%s3183_s14 + $0x28] sm:$0xff] }
 0x4ff   : > { %1944 = vmax.xlane.f32.xlu0 %v1943_v48 }
 0x503   : > { %v1901_v57 = vpop.f32.mrf.mxu0 }
 0x504   : > { %v1902_v52 = vadd.f32 %v1901_v57, %v1853_v53  ;;  %v1976_v53 = vld [vmem:[%s3183_s14 + $0x30] sm:$0xff] }
 0x506   : > { %v1946_v2 = vsel %vm1921_vm1, %v1902_v52, -inf }
 0x507   : > { %1947 = vmax.xlane.f32.xlu1 %v1946_v2 }
 0x50b   : > { %v1903_v54 = vpop.f32.mrf.mxu0 }
 0x50c   : > { %v1904_v6 = vadd.f32 %v1903_v54, %v1855_v10  ;;  %v1978_v10 = vld [vmem:[%s3183_s14 + $0x40] sm:$0xff] }
 0x50e   : > { %v1949_v11 = vsel %vm1921_vm1, %v1904_v6, -inf }
 0x50f   : > { %1950 = vmax.xlane.f32.xlu2 %v1949_v11  ;;  %v1979_v11 = vld [vmem:[%s3183_s14 + $0x48] sm:$0xff] }
 0x513   : > { %v1906_v18 = vpop.f32.mrf.mxu0 }
 0x514   : > { %v1907_v25 = vadd.f32 %v1906_v18, %v1858_v1  ;;  %v1980_v1 = vld [vmem:[%s3183_s14 + $0x50] sm:$0xff] }
 0x516   : > { %v1952_v50 = vsel %vm1921_vm1, %v1907_v25, -inf }
 0x517   : > { %1953 = vmax.xlane.f32.xlu0 %v1952_v50 }
 0x51b   : > { %v1908_v4 = vpop.f32.mrf.mxu0 }
 0x51c   : > { %v1909_v56 = vadd.f32 %v1908_v4, %v1860_v15 }
 0x51e   : > { %v1955_v3 = vsel %vm1921_vm1, %v1909_v56, -inf  ;;  %v1983_v56 = vld [vmem:[%s3183_s14 + $0x68] sm:$0xff] }
 0x51f   : > { %1956 = vmax.xlane.f32.xlu1 %v1955_v3 }
 0x523   : > { %v1911_v17 = vpop.f32.mrf.mxu0 }
 0x524   : > { %v1912_v37 = vadd.f32 %v1911_v17, %v1863_v36  ;;  %v1984_v36 = vld [vmem:[%s3183_s14 + $0x70] sm:$0xff] }
 0x526   : > { %v1958_v9 = vsel %vm1921_vm1, %v1912_v37, -inf  ;;  %v1985_v37 = vld [vmem:[%s3183_s14 + $0x78] sm:$0xff] }
 0x527   : > { %1959 = vmax.xlane.f32.xlu2 %v1958_v9 }
 0x52b   : > { %v1913_v23 = vpop.f32.mrf.mxu0 }
 0x52c   : > { %v1914_v12 = vadd.f32 %v1913_v23, %v1865_v40 }
 0x52e   : > { %v1961_v30 = vsel %vm1921_vm1, %v1914_v12, -inf }
 0x52f   : > { %1962 = vmax.xlane.f32.xlu0 %v1961_v30 }
 0x533   : > { %v1916_v39 = vpop.f32.mrf.mxu0 }
 0x534   : > { %v1917_v63 = vadd.f32 %v1916_v39, %v1868_v34 }
 0x536   : > { %v1964_v28 = vsel %vm1921_vm1, %v1917_v63, -inf }
 0x537   : > { %1965 = vmax.xlane.f32.xlu1 %v1964_v28 }
 0x53a   : > { %v1924_v49 = vpop.xlane.xlu0 %1923 }
 0x53b   : > { %v1986_v27 = vmax.f32 %v1970_v31, %v1924_v49  ;;  %v1918_v62 = vpop.f32.mrf.mxu0 }
 0x53c   : > { %v1919_v33 = vadd.f32 %v1918_v62, %v1870_v13 }
 0x53d   : > { %2003 = vst.msk [vmem:[%s3183_s14] sm:$0xff] %vm450_vm2, %v1986_v27 }
 0x53e   : > { %v1967_v38 = vsel %vm1921_vm1, %v1919_v33, -inf }
 0x53f   : > { %1968 = vmax.xlane.f32.xlu2 %v1967_v38 }
 0x542   : > { %v1927_v22 = vpop.xlane.xlu1 %1926 }
 0x543   : > { %v1987_v42 = vmax.f32 %v1971_v8, %v1927_v22 }
 0x545   : > { %2004 = vst.msk [vmem:[%s3183_s14 + $0x8] sm:$0xff] %vm450_vm2, %v1987_v42 }
 0x54a   : > { %v1930_v14 = vpop.xlane.xlu2 %1929 }
 0x54b   : > { %v1988_v43 = vmax.f32 %v1972_v16, %v1930_v14 }
 0x54d   : > { %2005 = vst.msk [vmem:[%s3183_s14 + $0x10] sm:$0xff] %vm450_vm2, %v1988_v43 }
 0x552   : > { %v1933_v35 = vpop.xlane.xlu2 %1932 }
 0x553   : > { %v1989_v41 = vmax.f32 %v1973_v29, %v1933_v35 }
 0x555   : > { %2006 = vst.msk [vmem:[%s3183_s14 + $0x18] sm:$0xff] %vm450_vm2, %v1989_v41 }
 0x55a   : > { %v1936_v45 = vpop.xlane.xlu0 %1935 }
 0x55b   : > { %v1990_v47 = vmax.f32 %v1974_v44, %v1936_v45 }
 0x55d   : > { %2007 = vst.msk [vmem:[%s3183_s14 + $0x20] sm:$0xff] %vm450_vm2, %v1990_v47 }
 0x562   : > { %v1939_v48 = vpop.xlane.xlu1 %1938 }
 0x563   : > { %v1991_v51 = vmax.f32 %v1975_v32, %v1939_v48 }
 0x565   : > { %2008 = vst.msk [vmem:[%s3183_s14 + $0x28] sm:$0xff] %vm450_vm2, %v1991_v51 }
 0x56a   : > { %v1942_v57 = vpop.xlane.xlu2 %1941 }
 0x56b   : > { %v1992_v52 = vmax.f32 %v1976_v53, %v1942_v57 }
 0x56d   : > { %2009 = vst.msk [vmem:[%s3183_s14 + $0x30] sm:$0xff] %vm450_vm2, %v1992_v52 }
 0x572   : > { %v1945_v2 = vpop.xlane.xlu0 %1944 }
 0x573   : > { %v1993_v46 = vmax.f32 %v1977_v0, %v1945_v2 }
 0x575   : > { %2010 = vst.msk [vmem:[%s3183_s14 + $0x38] sm:$0xff] %vm450_vm2, %v1993_v46 }
 0x57a   : > { %v1948_v54 = vpop.xlane.xlu1 %1947 }
 0x57b   : > { %v1994_v6 = vmax.f32 %v1978_v10, %v1948_v54 }
 0x57d   : > { %2011 = vst.msk [vmem:[%s3183_s14 + $0x40] sm:$0xff] %vm450_vm2, %v1994_v6 }
 0x582   : > { %v1951_v59 = vpop.xlane.xlu2 %1950 }
 0x583   : > { %v1995_v21 = vmax.f32 %v1979_v11, %v1951_v59 }
 0x585   : > { %2012 = vst.msk [vmem:[%s3183_s14 + $0x48] sm:$0xff] %vm450_vm2, %v1995_v21 }
 0x58a   : > { %v1954_v18 = vpop.xlane.xlu0 %1953 }
 0x58b   : > { %v1996_v25 = vmax.f32 %v1980_v1, %v1954_v18 }
 0x58d   : > { %2013 = vst.msk [vmem:[%s3183_s14 + $0x50] sm:$0xff] %vm450_vm2, %v1996_v25 }
 0x592   : > { %v1957_v50 = vpop.xlane.xlu1 %1956 }
 0x593   : > { %v1997_v7 = vmax.f32 %v1981_v60, %v1957_v50 }
 0x595   : > { %2014 = vst.msk [vmem:[%s3183_s14 + $0x58] sm:$0xff] %vm450_vm2, %v1997_v7 }
 0x59a   : > { %v1960_v15 = vpop.xlane.xlu2 %1959 }
 0x59b   : > { %v1998_v4 = vmax.f32 %v1982_v26, %v1960_v15 }
 0x59d   : > { %2015 = vst.msk [vmem:[%s3183_s14 + $0x60] sm:$0xff] %vm450_vm2, %v1998_v4 }
 0x5a2   : > { %v1963_v3 = vpop.xlane.xlu0 %1962 }
 0x5a3   : > { %v1999_v55 = vmax.f32 %v1983_v56, %v1963_v3 }
 0x5a5   : > { %2016 = vst.msk [vmem:[%s3183_s14 + $0x68] sm:$0xff] %vm450_vm2, %v1999_v55 }
 0x5aa   : > { %v1966_v19 = vpop.xlane.xlu1 %1965 }
 0x5ab   : > { %v2000_v17 = vmax.f32 %v1984_v36, %v1966_v19 }
 0x5ad   : > { %2017 = vst.msk [vmem:[%s3183_s14 + $0x70] sm:$0xff] %vm450_vm2, %v2000_v17 }
 0x5b2   : > { %v1969_v9 = vpop.xlane.xlu2 %1968 }
 0x5b3   : > { %v2001_v20 = vmax.f32 %v1985_v37, %v1969_v9 }
 0x5b5   : > { %2018 = vst.msk [vmem:[%s3183_s14 + $0x78] sm:$0xff] %vm450_vm2, %v2001_v20 }
 0x5b6 PF: > { %s21_s19 = sadd.s32 1, %s2450_s19   ;;  %s3292_s17 = smov %s2446_s18 }
 0x5b7   : > { %p18_p5 = scmp.ge.s32.totalorder %s21_s19, 4   ;;  %s3293_s18 = smov %s3295_s20 }
 0x5b9   :  { %20 = sbr.rel (!%p18_p5) target bundleno = 2 (0x2), region = 98 }

// kernel: tpu_custom_call.1
= control target key start
LH: loop header
LB: loop body
LE: loop exit
PB: predicated region body
PF: predicated region fallthrough
CT: control target
= control target key end

     0   :  { %s2516_s17 = smov 0   ;;  %s2518_s18 = smov 0   ;;  %s3280_s0 = inlined_call_operand.vmem [shape: f32[2,3,16], index: 0, kind: input, shape index: {}]   ;;  %s3281_s1 = inlined_call_operand.vmem [shape: f32[64,3], index: 1, kind: input, shape index: {}]   ;;  %s3282_s2 = inlined_call_operand.vmem [shape: f32[64,1], index: 2, kind: input, shape index: {}]   ;;  %s3283_s3 = inlined_call_operand.vmem [shape: bf16[128,64], index: 3, kind: input, shape index: {}]   ;;  %s3284_s4 = inlined_call_operand.vmem [shape: f32[128,1], index: 4, kind: input, shape index: {}]   ;;  %s3285_s5 = inlined_call_operand.vmem [shape: bf16[128,128], index: 5, kind: input, shape index: {}]   ;;  %s3286_s6 = inlined_call_operand.vmem [shape: f32[128,1], index: 6, kind: input, shape index: {}]   ;;  %s3287_s7 = inlined_call_operand.vmem [shape: bf16[256,128], index: 7, kind: input, shape index: {}]   ;;  %s3288_s8 = inlined_call_operand.vmem [shape: f32[256,1], index: 8, kind: input, shape index: {}]   ;;  %s3289_s9 = inlined_call_operand.vmem [shape: bf16[128,256], index: 9, kind: input, shape index: {}]   ;;  %s3290_s10 = inlined_call_operand.vmem [shape: f32[128,1], index: 10, kind: input, shape index: {}]   ;;  %s3291_s11 = inlined_call_operand.vmem [shape: f32[1,2,128,1], index: 11, kind: output, shape index: {}]  }
   0x1   :  { %s2520_s19 = smov 0  }
   0x2 LB: > { %s36_s20 = sadd.s32 1, %s2446_s18  ;;  %p2112_p0 = scmp.ge.s32.totalorder %s2450_s19, 1  ;;  %s2450_s19 = sphi %s2520_s19, %s21_s19   ;;  %s2446_s18 = sphi %s2518_s18, %s3293_s18   ;;  %s2442_s17 = sphi %s2516_s17, %s3292_s17  }
   0x3   : > { %p38_p1 = scmp.ge.s32.totalorder %s36_s20, 2  ;;  %p374_p2 = scmp.lt.s32.totalorder %s2450_s19, 3 }
   0x5   : > { %s3295_s20 = smov (%p38_p1, %s36_s20), 0  ;;  %p375_p3 = pnand %p2112_p0, %p374_p2 }
   0x6   : > { %p426_p4 = scmp.lt.s32.totalorder (!%p375_p3), %s2442_s17, 1 }
   0x7   : > { %378 = sbr.rel (%p375_p3) target bundleno = 1462 (0x5b6), region = 64 }
   0xc   : > { %v474_v0 = vld [vmem:[%s3281_s1 + $0x30] sm:$0xff]  ;;  %v471_v1 = vld [vmem:[%s3281_s1 + $0x18] sm:$0xff]  ;;  %v2452_v2 = vmov 2   ;;  %v2453_v3 = vmov 1   ;;  %v473_v5 = vld [vmem:[%s3281_s1 + $0x28] sm:$0xff]  ;;  %v2454_v8 = vmov 0  }
   0xd   : > { %2418 = vset.pattern.permute.xlu0 %v2452_v2  ;;  %2408 = vset.pattern.permute.xlu2 %v2452_v2  ;;  %v475_v4 = vld [vmem:[%s3281_s1 + $0x38] sm:$0xff]  ;;  %v472_v6 = vld [vmem:[%s3281_s1 + $0x20] sm:$0xff]  ;;  %v482_v9 = vld [vmem:[%s3282_s2 + $0x30] sm:$0xff]  ;;  %s3297_s17 = smov (!%p426_p4, %s2442_s17), 1  ;;  %vm843_vm0 = vcmask 523264   ;;  %vm1921_vm1 = vcmask 130048  }
   0xe   : > { %2407 = vset.pattern.permute.xlu1 %v2453_v3  ;;  %607 = vperm.xlu2 %2408, %v474_v0   ;;  %v468_v7 = vld [vmem:[%s3281_s1] sm:$0xff]  ;;  %v483_v10 = vld [vmem:[%s3282_s2 + $0x38] sm:$0xff]  ;;  %v470_v11 = vld [vmem:[%s3281_s1 + $0x10] sm:$0xff]  ;;  %s2113_s27 = sshll.u32 %s3297_s17, 2  ;;  %s2318_s30 = sshll.u32 %s3297_s17, 7  ;;  %vm450_vm2 = vcmask 7168  }
   0xf   : > { %558 = vperm.xlu1 %2407, %v474_v0   ;;  %595 = vperm.xlu0 %2418, %v471_v1   ;;  %v479_v12 = vld [vmem:[%s3282_s2 + $0x18] sm:$0xff]  ;;  %v480_v13 = vld [vmem:[%s3282_s2 + $0x20] sm:$0xff]  ;;  %v481_v14 = vld [vmem:[%s3282_s2 + $0x28] sm:$0xff]  ;;  %s432_s15 = scalar_lea.vmem %s3280_s0, %s2113_s27  ;;  %s3183_s14 = scalar_lea.vmem %s3291_s11, %s2318_s30 }
  0x10   : > { %v715_v15 = vld [vmem:[%s3284_s4 + $0x60] sm:$0xff]  ;;  %v469_v16 = vld [vmem:[%s3281_s1 + $0x8] sm:$0xff]  ;;  %v714_v17 = vld [vmem:[%s3284_s4 + $0x58] sm:$0xff] }
  0x11   : > { %v709_v18 = vld [vmem:[%s3284_s4 + $0x30] sm:$0xff]  ;;  %v708_v20 = vld [vmem:[%s3284_s4 + $0x28] sm:$0xff]  ;;  %v476_v22 = vld [vmem:[%s3282_s2] sm:$0xff] }
  0x12   : > { %v478_v19 = vld [vmem:[%s3282_s2 + $0x10] sm:$0xff]  ;;  %v477_v23 = vld [vmem:[%s3282_s2 + $0x8] sm:$0xff]  ;;  %v703_v24 = vld [vmem:[%s3284_s4] sm:$0xff] }
  0x13   : > { %v717_v26 = vld [vmem:[%s3284_s4 + $0x70] sm:$0xff]  ;;  %v718_v27 = vld [vmem:[%s3284_s4 + $0x78] sm:$0xff]  ;;  %v716_v30 = vld [vmem:[%s3284_s4 + $0x68] sm:$0xff] }
  0x14   : > { %v964_v28 = vld [vmem:[%s3286_s6 + $0x78] sm:$0xff]  ;;  %v713_v31 = vld [vmem:[%s3284_s4 + $0x50] sm:$0xff]  ;;  %v711_v36 = vld [vmem:[%s3284_s4 + $0x40] sm:$0xff] }
  0x15   : > { %v959_v32 = vld [vmem:[%s3286_s6 + $0x50] sm:$0xff]  ;;  %v712_v37 = vld [vmem:[%s3284_s4 + $0x48] sm:$0xff]  ;;  %v710_v41 = vld [vmem:[%s3284_s4 + $0x38] sm:$0xff] }
  0x16   : > { %611 = vperm.xlu2 %2408, %v475_v4   ;;  %v958_v38 = vld [vmem:[%s3286_s6 + $0x48] sm:$0xff]  ;;  %v707_v43 = vld [vmem:[%s3284_s4 + $0x20] sm:$0xff]  ;;  %v705_v47 = vld [vmem:[%s3284_s4 + $0x10] sm:$0xff] }
  0x17   : > { %562 = vperm.xlu1 %2407, %v475_v4   ;;  %2419 = vset.pattern.permute.xlu0 %v2453_v3  ;;  %v953_v44 = vld [vmem:[%s3286_s6 + $0x20] sm:$0xff]  ;;  %v706_v48 = vld [vmem:[%s3284_s4 + $0x18] sm:$0xff]  ;;  %v704_v54 = vld [vmem:[%s3284_s4 + $0x8] sm:$0xff] }
  0x18   : > { %554 = vperm.xlu0 %2419, %v473_v5   ;;  %v952_v50 = vld [vmem:[%s3286_s6 + $0x18] sm:$0xff]  ;;  %v467_v51 = vld [vmem:[%s432_s15] sm:$0x7]  ;;  %v963_v57 = vld [vmem:[%s3286_s6 + $0x70] sm:$0xff] }
  0x19   : > { %v2680_v55 = vperm.slane %v467_v51, 1  ;;  %v2682_v56 = vperm.slane %v467_v51, 0  ;;  %v1212_v60 = vld [vmem:[%s3288_s8 + $0x70] sm:$0xff]  ;;  %v2693_v61 = vperm.slane %v467_v51, 2 }
  0x1e   : > { %2410 = vset.pattern.permute.xlu2 %v2453_v3 }
  0x1f   : > { %2409 = vset.pattern.permute.xlu1 %v2454_v8  ;;  %550 = vperm.xlu2 %2410, %v472_v6  }
  0x20   : > { %511 = vperm.xlu1 %2409, %v473_v5   ;;  %534 = vperm.xlu0 %2419, %v468_v7  }
  0x27   : > { %2412 = vset.pattern.permute.xlu2 %v2452_v2 }
  0x28   : > { %2411 = vset.pattern.permute.xlu1 %v2452_v2  ;;  %2422 = vset.pattern.permute.xlu0 %v2454_v8 }
  0x29   : > { %599 = vperm.xlu1 %2411, %v472_v6   ;;  %603 = vperm.xlu2 %2412, %v473_v5  }
  0x2a   : > { %516 = vperm.xlu0 %2422, %v474_v0  }
  0x31   : > { %2413 = vset.pattern.permute.xlu1 %v2454_v8  ;;  %2414 = vset.pattern.permute.xlu2 %v2454_v8 }
  0x32   : > { %521 = vperm.xlu0 %2422, %v475_v4   ;;  %663 = vperm.xlu1 %2413, %v482_v9  }
  0x33   : > { %668 = vperm.xlu2 %2414, %v483_v10   ;;  %v1211_v10 = vld [vmem:[%s3288_s8 + $0x68] sm:$0xff] }
  0x3a   : > { %506 = vperm.xlu0 %2422, %v472_v6   ;;  %501 = vperm.xlu1 %2413, %v471_v1   ;;  %v962_v6 = vld [vmem:[%s3286_s6 + $0x68] sm:$0xff] }
  0x3b   : > { %2415 = vset.pattern.permute.xlu2 %v2453_v3 }
  0x3c   : > { %542 = vperm.xlu2 %2415, %v470_v11  }
  0x42   : > { %496 = vperm.xlu0 %2422, %v470_v11   ;;  %2416 = vset.pattern.permute.xlu1 %v2453_v3 }
  0x43   : > { %546 = vperm.xlu1 %2416, %v471_v1  }
  0x44   : > { %2417 = vset.pattern.permute.xlu2 %v2452_v2 }
  0x45   : > { %591 = vperm.xlu2 %2417, %v470_v11  }
  0x4a   : > { %648 = vperm.xlu0 %2422, %v479_v12  }
  0x4b   : > { %2420 = vset.pattern.permute.xlu1 %v2454_v8 }
  0x4c   : > { %653 = vperm.xlu1 %2420, %v480_v13  }
  0x4d   : > { %2421 = vset.pattern.permute.xlu2 %v2454_v8 }
  0x4e   : > { %658 = vperm.xlu2 %2421, %v481_v14  }
  0x52   : > { %785 = vperm.xlu0 %2422, %v715_v15  }
  0x54   : > { %486 = vperm.xlu1 %2420, %v468_v7  }
  0x56   : > { %491 = vperm.xlu2 %2421, %v469_v16  }
  0x5a   : > { %780 = vperm.xlu0 %2422, %v714_v17   ;;  %v960_v17 = vld [vmem:[%s3286_s6 + $0x58] sm:$0xff] }
  0x5c   : > { %2423 = vset.pattern.permute.xlu1 %v2453_v3 }
  0x5d   : > { %538 = vperm.xlu1 %2423, %v469_v16  }
  0x5e   : > { %2424 = vset.pattern.permute.xlu2 %v2452_v2 }
  0x5f   : > { %583 = vperm.xlu2 %2424, %v468_v7  }
  0x62   : > { %755 = vperm.xlu0 %2422, %v709_v18  }
  0x65   : > { %2425 = vset.pattern.permute.xlu1 %v2452_v2  ;;  %v961_v2 = vld [vmem:[%s3286_s6 + $0x60] sm:$0xff] }
  0x66   : > { %587 = vperm.xlu1 %2425, %v469_v16  }
  0x67   : > { %2426 = vset.pattern.permute.xlu2 %v2454_v8 }
  0x68   : > { %643 = vperm.xlu2 %2426, %v478_v19   ;;  %v2597_v21 = vpop.permute.xlu2 %607  ;;  %v957_v19 = vld [vmem:[%s3286_s6 + $0x40] sm:$0xff] }
  0x69   : > { %v621_v3 = vmul.f32 %v2693_v61, %v2597_v21 }
  0x6a   : > { %750 = vperm.xlu0 %2422, %v708_v20  }
  0x6e   : > { %2427 = vset.pattern.permute.xlu1 %v2454_v8 }
  0x6f   : > { %633 = vperm.xlu1 %2427, %v476_v22   ;;  %v1228_v22 = vld [vmem:[%s3288_s8 + $0xf0] sm:$0xff] }
  0x70   : > { %638 = vperm.xlu2 %2426, %v477_v23   ;;  %v2608_v25 = vpop.permute.xlu2 %611 }
  0x71   : > { %v622_v7 = vmul.f32 %v2693_v61, %v2608_v25 }
  0x72   : > { %725 = vperm.xlu0 %2422, %v703_v24  }
  0x77   : > { %795 = vperm.xlu1 %2427, %v717_v26  }
  0x78   : > { %800 = vperm.xlu2 %2426, %v718_v27   ;;  %v955_v27 = vld [vmem:[%s3286_s6 + $0x30] sm:$0xff] }
  0x79   : > { %v2619_v29 = vpop.permute.xlu2 %550 }
  0x7a   : > { %1050 = vperm.xlu0 %2422, %v964_v28  }
  0x7f   : > { %790 = vperm.xlu1 %2427, %v716_v30  }
  0x80   : > { %775 = vperm.xlu2 %2426, %v713_v31   ;;  %v956_v31 = vld [vmem:[%s3286_s6 + $0x38] sm:$0xff] }
  0x81   : > { %v559_v33 = vpop.permute.xlu1 %558  ;;  %v2630_v34 = vpop.permute.xlu0 %595 }
  0x82   : > { %1025 = vperm.xlu0 %2422, %v959_v32   ;;  %v572_v62 = vmul.f32 %v2680_v55, %v559_v33  ;;  %v570_v33 = vmul.f32 %v2680_v55, %v2619_v29  ;;  %v618_v29 = vmul.f32 %v2693_v61, %v2630_v34  ;;  %v951_v34 = vld [vmem:[%s3286_s6 + $0x10] sm:$0xff] }
  0x83   : > { %v2632_v35 = vpop.permute.xlu2 %603 }
  0x87   : > { %765 = vperm.xlu1 %2427, %v711_v36   ;;  %v620_v36 = vmul.f32 %v2693_v61, %v2632_v35 }
  0x88   : > { %770 = vperm.xlu2 %2426, %v712_v37  }
  0x89   : > { %v563_v39 = vpop.permute.xlu1 %562 }
  0x8a   : > { %1020 = vperm.xlu0 %2422, %v958_v38   ;;  %v2643_v40 = vpop.permute.xlu0 %554  ;;  %v573_v4 = vmul.f32 %v2680_v55, %v563_v39  ;;  %v1207_v39 = vld [vmem:[%s3288_s8 + $0x48] sm:$0xff] }
  0x8b   : > { %v571_v24 = vmul.f32 %v2680_v55, %v2643_v40 }
  0x8d   : > { %v669_v42 = vpop.permute.xlu2 %668 }
  0x8f   : > { %760 = vperm.xlu1 %2427, %v710_v41  }
  0x90   : > { %745 = vperm.xlu2 %2426, %v707_v43  }
  0x92   : > { %995 = vperm.xlu0 %2422, %v953_v44   ;;  %v512_v45 = vpop.permute.xlu1 %511  ;;  %v2658_v46 = vpop.permute.xlu0 %534 }
  0x93   : > { %v530_v25 = vmul.f32 %v2682_v56, %v512_v45 }
  0x95   : > { %v579_v37 = vadd.f32 %v571_v24, %v530_v25 }
  0x96   : > { %v2667_v49 = vpop.permute.xlu2 %542 }
  0x97   : > { %735 = vperm.xlu1 %2427, %v705_v47   ;;  %v568_v35 = vmul.f32 %v2680_v55, %v2667_v49  ;;  %v628_v45 = vadd.f32 %v620_v36, %v579_v37  ;;  %v1227_v37 = vld [vmem:[%s3288_s8 + $0xe8] sm:$0xff] }
  0x98   : > { %740 = vperm.xlu2 %2426, %v706_v48   ;;  %v954_v48 = vld [vmem:[%s3286_s6 + $0x28] sm:$0xff] }
  0x9a   : > { %990 = vperm.xlu0 %2422, %v952_v50  }
  0x9b   : > { %v2675_v52 = vpop.permute.xlu1 %599 }
  0x9c   : > { %v517_v53 = vpop.permute.xlu0 %516  ;;  %v619_v44 = vmul.f32 %v2693_v61, %v2675_v52  ;;  %v1204_v52 = vld [vmem:[%s3288_s8 + $0x30] sm:$0xff] }
  0x9d   : > { %v531_v58 = vmul.f32 %v2682_v56, %v517_v53 }
  0x9f   : > { %v2688_v59 = vpop.permute.xlu2 %591  ;;  %730 = vperm.xlu1 %2427, %v704_v54   ;;  %v580_v63 = vadd.f32 %v572_v62, %v531_v58 }
  0xa0   : > { %1045 = vperm.xlu2 %2426, %v963_v57   ;;  %v617_v47 = vmul.f32 %v2693_v61, %v2688_v59 }
  0xa1   : > { %v629_v9 = vadd.f32 %v621_v3, %v580_v63  ;;  %v949_v3 = vld [vmem:[%s3286_s6] sm:$0xff] }
  0xa2   : > { %1310 = vperm.xlu0 %2422, %v1212_v60  }
  0xa4   : > { %v522_v0 = vpop.permute.xlu0 %521  ;;  %v664_v1 = vpop.permute.xlu1 %663 }
  0xa5   : > { %v532_v5 = vmul.f32 %v2682_v56, %v522_v0  ;;  %v677_v13 = vadd.f32 %v664_v1, %v629_v9 }
  0xa7   : > { %v581_v8 = vadd.f32 %v573_v4, %v532_v5  ;;  %1035 = vperm.xlu1 %2427, %v961_v2   ;;  %v685_v18 = vmax.f32 %v677_v13, 0.0  ;;  %v1222_v13 = vld [vmem:[%s3288_s8 + $0xc0] sm:$0xff] }
  0xa8   : > { %v659_v11 = vpop.permute.xlu2 %658  ;;  %1040 = vperm.xlu2 %2426, %v962_v6   ;;  %v950_v6 = vld [vmem:[%s3286_s6 + $0x8] sm:$0xff] }
  0xa9   : > { %v630_v12 = vadd.f32 %v622_v7, %v581_v8  ;;  %v676_v50 = vadd.f32 %v659_v11, %v628_v45  ;;  %v1225_v8 = vld [vmem:[%s3288_s8 + $0xd8] sm:$0xff]  ;;  %v1210_v11 = vld [vmem:[%s3288_s8 + $0x60] sm:$0xff]  ;;  %v1632_v45 = vld [vmem:[%s3290_s10 + $0x8] sm:$0xff] }
  0xaa   : > { %1305 = vperm.xlu0 %2422, %v1211_v10   ;;  %v1213_v10 = vld [vmem:[%s3288_s8 + $0x78] sm:$0xff] }
  0xab   : > { %v678_v14 = vadd.f32 %v669_v42, %v630_v12  ;;  %v684_v59 = vmax.f32 %v676_v50, 0.0  ;;  %v1223_v50 = vld [vmem:[%s3288_s8 + $0xc8] sm:$0xff] }
  0xac   : > { %v507_v15 = vpop.permute.xlu0 %506  ;;  %v502_v16 = vpop.permute.xlu1 %501 }
  0xad   : > { %v686_v20 = vmax.f32 %v678_v14, 0.0  ;;  %v529_v28 = vmul.f32 %v2682_v56, %v507_v15  ;;  %v528_v38 = vmul.f32 %v2682_v56, %v502_v16  ;;  %v1208_v14 = vld [vmem:[%s3288_s8 + $0x50] sm:$0xff]  ;;  %v1209_v15 = vld [vmem:[%s3288_s8 + $0x58] sm:$0xff] }
  0xaf   : > { %1030 = vperm.xlu1 %2427, %v960_v17   ;;  %v722_v21 = vpack.c.bf16 %v686_v20, %v685_v18  ;;  %v578_v40 = vadd.f32 %v570_v33, %v529_v28  ;;  %v1201_v17 = vld [vmem:[%s3288_s8 + $0x18] sm:$0xff]  ;;  %v1226_v33 = vld [vmem:[%s3288_s8 + $0xe0] sm:$0xff] }
  0xb0   : > { %1015 = vperm.xlu2 %2426, %v957_v19   ;;  %v2720_v23 = vpop.permute.xlu2 %491  ;;  %v1229_v28 = vld [vmem:[%s3288_s8 + $0xf8] sm:$0xff] }
  0xb1   : > { %872 = vmatpush.bf16.msra.mxu0 %v722_v21  ;;  %2367 = vmatpush.bf16.msra.mxu3 %v722_v21  ;;  %v627_v54 = vadd.f32 %v619_v44, %v578_v40  ;;  %v526_v18 = vmul.f32 %v2682_v56, %v2720_v23  ;;  %v2319_v40 = vld [vmem:[%s3283_s3] sm:$0xff]  ;;  %v1203_v44 = vld [vmem:[%s3288_s8 + $0x28] sm:$0xff] }
  0xb2   : > { %1390 = vperm.xlu0 %2422, %v1228_v22   ;;  %v566_v22 = vmul.f32 %v2680_v55, %v2658_v46  ;;  %v1198_v46 = vld [vmem:[%s3288_s8] sm:$0xff] }
  0xb4   : > { %v497_v26 = vpop.permute.xlu0 %496 }
  0xb5   : > { %v547_v30 = vpop.permute.xlu1 %546  ;;  %v527_v41 = vmul.f32 %v2682_v56, %v497_v26 }
  0xb6   : > { %v569_v32 = vmul.f32 %v2680_v55, %v547_v30 }
  0xb7   : > { %1005 = vperm.xlu1 %2427, %v955_v27   ;;  %v576_v51 = vadd.f32 %v568_v35, %v527_v41  ;;  %v2324_v41 = vld [vmem:[%s3283_s3 + $0x28] sm:$0xff]  ;;  %v1202_v35 = vld [vmem:[%s3288_s8 + $0x20] sm:$0xff] }
  0xb8   : > { %1010 = vperm.xlu2 %2426, %v956_v31   ;;  %v577_v42 = vadd.f32 %v569_v32, %v528_v38 }
  0xb9   : > { %v584_v43 = vpop.permute.xlu2 %583  ;;  %v625_v63 = vadd.f32 %v617_v47, %v576_v51  ;;  %v2320_v47 = vld [vmem:[%s3283_s3 + $0x8] sm:$0xff]  ;;  %v1200_v51 = vld [vmem:[%s3288_s8 + $0x10] sm:$0xff] }
  0xba   : > { %1285 = vperm.xlu0 %2422, %v1207_v39   ;;  %v626_v53 = vadd.f32 %v618_v29, %v577_v42  ;;  %v615_v25 = vmul.f32 %v2693_v61, %v584_v43  ;;  %v1219_v39 = vld [vmem:[%s3288_s8 + $0xa8] sm:$0xff]  ;;  %v1205_v42 = vld [vmem:[%s3288_s8 + $0x38] sm:$0xff]  ;;  %v1224_v43 = vld [vmem:[%s3288_s8 + $0xd0] sm:$0xff] }
  0xbb   : > { %v1214_v29 = vld [vmem:[%s3288_s8 + $0x80] sm:$0xff] }
  0xbc   : > { %v649_v49 = vpop.permute.xlu0 %648 }
  0xbd   : > { %v674_v60 = vadd.f32 %v649_v49, %v626_v53  ;;  %v1635_v53 = vld [vmem:[%s3290_s10 + $0x20] sm:$0xff]  ;;  %v1638_v49 = vld [vmem:[%s3290_s10 + $0x38] sm:$0xff] }
  0xbe   : > { %v654_v57 = vpop.permute.xlu1 %653 }
  0xbf   : > { %v675_v58 = vadd.f32 %v654_v57, %v627_v54  ;;  %1000 = vperm.xlu1 %2427, %v954_v48   ;;  %v682_v4 = vmax.f32 %v674_v60, 0.0  ;;  %v2325_v48 = vld [vmem:[%s3283_s3 + $0x30] sm:$0xff] }
  0xc0   : > { %985 = vperm.xlu2 %2426, %v951_v34   ;;  %v1220_v54 = vld [vmem:[%s3288_s8 + $0xb0] sm:$0xff]  ;;  %v1221_v34 = vld [vmem:[%s3288_s8 + $0xb8] sm:$0xff] }
  0xc1   : > { %v683_v62 = vmax.f32 %v675_v58, 0.0  ;;  %v2321_v57 = vld [vmem:[%s3283_s3 + $0x10] sm:$0xff]  ;;  %v2326_v58 = vld [vmem:[%s3283_s3 + $0x38] sm:$0xff] }
  0xc2   : > { %v644_v0 = vpop.permute.xlu2 %643  ;;  %1270 = vperm.xlu0 %2422, %v1204_v52   ;;  %v1199_v52 = vld [vmem:[%s3288_s8 + $0x8] sm:$0xff]  ;;  %v1641_v60 = vld [vmem:[%s3290_s10 + $0x50] sm:$0xff] }
  0xc3   : > { %v673_v1 = vadd.f32 %v644_v0, %v625_v63  ;;  %v721_v2 = vpack.c.bf16 %v684_v59, %v683_v62  ;;  %v1218_v59 = vld [vmem:[%s3288_s8 + $0xa0] sm:$0xff]  ;;  %v1216_v62 = vld [vmem:[%s3288_s8 + $0x90] sm:$0xff]  ;;  %v1217_v63 = vld [vmem:[%s3288_s8 + $0x98] sm:$0xff] }
  0xc4   : > { %v1644_v0 = vld [vmem:[%s3290_s10 + $0x68] sm:$0xff] }
  0xc5   : > { %v681_v5 = vmax.f32 %v673_v1, 0.0  ;;  %873 = vmatpush.bf16.msra.mxu0 %v721_v2  ;;  %2368 = vmatpush.bf16.msra.mxu3 %v721_v2  ;;  %v2322_v1 = vld [vmem:[%s3283_s3 + $0x18] sm:$0xff]  ;;  %v1215_v2 = vld [vmem:[%s3288_s8 + $0x88] sm:$0xff] }
  0xc6   : > { %v487_v7 = vpop.permute.xlu1 %486 }
  0xc7   : > { %975 = vperm.xlu1 %2427, %v949_v3   ;;  %v720_v9 = vpack.c.bf16 %v682_v4, %v681_v5  ;;  %v525_v19 = vmul.f32 %v2682_v56, %v487_v7  ;;  %v1206_v56 = vld [vmem:[%s3288_s8 + $0x40] sm:$0xff]  ;;  %v1633_v4 = vld [vmem:[%s3290_s10 + $0x10] sm:$0xff]  ;;  %v1634_v5 = vld [vmem:[%s3290_s10 + $0x18] sm:$0xff] }
  0xc8   : > { %980 = vperm.xlu2 %2426, %v950_v6   ;;  %v1631_v3 = vld [vmem:[%s3290_s10] sm:$0xff]  ;;  %v1636_v7 = vld [vmem:[%s3290_s10 + $0x28] sm:$0xff] }
  0xc9   : > { %874 = vmatpush.bf16.msra.mxu0 %v720_v9  ;;  %2369 = vmatpush.bf16.msra.mxu3 %v720_v9  ;;  %v574_v26 = vadd.f32 %v566_v22, %v525_v19  ;;  %v2323_v6 = vld [vmem:[%s3283_s3 + $0x20] sm:$0xff] }
  0xca   : > { %1375 = vperm.xlu0 %2422, %v1225_v8   ;;  %v639_v23 = vpop.permute.xlu2 %638  ;;  %v1637_v8 = vld [vmem:[%s3290_s10 + $0x30] sm:$0xff]  ;;  %v1639_v9 = vld [vmem:[%s3290_s10 + $0x40] sm:$0xff] }
  0xcf   : > { %1315 = vperm.xlu1 %2427, %v1213_v10   ;;  %v539_v12 = vpop.permute.xlu1 %538  ;;  %v1640_v10 = vld [vmem:[%s3290_s10 + $0x48] sm:$0xff] }
  0xd0   : > { %1300 = vperm.xlu2 %2426, %v1210_v11   ;;  %v567_v16 = vmul.f32 %v2680_v55, %v539_v12  ;;  %v623_v55 = vadd.f32 %v615_v25, %v574_v26  ;;  %v1642_v11 = vld [vmem:[%s3290_s10 + $0x58] sm:$0xff]  ;;  %v1643_v12 = vld [vmem:[%s3290_s10 + $0x60] sm:$0xff] }
  0xd2   : > { %1360 = vperm.xlu0 %2422, %v1222_v13   ;;  %v575_v24 = vadd.f32 %v567_v16, %v526_v18  ;;  %v1645_v13 = vld [vmem:[%s3290_s10 + $0x70] sm:$0xff] }
  0xd7   : > { %1290 = vperm.xlu1 %2427, %v1208_v14   ;;  %v1646_v14 = vld [vmem:[%s3290_s10 + $0x78] sm:$0xff] }
  0xd8   : > { %1295 = vperm.xlu2 %2426, %v1209_v15   ;;  %v588_v20 = vpop.permute.xlu1 %587 }
  0xd9   : > { %v616_v21 = vmul.f32 %v2693_v61, %v588_v20 }
  0xda   : > { %1255 = vperm.xlu0 %2422, %v1201_v17  }
  0xdb   : > { %v624_v27 = vadd.f32 %v616_v21, %v575_v24 }
  0xdd   : > { %v672_v30 = vadd.f32 %v639_v23, %v624_v27  ;;  %v801_v27 = vpop.permute.xlu2 %800 }
  0xdf   : > { %1395 = vperm.xlu1 %2427, %v1229_v28   ;;  %v680_v36 = vmax.f32 %v672_v30, 0.0 }
  0xe0   : > { %1280 = vperm.xlu2 %2426, %v1206_v56   ;;  %v786_v56 = vpop.permute.xlu0 %785 }
  0xe1   : > { %v634_v61 = vpop.permute.xlu1 %633 }
  0xe2   : > { %1240 = vperm.xlu0 %2422, %v1198_v46   ;;  %v671_v31 = vadd.f32 %v634_v61, %v623_v55 }
  0xe4   : > { %v679_v32 = vmax.f32 %v671_v31, 0.0 }
  0xe6   : > { %v719_v38 = vpack.c.bf16 %v680_v36, %v679_v32  ;;  %v776_v32 = vpop.permute.xlu2 %775 }
  0xe7   : > { %1380 = vperm.xlu1 %2427, %v1226_v33  }
  0xe8   : > { %1385 = vperm.xlu2 %2426, %v1227_v37   ;;  %875 = vmatpush.bf16.msra.mxu0 %v719_v38 }
  0xe9   : > { %2370 = vmatpush.bf16.msra.mxu3 %v719_v38  ;;  %v796_v25 = vpop.permute.xlu1 %795  ;;  %v781_v38 = vpop.permute.xlu0 %780 }
  0xea   : > { %1345 = vperm.xlu0 %2422, %v1219_v39  }
  0xeb   : > { %2148 = vmatmul.msk.bf16.vlgmr.msra.gmra.mxu0 %vm843_vm0, %v2319_v40 }
  0xec   : > { %2153 = vmatmul.msk.bf16.vlgmr.msra.gmra.mxu3 %vm843_vm0, %v2324_v41 }
  0xef   : > { %1275 = vperm.xlu1 %2427, %v1205_v42  }
  0xf0   : > { %1370 = vperm.xlu2 %2426, %v1224_v43  }
  0xf1   : > { %v791_v23 = vpop.permute.xlu1 %790 }
  0xf2   : > { %1320 = vperm.xlu0 %2422, %v1214_v29  }
  0xf7   : > { %1260 = vperm.xlu1 %2427, %v1202_v35  }
  0xf8   : > { %1265 = vperm.xlu2 %2426, %v1203_v44  }
  0xf9   : > { %v766_v42 = vpop.permute.xlu1 %765 }
  0xfa   : > { %1670 = vperm.xlu0 %2422, %v1632_v45  }
  0xfb   : > { %2149 = vmatmul.msk.bf16.gmra.mxu0 %vm843_vm0, %v2320_v47 }
  0xfc   : > { %2154 = vmatmul.msk.bf16.gmra.mxu3 %vm843_vm0, %v2325_v48  ;;  %v771_v48 = vpop.permute.xlu2 %770 }
  0xff   : > { %1365 = vperm.xlu1 %2427, %v1223_v50  }
 0x100   : > { %1250 = vperm.xlu2 %2426, %v1200_v51  }
 0x101   : > { %v761_v51 = vpop.permute.xlu1 %760 }
 0x102   : > { %1685 = vperm.xlu0 %2422, %v1635_v53  }
 0x107   : > { %1350 = vperm.xlu1 %2427, %v1220_v54   ;;  %v756_v54 = vpop.permute.xlu0 %755 }
 0x108   : > { %1355 = vperm.xlu2 %2426, %v1221_v34   ;;  %v746_v34 = vpop.permute.xlu2 %745 }
 0x10a   : > { %1700 = vperm.xlu0 %2422, %v1638_v49  }
 0x10b   : > { %2150 = vmatmul.msk.bf16.gmra.mxu0 %vm843_vm0, %v2321_v57 }
 0x10c   : > { %2155 = vmatmul.msk.bf16.gmra.mxu3 %vm843_vm0, %v2326_v58 }
 0x10f   : > { %1245 = vperm.xlu1 %2427, %v1199_v52  }
 0x110   : > { %1340 = vperm.xlu2 %2426, %v1218_v59   ;;  %v736_v59 = vpop.permute.xlu1 %735 }
 0x112   : > { %1715 = vperm.xlu0 %2422, %v1641_v60  }
 0x117   : > { %1330 = vperm.xlu1 %2427, %v1216_v62  }
 0x118   : > { %1335 = vperm.xlu2 %2426, %v1217_v63  }
 0x11a   : > { %1730 = vperm.xlu0 %2422, %v1644_v0   ;;  %v751_v0 = vpop.permute.xlu0 %750 }
 0x11b   : > { %2151 = vmatmul.msk.bf16.gmra.mxu0 %vm843_vm0, %v2322_v1 }
 0x11f   : > { %1325 = vperm.xlu1 %2427, %v1215_v2  }
 0x120   : > { %1665 = vperm.xlu2 %2426, %v1631_v3  }
 0x127   : > { %1675 = vperm.xlu1 %2427, %v1633_v4  }
 0x128   : > { %1680 = vperm.xlu2 %2426, %v1634_v5  }
 0x12b   : > { %2152 = vmatmul.msk.bf16.gmra.mxu0 %vm843_vm0, %v2323_v6  ;;  %v741_v6 = vpop.permute.xlu2 %740 }
 0x12f   : > { %1690 = vperm.xlu1 %2427, %v1636_v7  }
 0x130   : > { %1695 = vperm.xlu2 %2426, %v1637_v8  }
 0x137   : > { %1705 = vperm.xlu1 %2427, %v1639_v9  }
 0x138   : > { %1710 = vperm.xlu2 %2426, %v1640_v10  }
 0x13f   : > { %1720 = vperm.xlu1 %2427, %v1642_v11  }
 0x140   : > { %1725 = vperm.xlu2 %2426, %v1643_v12   ;;  %v731_v12 = vpop.permute.xlu1 %730 }
 0x147   : > { %1735 = vperm.xlu1 %2427, %v1645_v13  }
 0x148   : > { %1740 = vperm.xlu2 %2426, %v1646_v14  }
 0x168   : > { %v2934_v15 = vpop.f32.mrf.mxu0 }
 0x16f   : > { %v902_v16 = vpop.f32.mrf.mxu3 }
 0x170   : > { %v2936_v17 = vpop.f32.mrf.mxu0  ;;  %v903_v43 = vadd.f32 %v902_v16, %v776_v32  ;;  %v2334_v32 = vld [vmem:[%s3285_s5 + $0x38] sm:$0xff] }
 0x171   : > { %v880_v13 = vadd.f32 %v2936_v17, %v731_v12  ;;  %v2328_v17 = vld [vmem:[%s3285_s5 + $0x8] sm:$0xff] }
 0x172   : > { %v927_v47 = vmax.f32 %v903_v43, 0.0 }
 0x177   : > { %v904_v18 = vpop.f32.mrf.mxu3 }
 0x178   : > { %v882_v19 = vpop.f32.mrf.mxu0  ;;  %v905_v39 = vadd.f32 %v904_v18, %v781_v38  ;;  %v726_v18 = vpop.permute.xlu0 %725 }
 0x179   : > { %v883_v10 = vadd.f32 %v882_v19, %v736_v59  ;;  %v2327_v19 = vld [vmem:[%s3285_s5] sm:$0xff] }
 0x17a   : > { %v928_v35 = vmax.f32 %v905_v39, 0.0 }
 0x17c   : > { %v970_v50 = vpack.c.bf16 %v928_v35, %v927_v47 }
 0x17f   : > { %v907_v20 = vpop.f32.mrf.mxu3 }
 0x180   : > { %v884_v21 = vpop.f32.mrf.mxu0  ;;  %v908_v33 = vadd.f32 %v907_v20, %v786_v56  ;;  %v878_v20 = vadd.f32 %v2934_v15, %v726_v18  ;;  %v2329_v15 = vld [vmem:[%s3285_s5 + $0x10] sm:$0xff]  ;;  %v2332_v56 = vld [vmem:[%s3285_s5 + $0x28] sm:$0xff] }
 0x181   : > { %v885_v7 = vadd.f32 %v884_v21, %v741_v6 }
 0x182   : > { %v929_v29 = vmax.f32 %v908_v33, 0.0  ;;  %v1051_v33 = vpop.permute.xlu0 %1050 }
 0x183   : > { %v920_v14 = vmax.f32 %v885_v7, 0.0 }
 0x187   : > { %v909_v22 = vpop.f32.mrf.mxu3 }
 0x188   : > { %v887_v24 = vpop.f32.mrf.mxu0  ;;  %v910_v30 = vadd.f32 %v909_v22, %v791_v23  ;;  %v919_v22 = vmax.f32 %v883_v10, 0.0  ;;  %v1046_v23 = vpop.permute.xlu2 %1045 }
 0x189   : > { %v888_v4 = vadd.f32 %v887_v24, %v746_v34  ;;  %v918_v24 = vmax.f32 %v880_v13, 0.0 }
 0x18a   : > { %v930_v40 = vmax.f32 %v910_v30, 0.0  ;;  %v1026_v38 = vpop.permute.xlu0 %1025 }
 0x18b   : > { %v921_v11 = vmax.f32 %v888_v4, 0.0 }
 0x18c   : > { %v971_v45 = vpack.c.bf16 %v930_v40, %v929_v29 }
 0x18f   : > { %v912_v26 = vpop.f32.mrf.mxu3 }
 0x190   : > { %v889_v28 = vpop.f32.mrf.mxu0  ;;  %v913_v46 = vadd.f32 %v912_v26, %v796_v25  ;;  %v966_v25 = vpack.c.bf16 %v920_v14, %v919_v22  ;;  %v917_v26 = vmax.f32 %v878_v20, 0.0  ;;  %v1041_v30 = vpop.permute.xlu2 %1040 }
 0x191   : > { %v890_v1 = vadd.f32 %v889_v28, %v751_v0  ;;  %v2331_v28 = vld [vmem:[%s3285_s5 + $0x20] sm:$0xff] }
 0x192   : > { %v931_v36 = vmax.f32 %v913_v46, 0.0  ;;  %v965_v21 = vpack.c.bf16 %v918_v24, %v917_v26  ;;  %v1036_v46 = vpop.permute.xlu1 %1035 }
 0x193   : > { %v922_v8 = vmax.f32 %v890_v1, 0.0 }
 0x195   : > { %v967_v16 = vpack.c.bf16 %v922_v8, %v921_v11 }
 0x197   : > { %v914_v55 = vpop.f32.mrf.mxu3 }
 0x198   : > { %v915_v61 = vadd.f32 %v914_v55, %v801_v27  ;;  %v892_v31 = vpop.f32.mrf.mxu0  ;;  %v2330_v27 = vld [vmem:[%s3285_s5 + $0x18] sm:$0xff]  ;;  %v2333_v55 = vld [vmem:[%s3285_s5 + $0x30] sm:$0xff] }
 0x199   : > { %v893_v60 = vadd.f32 %v892_v31, %v756_v54  ;;  %v2961_v31 = vpop.permute.xlu2 %1015 }
 0x19a   : > { %v932_v37 = vmax.f32 %v915_v61, 0.0  ;;  %v1031_v61 = vpop.permute.xlu1 %1030 }
 0x19b   : > { %v923_v5 = vmax.f32 %v893_v60, 0.0 }
 0x19c   : > { %v972_v41 = vpack.c.bf16 %v932_v37, %v931_v36 }
 0x19e   : > { %1101 = vmatpush.bf16.msra.mxu1 %v972_v41 }
 0x1a0   : > { %v894_v44 = vpop.f32.mrf.mxu0 }
 0x1a1   : > { %v895_v58 = vadd.f32 %v894_v44, %v761_v51  ;;  %v1011_v37 = vpop.permute.xlu2 %1010 }
 0x1a2   : > { %1102 = vmatpush.bf16.msra.mxu1 %v971_v45  ;;  %v1006_v36 = vpop.permute.xlu1 %1005 }
 0x1a3   : > { %v924_v2 = vmax.f32 %v895_v58, 0.0 }
 0x1a5   : > { %v968_v9 = vpack.c.bf16 %v924_v2, %v923_v5 }
 0x1a6   : > { %1103 = vmatpush.bf16.msra.mxu1 %v970_v50 }
 0x1a8   : > { %v897_v53 = vpop.f32.mrf.mxu0 }
 0x1a9   : > { %v898_v49 = vadd.f32 %v897_v53, %v766_v42  ;;  %v986_v40 = vpop.permute.xlu2 %985  ;;  %v1021_v42 = vpop.permute.xlu0 %1020 }
 0x1aa   : > { %v1001_v39 = vpop.permute.xlu1 %1000 }
 0x1ab   : > { %v925_v62 = vmax.f32 %v898_v49, 0.0 }
 0x1b0   : > { %v899_v57 = vpop.f32.mrf.mxu0 }
 0x1b1   : > { %v900_v52 = vadd.f32 %v899_v57, %v771_v48  ;;  %v981_v35 = vpop.permute.xlu2 %980  ;;  %v996_v51 = vpop.permute.xlu0 %995 }
 0x1b2   : > { %v976_v43 = vpop.permute.xlu1 %975 }
 0x1b3   : > { %v926_v63 = vmax.f32 %v900_v52, 0.0 }
 0x1b5   : > { %v969_v3 = vpack.c.bf16 %v926_v63, %v925_v62 }
 0x1b7   : > { %1104 = vmatpush.bf16.msra.mxu1 %v969_v3 }
 0x1b9   : > { %v991_v34 = vpop.permute.xlu0 %990 }
 0x1bb   : > { %1105 = vmatpush.bf16.msra.mxu1 %v968_v9 }
 0x1bf   : > { %1106 = vmatpush.bf16.msra.mxu1 %v967_v16 }
 0x1c3   : > { %1107 = vmatpush.bf16.msra.mxu1 %v966_v25 }
 0x1c7   : > { %1108 = vmatpush.bf16.msra.mxu1 %v965_v21 }
 0x1ca   : > { %1109 = vmatmul.bf16.vlgmr.msra.gmra.mxu1 %v2327_v19 }
 0x1da   : > { %1114 = vmatmul.bf16.gmra.mxu1 %v2328_v17 }
 0x1ea   : > { %1119 = vmatmul.bf16.gmra.mxu1 %v2329_v15 }
 0x1fa   : > { %1124 = vmatmul.bf16.gmra.mxu1 %v2330_v27 }
 0x20a   : > { %1129 = vmatmul.bf16.gmra.mxu1 %v2331_v28 }
 0x21a   : > { %1134 = vmatmul.bf16.gmra.mxu1 %v2332_v56 }
 0x22a   : > { %1139 = vmatmul.bf16.gmra.mxu1 %v2333_v55 }
 0x23a   : > { %1144 = vmatmul.bf16.gmra.mxu1 %v2334_v32 }
 0x247   : > { %v1110_v41 = vpop.f32.mrf.mxu1 }
 0x248   : > { %v1111_v29 = vadd.f32 %v1110_v41, %v976_v43  ;;  %v2340_v41 = vld [vmem:[%s3287_s7 + $0x28] sm:$0xff]  ;;  %v2341_v43 = vld [vmem:[%s3287_s7 + $0x30] sm:$0xff] }
 0x24a   : > { %v1150_v47 = vmax.f32 %v1111_v29, 0.0  ;;  %v2338_v29 = vld [vmem:[%s3287_s7 + $0x18] sm:$0xff] }
 0x24f   : > { %v1112_v44 = vpop.f32.mrf.mxu1 }
 0x250   : > { %v1113_v45 = vadd.f32 %v1112_v44, %v981_v35  ;;  %v2342_v35 = vld [vmem:[%s3287_s7 + $0x38] sm:$0xff]  ;;  %v2343_v44 = vld [vmem:[%s3287_s7 + $0x40] sm:$0xff] }
 0x252   : > { %v1151_v48 = vmax.f32 %v1113_v45, 0.0  ;;  %v2344_v45 = vld [vmem:[%s3287_s7 + $0x48] sm:$0xff] }
 0x254   : > { %v2966_v50 = vpack.c.bf16 %v1151_v48, %v1150_v47  ;;  %v2345_v47 = vld [vmem:[%s3287_s7 + $0x50] sm:$0xff]  ;;  %v1311_v48 = vpop.permute.xlu0 %1310 }
 0x257   : > { %v1115_v53 = vpop.f32.mrf.mxu1 }
 0x258   : > { %v1116_v54 = vadd.f32 %v1115_v53, %v986_v40 }
 0x25a   : > { %v1152_v58 = vmax.f32 %v1116_v54, 0.0 }
 0x25c   : > { %v1306_v53 = vpop.permute.xlu0 %1305 }
 0x25f   : > { %v1117_v49 = vpop.f32.mrf.mxu1 }
 0x260   : > { %v1118_v57 = vadd.f32 %v1117_v49, %v991_v34 }
 0x262   : > { %v1153_v52 = vmax.f32 %v1118_v57, 0.0  ;;  %v2347_v57 = vld [vmem:[%s3287_s7 + $0x60] sm:$0xff] }
 0x264   : > { %v1231_v59 = vpack.c.bf16 %v1153_v52, %v1152_v58  ;;  %v3007_v34 = vpop.permute.xlu0 %1390  ;;  %v1301_v52 = vpop.permute.xlu2 %1300 }
 0x267   : > { %v1120_v60 = vpop.f32.mrf.mxu1 }
 0x268   : > { %v1121_v62 = vadd.f32 %v1120_v60, %v996_v51  ;;  %v2346_v51 = vld [vmem:[%s3287_s7 + $0x58] sm:$0xff] }
 0x26a   : > { %v1154_v1 = vmax.f32 %v1121_v62, 0.0 }
 0x26f   : > { %v1122_v63 = vpop.f32.mrf.mxu1 }
 0x270   : > { %v1123_v0 = vadd.f32 %v1122_v63, %v1001_v39 }
 0x272   : > { %v1155_v2 = vmax.f32 %v1123_v0, 0.0  ;;  %v1296_v0 = vpop.permute.xlu2 %1295 }
 0x274   : > { %v1232_v3 = vpack.c.bf16 %v1155_v2, %v1154_v1  ;;  %v2348_v2 = vld [vmem:[%s3287_s7 + $0x68] sm:$0xff] }
 0x277   : > { %v1125_v4 = vpop.f32.mrf.mxu1 }
 0x278   : > { %v1126_v5 = vadd.f32 %v1125_v4, %v1006_v36 }
 0x27a   : > { %v1156_v8 = vmax.f32 %v1126_v5, 0.0 }
 0x27f   : > { %v1127_v6 = vpop.f32.mrf.mxu1 }
 0x280   : > { %v1128_v7 = vadd.f32 %v1127_v6, %v1011_v37 }
 0x282   : > { %v1157_v9 = vmax.f32 %v1128_v7, 0.0  ;;  %v1281_v7 = vpop.permute.xlu2 %1280 }
 0x284   : > { %v1233_v10 = vpack.c.bf16 %v1157_v9, %v1156_v8 }
 0x287   : > { %v1130_v11 = vpop.f32.mrf.mxu1 }
 0x288   : > { %v1131_v39 = vadd.f32 %v1130_v11, %v2961_v31  ;;  %v2335_v31 = vld [vmem:[%s3287_s7] sm:$0xff]  ;;  %v2349_v11 = vld [vmem:[%s3287_s7 + $0x70] sm:$0xff] }
 0x28f   : > { %v1132_v12 = vpop.f32.mrf.mxu1 }
 0x290   : > { %v1133_v32 = vadd.f32 %v1132_v12, %v1021_v42  ;;  %v2337_v42 = vld [vmem:[%s3287_s7 + $0x10] sm:$0xff] }
 0x297   : > { %v1135_v13 = vpop.f32.mrf.mxu1 }
 0x298   : > { %v1136_v56 = vadd.f32 %v1135_v13, %v1026_v38  ;;  %v2336_v38 = vld [vmem:[%s3287_s7 + $0x8] sm:$0xff]  ;;  %v3032_v13 = vpop.permute.xlu2 %1385 }
 0x29a   : > { %v1160_v40 = vmax.f32 %v1136_v56, 0.0 }
 0x29f   : > { %v1137_v14 = vpop.f32.mrf.mxu1 }
 0x2a0   : > { %v1138_v15 = vadd.f32 %v1137_v14, %v1031_v61 }
 0x2a2   : > { %v1161_v36 = vmax.f32 %v1138_v15, 0.0 }
 0x2a7   : > { %v1140_v16 = vpop.f32.mrf.mxu1 }
 0x2a8   : > { %v1141_v21 = vadd.f32 %v1140_v16, %v1036_v46  ;;  %v1158_v46 = vmax.f32 %v1131_v39, 0.0 }
 0x2aa   : > { %v1162_v55 = vmax.f32 %v1141_v21, 0.0 }
 0x2af   : > { %v1142_v18 = vpop.f32.mrf.mxu1 }
 0x2b0   : > { %v1143_v25 = vadd.f32 %v1142_v18, %v1041_v30  ;;  %v1235_v30 = vpack.c.bf16 %v1161_v36, %v1160_v40 }
 0x2b2   : > { %v1163_v27 = vmax.f32 %v1143_v25, 0.0 }
 0x2b4   : > { %v1236_v37 = vpack.c.bf16 %v1163_v27, %v1162_v55 }
 0x2b7   : > { %v1145_v20 = vpop.f32.mrf.mxu1 }
 0x2b8   : > { %v1146_v22 = vadd.f32 %v1145_v20, %v1046_v23  ;;  %v1159_v23 = vmax.f32 %v1133_v32, 0.0 }
 0x2ba   : > { %v1164_v19 = vmax.f32 %v1146_v22, 0.0  ;;  %v1234_v61 = vpack.c.bf16 %v1159_v23, %v1158_v46  ;;  %v3038_v22 = vpop.permute.xlu2 %1370 }
 0x2bf   : > { %v1147_v24 = vpop.f32.mrf.mxu1 }
 0x2c0   : > { %v1148_v26 = vadd.f32 %v1147_v24, %v1051_v33  ;;  %v2339_v33 = vld [vmem:[%s3287_s7 + $0x20] sm:$0xff] }
 0x2c2   : > { %v1165_v17 = vmax.f32 %v1148_v26, 0.0  ;;  %v2350_v26 = vld [vmem:[%s3287_s7 + $0x78] sm:$0xff] }
 0x2c4   : > { %v1237_v28 = vpack.c.bf16 %v1165_v17, %v1164_v19  ;;  %v1266_v17 = vpop.permute.xlu2 %1265 }
 0x2c6   : > { %1494 = vmatpush.bf16.msrb.mxu1 %v1237_v28  ;;  %2371 = vmatpush.bf16.msra.mxu2 %v1237_v28 }
 0x2ca   : > { %1495 = vmatpush.bf16.msrb.mxu1 %v1236_v37  ;;  %2372 = vmatpush.bf16.msra.mxu2 %v1236_v37 }
 0x2cc   : > { %v1251_v39 = vpop.permute.xlu2 %1250 }
 0x2ce   : > { %1496 = vmatpush.bf16.msrb.mxu1 %v1235_v30  ;;  %2373 = vmatpush.bf16.msra.mxu2 %v1235_v30 }
 0x2d2   : > { %1497 = vmatpush.bf16.msrb.mxu1 %v1234_v61  ;;  %2374 = vmatpush.bf16.msra.mxu2 %v1234_v61 }
 0x2d6   : > { %1498 = vmatpush.bf16.msrb.mxu1 %v1233_v10  ;;  %2375 = vmatpush.bf16.msra.mxu2 %v1233_v10 }
 0x2da   : > { %1499 = vmatpush.bf16.msrb.mxu1 %v1232_v3  ;;  %2376 = vmatpush.bf16.msra.mxu2 %v1232_v3 }
 0x2de   : > { %1500 = vmatpush.bf16.msrb.mxu1 %v1231_v59  ;;  %2377 = vmatpush.bf16.msra.mxu2 %v1231_v59  ;;  %v1286_v59 = vpop.permute.xlu0 %1285 }
 0x2e2   : > { %1501 = vmatpush.bf16.msrb.mxu1 %v2966_v50  ;;  %2378 = vmatpush.bf16.msra.mxu2 %v2966_v50  ;;  %v1316_v50 = vpop.permute.xlu1 %1315 }
 0x2e5   : > { %1502 = vmatmul.bf16.vlgmr.msrb.gmra.mxu1 %v2335_v31  ;;  %1522 = vmatmul.bf16.vlgmr.msra.gmra.mxu2 %v2339_v33 }
 0x2e6   : > { %v1271_v3 = vpop.permute.xlu0 %1270 }
 0x2ea   : > { %v1291_v54 = vpop.permute.xlu1 %1290 }
 0x2ee   : > { %v3025_v8 = vpop.permute.xlu0 %1375 }
 0x2f2   : > { %v3009_v49 = vpop.permute.xlu1 %1395 }
 0x2f5   : > { %1507 = vmatmul.bf16.gmra.mxu1 %v2336_v38  ;;  %1527 = vmatmul.bf16.gmra.mxu2 %v2340_v41 }
 0x2f6   : > { %v3034_v14 = vpop.permute.xlu0 %1360 }
 0x2fa   : > { %v3016_v62 = vpop.permute.xlu1 %1380 }
 0x2fe   : > { %v1256_v24 = vpop.permute.xlu0 %1255 }
 0x302   : > { %v1276_v4 = vpop.permute.xlu1 %1275 }
 0x305   : > { %1512 = vmatmul.bf16.gmra.mxu1 %v2337_v42  ;;  %1532 = vmatmul.bf16.gmra.mxu2 %v2341_v43 }
 0x306   : > { %v1241_v27 = vpop.permute.xlu0 %1240 }
 0x30a   : > { %v1261_v9 = vpop.permute.xlu1 %1260 }
 0x30e   : > { %v3045_v46 = vpop.permute.xlu0 %1345 }
 0x312   : > { %v3036_v16 = vpop.permute.xlu1 %1365 }
 0x315   : > { %1517 = vmatmul.bf16.gmra.mxu1 %v2338_v29  ;;  %1537 = vmatmul.bf16.gmra.mxu2 %v2342_v35 }
 0x31a   : > { %v3043_v21 = vpop.permute.xlu1 %1350 }
 0x322   : > { %v1246_v28 = vpop.permute.xlu1 %1245 }
 0x325   : > { %1542 = vmatmul.bf16.gmra.mxu2 %v2343_v44 }
 0x32a   : > { %v1331_v38 = vpop.permute.xlu1 %1330 }
 0x335   : > { %1547 = vmatmul.bf16.gmra.mxu2 %v2344_v45 }
 0x345   : > { %1552 = vmatmul.bf16.gmra.mxu2 %v2345_v47 }
 0x355   : > { %1557 = vmatmul.bf16.gmra.mxu2 %v2346_v51 }
 0x362   : > { %v3014_v58 = vpop.f32.mrf.mxu1 }
 0x365   : > { %1562 = vmatmul.bf16.gmra.mxu2 %v2347_v57 }
 0x368   : > { %v1523_v60 = vpop.f32.mrf.mxu2 }
 0x369   : > { %v1524_v47 = vadd.f32 %v1523_v60, %v1281_v7 }
 0x36a   : > { %v3018_v63 = vpop.f32.mrf.mxu1 }
 0x370   : > { %v1525_v1 = vpop.f32.mrf.mxu2 }
 0x371   : > { %v1526_v29 = vadd.f32 %v1525_v1, %v1286_v59 }
 0x372   : > { %v3023_v5 = vpop.f32.mrf.mxu1 }
 0x373   : > { %v1592_v51 = vmax.f32 %v1526_v29, 0.0  ;;  %v2354_v29 = vld [vmem:[%s3289_s9 + $0x14] sm:$0xf0] }
 0x375   : > { %1567 = vmatmul.bf16.gmra.mxu2 %v2348_v2 }
 0x378   : > { %v1528_v6 = vpop.f32.mrf.mxu2 }
 0x379   : > { %v1529_v41 = vadd.f32 %v1528_v6, %v1291_v54  ;;  %v1326_v54 = vpop.permute.xlu1 %1325 }
 0x37a   : > { %v3030_v12 = vpop.f32.mrf.mxu1 }
 0x380   : > { %v1530_v10 = vpop.f32.mrf.mxu2 }
 0x381   : > { %v1531_v61 = vadd.f32 %v1530_v10, %v1296_v0  ;;  %v1591_v0 = vmax.f32 %v1524_v47, 0.0 }
 0x382   : > { %v1513_v20 = vpop.f32.mrf.mxu1 }
 0x383   : > { %v1594_v35 = vmax.f32 %v1531_v61, 0.0 }
 0x385   : > { %1572 = vmatmul.bf16.gmra.mxu2 %v2349_v11 }
 0x388   : > { %v1533_v18 = vpop.f32.mrf.mxu2 }
 0x389   : > { %v1534_v40 = vadd.f32 %v1533_v18, %v1301_v52  ;;  %v1321_v52 = vpop.permute.xlu0 %1320  ;;  %v1651_v18 = vpack.c.bf16 %v1592_v51, %v1591_v0  ;;  %v2356_v0 = vld [vmem:[%s3289_s9 + $0x24] sm:$0xf0] }
 0x38a   : > { %v1515_v19 = vpop.f32.mrf.mxu1 }
 0x38b   : > { %v1595_v42 = vmax.f32 %v1534_v40, 0.0  ;;  %v1516_v11 = vadd.f32 %v1515_v19, %v1266_v17  ;;  %v1506_v17 = vadd.f32 %v3018_v63, %v1246_v28 }
 0x390   : > { %v1535_v25 = vpop.f32.mrf.mxu2 }
 0x391   : > { %v1536_v36 = vadd.f32 %v1535_v25, %v1306_v53  ;;  %v1514_v25 = vadd.f32 %v1513_v20, %v1261_v9  ;;  %v1504_v20 = vadd.f32 %v3014_v58, %v1241_v27 }
 0x392   : > { %v1518_v55 = vpop.f32.mrf.mxu1 }
 0x393   : > { %v1596_v31 = vmax.f32 %v1536_v36, 0.0  ;;  %v1519_v2 = vadd.f32 %v1518_v55, %v1271_v3  ;;  %v1509_v55 = vadd.f32 %v3023_v5, %v1251_v39  ;;  %v1587_v36 = vmax.f32 %v1514_v25, 0.0  ;;  %v2254_v5 = vld [vmem:[%s3289_s9] sm:$0xf]  ;;  %v2352_v39 = vld [vmem:[%s3289_s9 + $0x4] sm:$0xf0] }
 0x394   : > { %v2255_v58 = vor.u32 %v2352_v39, %v2254_v5 }
 0x395   : > { %1577 = vmatmul.bf16.gmra.mxu2 %v2350_v26  ;;  %v1653_v44 = vpack.c.bf16 %v1596_v31, %v1595_v42  ;;  %v1589_v60 = vmax.f32 %v1519_v2, 0.0  ;;  %v1585_v40 = vmax.f32 %v1509_v55, 0.0 }
 0x398   : > { %v1538_v15 = vpop.f32.mrf.mxu2 }
 0x399   : > { %v1539_v56 = vadd.f32 %v1538_v15, %v1311_v48  ;;  %v1593_v48 = vmax.f32 %v1529_v41, 0.0  ;;  %v1511_v15 = vadd.f32 %v3030_v12, %v1256_v24  ;;  %v1583_v24 = vmax.f32 %v1504_v20, 0.0 }
 0x39a   : > { %v1520_v45 = vpop.f32.mrf.mxu1 }
 0x39b   : > { %v1597_v23 = vmax.f32 %v1539_v56, 0.0  ;;  %v1521_v53 = vadd.f32 %v1520_v45, %v1276_v4  ;;  %v1652_v57 = vpack.c.bf16 %v1594_v35, %v1593_v48  ;;  %v1588_v4 = vmax.f32 %v1516_v11, 0.0 }
 0x39d   : > { %v1590_v59 = vmax.f32 %v1521_v53, 0.0  ;;  %v1649_v9 = vpack.c.bf16 %v1588_v4, %v1587_v36 }
 0x39f   : > { %v1650_v56 = vpack.c.bf16 %v1590_v59, %v1589_v60 }
 0x3a0   : > { %v1540_v32 = vpop.f32.mrf.mxu2 }
 0x3a1   : > { %v1541_v37 = vadd.f32 %v1540_v32, %v1316_v50  ;;  %v3047_v50 = vpop.permute.xlu2 %1355 }
 0x3a3   : > { %v1598_v30 = vmax.f32 %v1541_v37, 0.0  ;;  %v1586_v37 = vmax.f32 %v1511_v15, 0.0 }
 0x3a5   : > { %v1654_v33 = vpack.c.bf16 %v1598_v30, %v1597_v23  ;;  %v1584_v23 = vmax.f32 %v1506_v17, 0.0  ;;  %v1648_v12 = vpack.c.bf16 %v1586_v37, %v1585_v40  ;;  %v2302_v37 = vld [vmem:[%s3289_s9 + $0x60] sm:$0xf] }
 0x3a7   : > { %1823 = vmatpush.bf16.msrb.mxu3 %v1654_v33  ;;  %v1647_v31 = vpack.c.bf16 %v1584_v23, %v1583_v24 }
 0x3a8   : > { %v1543_v43 = vpop.f32.mrf.mxu2 }
 0x3a9   : > { %v1544_v10 = vadd.f32 %v1543_v43, %v1321_v52  ;;  %v1341_v3 = vpop.permute.xlu2 %1340  ;;  %v2262_v43 = vld [vmem:[%s3289_s9 + $0x10] sm:$0xf]  ;;  %v2270_v52 = vld [vmem:[%s3289_s9 + $0x20] sm:$0xf] }
 0x3aa   : > { %v2263_v45 = vor.u32 %v2354_v29, %v2262_v43  ;;  %v2256_v43 = vld [vmem:[%s3289_s9 + $0x8] sm:$0xf0] }
 0x3ab   : > { %1824 = vmatpush.bf16.msrb.mxu3 %v1653_v44  ;;  %v1599_v7 = vmax.f32 %v1544_v10, 0.0  ;;  %v2271_v10 = vor.u32 %v2356_v0, %v2270_v52  ;;  %v2288_v52 = vld [vmem:[%s3289_s9 + $0x48] sm:$0xf0] }
 0x3af   : > { %1825 = vmatpush.bf16.msrb.mxu3 %v1652_v57 }
 0x3b0   : > { %v1545_v6 = vpop.f32.mrf.mxu2 }
 0x3b1   : > { %v1546_v1 = vadd.f32 %v1545_v6, %v1326_v54  ;;  %v1336_v63 = vpop.permute.xlu2 %1335 }
 0x3b3   : > { %v1600_v26 = vmax.f32 %v1546_v1, 0.0  ;;  %1826 = vmatpush.bf16.msrb.mxu3 %v1651_v18  ;;  %v2358_v1 = vld [vmem:[%s3289_s9 + $0x34] sm:$0xf0] }
 0x3b5   : > { %v3050_v32 = vpack.c.bf16 %v1600_v26, %v1599_v7  ;;  %v2360_v7 = vld [vmem:[%s3289_s9 + $0x44] sm:$0xf0] }
 0x3b7   : > { %1827 = vmatpush.bf16.msrb.mxu3 %v1650_v56  ;;  %v2294_v56 = vld [vmem:[%s3289_s9 + $0x50] sm:$0xf] }
 0x3b8   : > { %v1548_v19 = vpop.f32.mrf.mxu2 }
 0x3b9   : > { %v1549_v30 = vadd.f32 %v1548_v19, %v1331_v38 }
 0x3bb   : > { %1828 = vmatpush.bf16.msrb.mxu3 %v1649_v9  ;;  %v1601_v27 = vmax.f32 %v1549_v30, 0.0  ;;  %v2364_v9 = vld [vmem:[%s3289_s9 + $0x64] sm:$0xf0] }
 0x3bf   : > { %1829 = vmatpush.bf16.msrb.mxu3 %v1648_v12  ;;  %v2303_v12 = vor.u32 %v2364_v9, %v2302_v37  ;;  %v1676_v9 = vpop.permute.xlu1 %1675 }
 0x3c0   : > { %v1550_v28 = vpop.f32.mrf.mxu2 }
 0x3c1   : > { %v1551_v61 = vadd.f32 %v1550_v28, %v1336_v63 }
 0x3c3   : > { %v1602_v33 = vmax.f32 %v1551_v61, 0.0  ;;  %1830 = vmatpush.bf16.msrb.mxu3 %v1647_v31 }
 0x3c5   : > { %v3061_v41 = vpack.c.bf16 %v1602_v33, %v1601_v27 }
 0x3c6   : > { %1831 = vmatmul.bf16.vlgmr.msrb.gmra.mxu3 %v2255_v58 }
 0x3c8   : > { %v1553_v38 = vpop.f32.mrf.mxu2 }
 0x3c9   : > { %v1554_v42 = vadd.f32 %v1553_v38, %v1341_v3  ;;  %v2362_v3 = vld [vmem:[%s3289_s9 + $0x54] sm:$0xf0] }
 0x3ca   : > { %v2295_v36 = vor.u32 %v2362_v3, %v2294_v56  ;;  %v1671_v3 = vpop.permute.xlu0 %1670 }
 0x3cb   : > { %v1603_v47 = vmax.f32 %v1554_v42, 0.0 }
 0x3d0   : > { %v1555_v35 = vpop.f32.mrf.mxu2 }
 0x3d1   : > { %v1556_v44 = vadd.f32 %v1555_v35, %v3045_v46  ;;  %v2353_v35 = vld [vmem:[%s3289_s9 + $0x14] sm:$0xf] }
 0x3d3   : > { %v1604_v48 = vmax.f32 %v1556_v44, 0.0 }
 0x3d5   : > { %v3070_v51 = vpack.c.bf16 %v1604_v48, %v1603_v47  ;;  %v2272_v47 = vld [vmem:[%s3289_s9 + $0x28] sm:$0xf0]  ;;  %v2357_v48 = vld [vmem:[%s3289_s9 + $0x34] sm:$0xf] }
 0x3d6   : > { %1836 = vmatmul.bf16.gmra.mxu3 %v2263_v45  ;;  %v2355_v45 = vld [vmem:[%s3289_s9 + $0x24] sm:$0xf] }
 0x3d8   : > { %v1558_v53 = vpop.f32.mrf.mxu2 }
 0x3d9   : > { %v1559_v57 = vadd.f32 %v1558_v53, %v3043_v21  ;;  %v2278_v21 = vld [vmem:[%s3289_s9 + $0x30] sm:$0xf] }
 0x3da   : > { %v2279_v25 = vor.u32 %v2358_v1, %v2278_v21  ;;  %v2365_v1 = vld [vmem:[%s3289_s9 + $0x74] sm:$0xf] }
 0x3db   : > { %v1605_v54 = vmax.f32 %v1559_v57, 0.0  ;;  %v2359_v57 = vld [vmem:[%s3289_s9 + $0x44] sm:$0xf] }
 0x3dc   : > { %v2291_v0 = vor.u32 %v2359_v57, %v2288_v52 }
 0x3e0   : > { %v1560_v2 = vpop.f32.mrf.mxu2 }
 0x3e1   : > { %v1561_v46 = vadd.f32 %v1560_v2, %v3047_v50  ;;  %v2286_v50 = vld [vmem:[%s3289_s9 + $0x40] sm:$0xf]  ;;  %v2361_v2 = vld [vmem:[%s3289_s9 + $0x54] sm:$0xf] }
 0x3e2   : > { %v2287_v15 = vor.u32 %v2360_v7, %v2286_v50  ;;  %v1666_v7 = vpop.permute.xlu2 %1665 }
 0x3e3   : > { %v1606_v6 = vmax.f32 %v1561_v46, 0.0  ;;  %v2296_v46 = vld [vmem:[%s3289_s9 + $0x58] sm:$0xf0] }
 0x3e5   : > { %v1658_v11 = vpack.c.bf16 %v1606_v6, %v1605_v54  ;;  %v2363_v54 = vld [vmem:[%s3289_s9 + $0x64] sm:$0xf]  ;;  %v2304_v6 = vld [vmem:[%s3289_s9 + $0x68] sm:$0xf0] }
 0x3e6   : > { %1841 = vmatmul.bf16.gmra.mxu3 %v2271_v10  ;;  %v2299_v10 = vor.u32 %v2361_v2, %v2296_v46 }
 0x3e8   : > { %v1563_v59 = vpop.f32.mrf.mxu2 }
 0x3f0   : > { %v1565_v18 = vpop.f32.mrf.mxu2 }
 0x3f1   : > { %v1566_v31 = vadd.f32 %v1565_v18, %v3036_v16  ;;  %v2312_v18 = vld [vmem:[%s3289_s9 + $0x78] sm:$0xf0] }
 0x3f6   : > { %1846 = vmatmul.bf16.gmra.mxu3 %v2279_v25  ;;  %v2315_v25 = vor.u32 %v2365_v1, %v2312_v18 }
 0x3f8   : > { %v1568_v60 = vpop.f32.mrf.mxu2 }
 0x3f9   : > { %v1569_v28 = vadd.f32 %v1568_v60, %v3038_v22  ;;  %v2366_v22 = vld [vmem:[%s3289_s9 + $0x74] sm:$0xf0] }
 0x3fb   : > { %v1609_v27 = vmax.f32 %v1569_v28, 0.0 }
 0x400   : > { %v1570_v26 = vpop.f32.mrf.mxu2 }
 0x406   : > { %1851 = vmatmul.bf16.gmra.mxu3 %v2287_v15 }
 0x408   : > { %v1573_v4 = vpop.f32.mrf.mxu2 }
 0x409   : > { %v1574_v24 = vadd.f32 %v1573_v4, %v3016_v62  ;;  %v1608_v62 = vmax.f32 %v1566_v31, 0.0 }
 0x40b   : > { %v1611_v61 = vmax.f32 %v1574_v24, 0.0 }
 0x410   : > { %v1575_v55 = vpop.f32.mrf.mxu2 }
 0x411   : > { %v1576_v40 = vadd.f32 %v1575_v55, %v3032_v13 }
 0x413   : > { %v1612_v39 = vmax.f32 %v1576_v40, 0.0 }
 0x415   : > { %v1661_v13 = vpack.c.bf16 %v1612_v39, %v1611_v61  ;;  %v1686_v61 = vpop.permute.xlu0 %1685 }
 0x416   : > { %1856 = vmatmul.bf16.gmra.mxu3 %v2295_v36 }
 0x418   : > { %v1578_v19 = vpop.f32.mrf.mxu2 }
 0x419   : > { %v1579_v17 = vadd.f32 %v1578_v19, %v3007_v34  ;;  %v1571_v34 = vadd.f32 %v1570_v26, %v3025_v8  ;;  %v2310_v8 = vld [vmem:[%s3289_s9 + $0x70] sm:$0xf] }
 0x41a   : > { %v2311_v16 = vor.u32 %v2366_v22, %v2310_v8 }
 0x41b   : > { %v1613_v30 = vmax.f32 %v1579_v17, 0.0  ;;  %v1610_v58 = vmax.f32 %v1571_v34, 0.0 }
 0x41d   : > { %v1660_v33 = vpack.c.bf16 %v1610_v58, %v1609_v27 }
 0x420   : > { %v1580_v20 = vpop.f32.mrf.mxu2 }
 0x421   : > { %v1581_v23 = vadd.f32 %v1580_v20, %v3009_v49  ;;  %v1564_v49 = vadd.f32 %v1563_v59, %v3034_v14  ;;  %v2351_v14 = vld [vmem:[%s3289_s9 + $0x4] sm:$0xf]  ;;  %v2307_v59 = vor.u32 %v2363_v54, %v2304_v6 }
 0x422   : > { %v2259_v29 = vor.u32 %v2351_v14, %v2256_v43 }
 0x423   : > { %v1614_v5 = vmax.f32 %v1581_v23, 0.0  ;;  %v1607_v38 = vmax.f32 %v1564_v49, 0.0 }
 0x425   : > { %v1662_v63 = vpack.c.bf16 %v1614_v5, %v1613_v30  ;;  %v1659_v42 = vpack.c.bf16 %v1608_v62, %v1607_v38  ;;  %v1681_v30 = vpop.permute.xlu2 %1680  ;;  %v1691_v62 = vpop.permute.xlu1 %1690 }
 0x426   : > { %1861 = vmatmul.bf16.gmra.mxu3 %v2303_v12 }
 0x427   : > { %1872 = vmatpush.bf16.msrb.mxu0 %v1662_v63 }
 0x42b   : > { %1873 = vmatpush.bf16.msrb.mxu0 %v1661_v13 }
 0x42f   : > { %1874 = vmatpush.bf16.msrb.mxu0 %v1660_v33 }
 0x433   : > { %1875 = vmatpush.bf16.msrb.mxu0 %v1659_v42  ;;  %v1696_v42 = vpop.permute.xlu2 %1695 }
 0x436   : > { %1866 = vmatmul.bf16.gmra.mxu3 %v2311_v16 }
 0x437   : > { %1876 = vmatpush.bf16.msrb.mxu0 %v1658_v11 }
 0x43b   : > { %1877 = vmatpush.bf16.msrb.mxu0 %v3070_v51  ;;  %v2280_v51 = vld [vmem:[%s3289_s9 + $0x38] sm:$0xf0]  ;;  %v1711_v46 = vpop.permute.xlu2 %1710 }
 0x43c   : > { %v2283_v53 = vor.u32 %v2357_v48, %v2280_v51  ;;  %v1706_v51 = vpop.permute.xlu1 %1705 }
 0x43f   : > { %1878 = vmatpush.bf16.msrb.mxu0 %v3061_v41  ;;  %v2264_v41 = vld [vmem:[%s3289_s9 + $0x18] sm:$0xf0] }
 0x440   : > { %v2267_v44 = vor.u32 %v2353_v35, %v2264_v41  ;;  %v1701_v41 = vpop.permute.xlu0 %1700 }
 0x443   : > { %1879 = vmatpush.bf16.msrb.mxu0 %v3050_v32  ;;  %v2275_v32 = vor.u32 %v2355_v45, %v2272_v47 }
 0x446   : > { %1880 = vmatmul.bf16.vlgmr.msrb.gmra.mxu0 %v2259_v29 }
 0x449   : > { %v1832_v11 = vpop.f32.mrf.mxu3 }
 0x44a   : > { %v1833_v26 = vadd.f32 %v1832_v11, %v1666_v7  ;;  %v1721_v7 = vpop.permute.xlu1 %1720 }
 0x451   : > { %v1834_v21 = vpop.f32.mrf.mxu3 }
 0x452   : > { %v1835_v36 = vadd.f32 %v1834_v21, %v1671_v3  ;;  %v1716_v21 = vpop.permute.xlu0 %1715 }
 0x456   : > { %1885 = vmatmul.bf16.gmra.mxu0 %v2267_v44 }
 0x459   : > { %v1837_v60 = vpop.f32.mrf.mxu3 }
 0x45a   : > { %v1838_v20 = vadd.f32 %v1837_v60, %v1676_v9  ;;  %v2455_v60 = vmov -inf  }
 0x45b   : > { %451 = vst.msk [vmem:[%s3183_s14] sm:$0xff] %vm450_vm2, %v2455_v60 }
 0x45c   : > { %452 = vst.msk [vmem:[%s3183_s14 + $0x8] sm:$0xff] %vm450_vm2, %v2455_v60 }
 0x45d   : > { %453 = vst.msk [vmem:[%s3183_s14 + $0x10] sm:$0xff] %vm450_vm2, %v2455_v60 }
 0x45e   : > { %454 = vst.msk [vmem:[%s3183_s14 + $0x18] sm:$0xff] %vm450_vm2, %v2455_v60 }
 0x45f   : > { %455 = vst.msk [vmem:[%s3183_s14 + $0x20] sm:$0xff] %vm450_vm2, %v2455_v60 }
 0x460   : > { %456 = vst.msk [vmem:[%s3183_s14 + $0x28] sm:$0xff] %vm450_vm2, %v2455_v60 }
 0x461   : > { %v1839_v50 = vpop.f32.mrf.mxu3  ;;  %457 = vst.msk [vmem:[%s3183_s14 + $0x30] sm:$0xff] %vm450_vm2, %v2455_v60 }
 0x462   : > { %v1840_v5 = vadd.f32 %v1839_v50, %v1681_v30  ;;  %458 = vst.msk [vmem:[%s3183_s14 + $0x38] sm:$0xff] %vm450_vm2, %v2455_v60 }
 0x463   : > { %459 = vst.msk [vmem:[%s3183_s14 + $0x40] sm:$0xff] %vm450_vm2, %v2455_v60 }
 0x464   : > { %460 = vst.msk [vmem:[%s3183_s14 + $0x48] sm:$0xff] %vm450_vm2, %v2455_v60 }
 0x465   : > { %461 = vst.msk [vmem:[%s3183_s14 + $0x50] sm:$0xff] %vm450_vm2, %v2455_v60 }
 0x466   : > { %1890 = vmatmul.bf16.gmra.mxu0 %v2275_v32  ;;  %462 = vst.msk [vmem:[%s3183_s14 + $0x58] sm:$0xff] %vm450_vm2, %v2455_v60 }
 0x467   : > { %463 = vst.msk [vmem:[%s3183_s14 + $0x60] sm:$0xff] %vm450_vm2, %v2455_v60 }
 0x468   : > { %464 = vst.msk [vmem:[%s3183_s14 + $0x68] sm:$0xff] %vm450_vm2, %v2455_v60 }
 0x469   : > { %v1842_v55 = vpop.f32.mrf.mxu3  ;;  %465 = vst.msk [vmem:[%s3183_s14 + $0x70] sm:$0xff] %vm450_vm2, %v2455_v60 }
 0x46a   : > { %v1843_v31 = vadd.f32 %v1842_v55, %v1686_v61  ;;  %v1726_v55 = vpop.permute.xlu2 %1725  ;;  %466 = vst.msk [vmem:[%s3183_s14 + $0x78] sm:$0xff] %vm450_vm2, %v2455_v60 }
 0x46d   : > { %v1981_v60 = vld [vmem:[%s3183_s14 + $0x58] sm:$0xff] }
 0x471   : > { %v1844_v40 = vpop.f32.mrf.mxu3 }
 0x472   : > { %v1845_v33 = vadd.f32 %v1844_v40, %v1691_v62 }
 0x476   : > { %1895 = vmatmul.bf16.gmra.mxu0 %v2283_v53 }
 0x479   : > { %v1847_v63 = vpop.f32.mrf.mxu3 }
 0x47a   : > { %v1848_v14 = vadd.f32 %v1847_v63, %v1696_v42 }
 0x481   : > { %v1849_v27 = vpop.f32.mrf.mxu3 }
 0x482   : > { %v1850_v44 = vadd.f32 %v1849_v27, %v1701_v41 }
 0x486   : > { %1900 = vmatmul.bf16.gmra.mxu0 %v2291_v0 }
 0x489   : > { %v1852_v16 = vpop.f32.mrf.mxu3 }
 0x48a   : > { %v1853_v53 = vadd.f32 %v1852_v16, %v1706_v51  ;;  %v1972_v16 = vld [vmem:[%s3183_s14 + $0x10] sm:$0xff] }
 0x491   : > { %v1854_v45 = vpop.f32.mrf.mxu3 }
 0x496   : > { %1905 = vmatmul.bf16.gmra.mxu0 %v2299_v10  ;;  %v1855_v10 = vadd.f32 %v1854_v45, %v1711_v46 }
 0x499   : > { %v1857_v0 = vpop.f32.mrf.mxu3 }
 0x49a   : > { %v1858_v1 = vadd.f32 %v1857_v0, %v1716_v21  ;;  %v1977_v0 = vld [vmem:[%s3183_s14 + $0x38] sm:$0xff] }
 0x4a6   : > { %1910 = vmatmul.bf16.gmra.mxu0 %v2307_v59  ;;  %v1859_v59 = vpop.f32.mrf.mxu3 }
 0x4b6   : > { %1915 = vmatmul.bf16.gmra.mxu0 %v2315_v25 }
 0x4c3   : > { %v1881_v15 = vpop.f32.mrf.mxu0 }
 0x4c4   : > { %v1882_v4 = vadd.f32 %v1881_v15, %v1833_v26  ;;  %v1862_v26 = vpop.f32.mrf.mxu3  ;;  %v1860_v15 = vadd.f32 %v1859_v59, %v1721_v7 }
 0x4c6   : > { %v1922_v56 = vsel %vm1921_vm1, %v1882_v4, -inf }
 0x4c7   : > { %1923 = vmax.xlane.f32.xlu0 %v1922_v56 }
 0x4cb   : > { %v1883_v19 = vpop.f32.mrf.mxu0 }
 0x4cc   : > { %v1884_v17 = vadd.f32 %v1883_v19, %v1835_v36  ;;  %v1863_v36 = vadd.f32 %v1862_v26, %v1726_v55  ;;  %v1864_v19 = vpop.f32.mrf.mxu3  ;;  %v1982_v26 = vld [vmem:[%s3183_s14 + $0x60] sm:$0xff] }
 0x4ce   : > { %v1925_v37 = vsel %vm1921_vm1, %v1884_v17, -inf }
 0x4cf   : > { %1926 = vmax.xlane.f32.xlu1 %v1925_v37 }
 0x4d3   : > { %v1886_v23 = vpop.f32.mrf.mxu0 }
 0x4d4   : > { %v1887_v12 = vadd.f32 %v1886_v23, %v1838_v20  ;;  %v1731_v20 = vpop.permute.xlu0 %1730 }
 0x4d5   : > { %v1865_v40 = vadd.f32 %v1864_v19, %v1731_v20 }
 0x4d6   : > { %v1928_v24 = vsel %vm1921_vm1, %v1887_v12, -inf }
 0x4d7   : > { %1929 = vmax.xlane.f32.xlu2 %v1928_v24  ;;  %v1867_v24 = vpop.f32.mrf.mxu3 }
 0x4db   : > { %v1888_v34 = vpop.f32.mrf.mxu0 }
 0x4dc   : > { %v1889_v39 = vadd.f32 %v1888_v34, %v1840_v5  ;;  %v1736_v5 = vpop.permute.xlu1 %1735 }
 0x4dd   : > { %v1868_v34 = vadd.f32 %v1867_v24, %v1736_v5 }
 0x4de   : > { %v1931_v28 = vsel %vm1921_vm1, %v1889_v39, -inf }
 0x4df   : > { %1932 = vmax.xlane.f32.xlu2 %v1931_v28  ;;  %v1869_v61 = vpop.f32.mrf.mxu3 }
 0x4e3   : > { %v1891_v58 = vpop.f32.mrf.mxu0 }
 0x4e4   : > { %v1892_v13 = vadd.f32 %v1891_v58, %v1843_v31  ;;  %v1970_v31 = vld [vmem:[%s3183_s14] sm:$0xff]  ;;  %v1741_v58 = vpop.permute.xlu2 %1740 }
 0x4e6   : > { %v1934_v49 = vsel %vm1921_vm1, %v1892_v13, -inf  ;;  %v1870_v13 = vadd.f32 %v1869_v61, %v1741_v58 }
 0x4e7   : > { %1935 = vmax.xlane.f32.xlu0 %v1934_v49 }
 0x4eb   : > { %v1893_v38 = vpop.f32.mrf.mxu0 }
 0x4ec   : > { %v1894_v8 = vadd.f32 %v1893_v38, %v1845_v33 }
 0x4ee   : > { %v1937_v22 = vsel %vm1921_vm1, %v1894_v8, -inf  ;;  %v1971_v8 = vld [vmem:[%s3183_s14 + $0x8] sm:$0xff] }
 0x4ef   : > { %1938 = vmax.xlane.f32.xlu1 %v1937_v22 }
 0x4f3   : > { %v1896_v43 = vpop.f32.mrf.mxu0 }
 0x4f4   : > { %v1897_v29 = vadd.f32 %v1896_v43, %v1848_v14 }
 0x4f6   : > { %v1940_v35 = vsel %vm1921_vm1, %v1897_v29, -inf  ;;  %v1973_v29 = vld [vmem:[%s3183_s14 + $0x18] sm:$0xff] }
 0x4f7   : > { %1941 = vmax.xlane.f32.xlu2 %v1940_v35 }
 0x4fb   : > { %v1898_v47 = vpop.f32.mrf.mxu0 }
 0x4fc   : > { %v1899_v32 = vadd.f32 %v1898_v47, %v1850_v44  ;;  %v1974_v44 = vld [vmem:[%s3183_s14 + $0x20] sm:$0xff] }
 0x4fe   : > { %v1943_v48 = vsel %vm1921_vm1, %v1899_v32, -inf  ;;  %v1975_v32 = vld [vmem:[%s3183_s14 + $0x28] sm:$0xff] }
 0x4ff   : > { %1944 = vmax.xlane.f32.xlu0 %v1943_v48 }
 0x503   : > { %v1901_v57 = vpop.f32.mrf.mxu0 }
 0x504   : > { %v1902_v52 = vadd.f32 %v1901_v57, %v1853_v53  ;;  %v1976_v53 = vld [vmem:[%s3183_s14 + $0x30] sm:$0xff] }
 0x506   : > { %v1946_v2 = vsel %vm1921_vm1, %v1902_v52, -inf }
 0x507   : > { %1947 = vmax.xlane.f32.xlu1 %v1946_v2 }
 0x50b   : > { %v1903_v54 = vpop.f32.mrf.mxu0 }
 0x50c   : > { %v1904_v6 = vadd.f32 %v1903_v54, %v1855_v10  ;;  %v1978_v10 = vld [vmem:[%s3183_s14 + $0x40] sm:$0xff] }
 0x50e   : > { %v1949_v11 = vsel %vm1921_vm1, %v1904_v6, -inf }
 0x50f   : > { %1950 = vmax.xlane.f32.xlu2 %v1949_v11  ;;  %v1979_v11 = vld [vmem:[%s3183_s14 + $0x48] sm:$0xff] }
 0x513   : > { %v1906_v18 = vpop.f32.mrf.mxu0 }
 0x514   : > { %v1907_v25 = vadd.f32 %v1906_v18, %v1858_v1  ;;  %v1980_v1 = vld [vmem:[%s3183_s14 + $0x50] sm:$0xff] }
 0x516   : > { %v1952_v50 = vsel %vm1921_vm1, %v1907_v25, -inf }
 0x517   : > { %1953 = vmax.xlane.f32.xlu0 %v1952_v50 }
 0x51b   : > { %v1908_v4 = vpop.f32.mrf.mxu0 }
 0x51c   : > { %v1909_v56 = vadd.f32 %v1908_v4, %v1860_v15 }
 0x51e   : > { %v1955_v3 = vsel %vm1921_vm1, %v1909_v56, -inf  ;;  %v1983_v56 = vld [vmem:[%s3183_s14 + $0x68] sm:$0xff] }
 0x51f   : > { %1956 = vmax.xlane.f32.xlu1 %v1955_v3 }
 0x523   : > { %v1911_v17 = vpop.f32.mrf.mxu0 }
 0x524   : > { %v1912_v37 = vadd.f32 %v1911_v17, %v1863_v36  ;;  %v1984_v36 = vld [vmem:[%s3183_s14 + $0x70] sm:$0xff] }
 0x526   : > { %v1958_v9 = vsel %vm1921_vm1, %v1912_v37, -inf  ;;  %v1985_v37 = vld [vmem:[%s3183_s14 + $0x78] sm:$0xff] }
 0x527   : > { %1959 = vmax.xlane.f32.xlu2 %v1958_v9 }
 0x52b   : > { %v1913_v23 = vpop.f32.mrf.mxu0 }
 0x52c   : > { %v1914_v12 = vadd.f32 %v1913_v23, %v1865_v40 }
 0x52e   : > { %v1961_v30 = vsel %vm1921_vm1, %v1914_v12, -inf }
 0x52f   : > { %1962 = vmax.xlane.f32.xlu0 %v1961_v30 }
 0x533   : > { %v1916_v39 = vpop.f32.mrf.mxu0 }
 0x534   : > { %v1917_v63 = vadd.f32 %v1916_v39, %v1868_v34 }
 0x536   : > { %v1964_v28 = vsel %vm1921_vm1, %v1917_v63, -inf }
 0x537   : > { %1965 = vmax.xlane.f32.xlu1 %v1964_v28 }
 0x53a   : > { %v1924_v49 = vpop.xlane.xlu0 %1923 }
 0x53b   : > { %v1986_v27 = vmax.f32 %v1970_v31, %v1924_v49  ;;  %v1918_v62 = vpop.f32.mrf.mxu0 }
 0x53c   : > { %v1919_v33 = vadd.f32 %v1918_v62, %v1870_v13 }
 0x53d   : > { %2003 = vst.msk [vmem:[%s3183_s14] sm:$0xff] %vm450_vm2, %v1986_v27 }
 0x53e   : > { %v1967_v38 = vsel %vm1921_vm1, %v1919_v33, -inf }
 0x53f   : > { %1968 = vmax.xlane.f32.xlu2 %v1967_v38 }
 0x542   : > { %v1927_v22 = vpop.xlane.xlu1 %1926 }
 0x543   : > { %v1987_v42 = vmax.f32 %v1971_v8, %v1927_v22 }
 0x545   : > { %2004 = vst.msk [vmem:[%s3183_s14 + $0x8] sm:$0xff] %vm450_vm2, %v1987_v42 }
 0x54a   : > { %v1930_v14 = vpop.xlane.xlu2 %1929 }
 0x54b   : > { %v1988_v43 = vmax.f32 %v1972_v16, %v1930_v14 }
 0x54d   : > { %2005 = vst.msk [vmem:[%s3183_s14 + $0x10] sm:$0xff] %vm450_vm2, %v1988_v43 }
 0x552   : > { %v1933_v35 = vpop.xlane.xlu2 %1932 }
 0x553   : > { %v1989_v41 = vmax.f32 %v1973_v29, %v1933_v35 }
 0x555   : > { %2006 = vst.msk [vmem:[%s3183_s14 + $0x18] sm:$0xff] %vm450_vm2, %v1989_v41 }
 0x55a   : > { %v1936_v45 = vpop.xlane.xlu0 %1935 }
 0x55b   : > { %v1990_v47 = vmax.f32 %v1974_v44, %v1936_v45 }
 0x55d   : > { %2007 = vst.msk [vmem:[%s3183_s14 + $0x20] sm:$0xff] %vm450_vm2, %v1990_v47 }
 0x562   : > { %v1939_v48 = vpop.xlane.xlu1 %1938 }
 0x563   : > { %v1991_v51 = vmax.f32 %v1975_v32, %v1939_v48 }
 0x565   : > { %2008 = vst.msk [vmem:[%s3183_s14 + $0x28] sm:$0xff] %vm450_vm2, %v1991_v51 }
 0x56a   : > { %v1942_v57 = vpop.xlane.xlu2 %1941 }
 0x56b   : > { %v1992_v52 = vmax.f32 %v1976_v53, %v1942_v57 }
 0x56d   : > { %2009 = vst.msk [vmem:[%s3183_s14 + $0x30] sm:$0xff] %vm450_vm2, %v1992_v52 }
 0x572   : > { %v1945_v2 = vpop.xlane.xlu0 %1944 }
 0x573   : > { %v1993_v46 = vmax.f32 %v1977_v0, %v1945_v2 }
 0x575   : > { %2010 = vst.msk [vmem:[%s3183_s14 + $0x38] sm:$0xff] %vm450_vm2, %v1993_v46 }
 0x57a   : > { %v1948_v54 = vpop.xlane.xlu1 %1947 }
 0x57b   : > { %v1994_v6 = vmax.f32 %v1978_v10, %v1948_v54 }
 0x57d   : > { %2011 = vst.msk [vmem:[%s3183_s14 + $0x40] sm:$0xff] %vm450_vm2, %v1994_v6 }
 0x582   : > { %v1951_v59 = vpop.xlane.xlu2 %1950 }
 0x583   : > { %v1995_v21 = vmax.f32 %v1979_v11, %v1951_v59 }
 0x585   : > { %2012 = vst.msk [vmem:[%s3183_s14 + $0x48] sm:$0xff] %vm450_vm2, %v1995_v21 }
 0x58a   : > { %v1954_v18 = vpop.xlane.xlu0 %1953 }
 0x58b   : > { %v1996_v25 = vmax.f32 %v1980_v1, %v1954_v18 }
 0x58d   : > { %2013 = vst.msk [vmem:[%s3183_s14 + $0x50] sm:$0xff] %vm450_vm2, %v1996_v25 }
 0x592   : > { %v1957_v50 = vpop.xlane.xlu1 %1956 }
 0x593   : > { %v1997_v7 = vmax.f32 %v1981_v60, %v1957_v50 }
 0x595   : > { %2014 = vst.msk [vmem:[%s3183_s14 + $0x58] sm:$0xff] %vm450_vm2, %v1997_v7 }
 0x59a   : > { %v1960_v15 = vpop.xlane.xlu2 %1959 }
 0x59b   : > { %v1998_v4 = vmax.f32 %v1982_v26, %v1960_v15 }
 0x59d   : > { %2015 = vst.msk [vmem:[%s3183_s14 + $0x60] sm:$0xff] %vm450_vm2, %v1998_v4 }
 0x5a2   : > { %v1963_v3 = vpop.xlane.xlu0 %1962 }
 0x5a3   : > { %v1999_v55 = vmax.f32 %v1983_v56, %v1963_v3 }
 0x5a5   : > { %2016 = vst.msk [vmem:[%s3183_s14 + $0x68] sm:$0xff] %vm450_vm2, %v1999_v55 }
 0x5aa   : > { %v1966_v19 = vpop.xlane.xlu1 %1965 }
 0x5ab   : > { %v2000_v17 = vmax.f32 %v1984_v36, %v1966_v19 }
 0x5ad   : > { %2017 = vst.msk [vmem:[%s3183_s14 + $0x70] sm:$0xff] %vm450_vm2, %v2000_v17 }
 0x5b2   : > { %v1969_v9 = vpop.xlane.xlu2 %1968 }
 0x5b3   : > { %v2001_v20 = vmax.f32 %v1985_v37, %v1969_v9 }
 0x5b5   : > { %2018 = vst.msk [vmem:[%s3183_s14 + $0x78] sm:$0xff] %vm450_vm2, %v2001_v20 }
 0x5b6 PF: > { %s21_s19 = sadd.s32 1, %s2450_s19   ;;  %s3292_s17 = smov %s2446_s18 }
 0x5b7   : > { %p18_p5 = scmp.ge.s32.totalorder %s21_s19, 4   ;;  %s3293_s18 = smov %s3295_s20 }
 0x5b9   :  { %20 = sbr.rel (!%p18_p5) target bundleno = 2 (0x2), region = 98 }

</bundles_post_ra>
